<compile_context>
chip_gen: v6e
topology: v6e:2x2x1
jax: 0.10.0
libtpu: 0.0.40
codegen_flags: <defaults>
</compile_context>

<pallas_src>
import jax
import jax.numpy as jnp
from jax import lax
from jax.experimental import pallas as pl
from jax.experimental.pallas import tpu as pltpu


def _make_bbox_kernel(N, Cin, Cout, H, W, pad, out_dtype):
    HW = H * W

    def kernel(x_ref, w_ref, b_ref, o_ref, xpad_ref):
        # x_ref   : (N*Cin, H*W)              VMEM  input planes (flattened spatial)
        # w_ref   : (Cout*Cin*9,)             SMEM  conv weights (OIHW, row-major flat)
        # b_ref   : (Cout,)                   SMEM  bias
        # o_ref   : (N*Cout, H*W)             VMEM  output planes (flattened spatial)
        # xpad_ref: (N*Cin, pad + H*W + pad)  VMEM  f32 scratch with a zero halo in lanes

        # Zero the halo once, then drop the input into the lane-aligned interior
        # (pad is a multiple of 128, so this store is unmasked / aligned).
        xpad_ref[...] = jnp.zeros_like(xpad_ref)
        xpad_ref[:, pad:pad + HW] = x_ref[...].astype(jnp.float32)

        # Column index of every flattened pixel.  Shifting the flat plane by
        # dy*W + dx handles the y-boundary automatically (it falls into the zero
        # halo); only the x-direction row wrap needs masking.
        col = lax.broadcasted_iota(jnp.int32, (1, HW), 1) % W
        ok_dxm1 = col >= 1         # tap dx = -1 is invalid at x == 0
        ok_dxp1 = col < (W - 1)    # tap dx = +1 is invalid at x == W-1

        # f32 accumulators: one (1, H*W) lane-dense plane per (n, co), seeded with bias.
        accs = [jnp.zeros((1, HW), jnp.float32) + b_ref[co]
                for _ in range(N) for co in range(Cout)]

        # 3x3 conv = 9 shifted planes x (Cin*Cout) scalar-broadcast VPU FMAs.
        for ky in range(3):
            for kx in range(3):
                dy, dx = ky - 1, kx - 1
                shift = dy * W + dx
                # Statically-offset slice of the padded plane stack: (N*Cin, H*W).
                sh = xpad_ref[:, pad + shift:pad + shift + HW]
                if dx == -1:
                    sh = jnp.where(ok_dxm1, sh, 0.0)
                elif dx == 1:
                    sh = jnp.where(ok_dxp1, sh, 0.0)
                for n in range(N):
                    for ci in range(Cin):
                        row = n * Cin + ci
                        xrow = sh[row:row + 1, :]                 # (1, H*W)
                        w_base = (ci * 3 + ky) * 3 + kx
                        for co in range(Cout):
                            w_s = w_ref[co * Cin * 9 + w_base]    # SMEM scalar
                            r = n * Cout + co
                            accs[r] = accs[r] + w_s * xrow

        # Lane-dense (H*W-wide) output stores.
        for r in range(N * Cout):
            o_ref[r:r + 1, :] = accs[r].astype(out_dtype)

    return kernel


def bbox_head_forward(x_nchw, weight_oihw, bias):
    """Conv2d(Cin, 5, kernel_size=3, padding=1): (N, Cin, H, W) -> (N, 5, H, W)."""
    N, Cin, H, W = x_nchw.shape
    Cout = weight_oihw.shape[0]
    HW = H * W
    # Lane-aligned halo width: must cover the max shift |dy*W + dx| = W + 1 and keep
    # the interior store 128-aligned.
    pad = ((W + 1 + 127) // 128) * 128

    # Free, contiguous reshapes only (no transposes, no wrapper-side padding passes).
    x2d = x_nchw.reshape(N * Cin, HW)
    w_flat = weight_oihw.astype(jnp.float32).reshape(Cout * Cin * 9)
    b_flat = bias.astype(jnp.float32).reshape(Cout)

    kernel = _make_bbox_kernel(N, Cin, Cout, H, W, pad, x_nchw.dtype)

    itemsize = jnp.dtype(x_nchw.dtype).itemsize
    flops = 2 * N * Cout * Cin * 9 * HW + N * Cout * HW
    bytes_accessed = int(N * Cin * HW * itemsize + w_flat.size * 4 + b_flat.size * 4
                         + N * Cout * HW * itemsize)

    out2d = pl.pallas_call(
        kernel,
        out_shape=jax.ShapeDtypeStruct((N * Cout, HW), x_nchw.dtype),
        in_specs=[
            pl.BlockSpec(memory_space=pltpu.MemorySpace.VMEM),   # input planes
            pl.BlockSpec(memory_space=pltpu.MemorySpace.SMEM),   # weights as scalars
            pl.BlockSpec(memory_space=pltpu.MemorySpace.SMEM),   # bias as scalars
        ],
        out_specs=pl.BlockSpec(memory_space=pltpu.MemorySpace.VMEM),
        scratch_shapes=[pltpu.VMEM((N * Cin, pad + HW + pad), jnp.float32)],
        cost_estimate=pl.CostEstimate(flops=flops, transcendentals=0,
                                      bytes_accessed=bytes_accessed),
    )(x2d, w_flat, b_flat)

    # (N*Cout, H*W) is exactly (N, Cout, H, W) in row-major order -> free reshape.
    return out2d.reshape(N, Cout, H, W)


if __name__ == "__main__":
    # Small, deterministic inputs consistent with the module.
    N, Cin, H, W = 2, 4, 16, 16
    Cout = 5

    key = jax.random.PRNGKey(0)
    k_x, k_w, k_b = jax.random.split(key, 3)
    x = jax.random.normal(k_x, (N, Cin, H, W), dtype=jnp.float32)
    # Deterministic synthetic parameters (same shapes as nn.Conv2d(Cin, 5, 3)).
    fan_in = Cin * 3 * 3
    bound = 1.0 / (fan_in ** 0.5)
    weight = jax.random.uniform(k_w, (Cout, Cin, 3, 3), jnp.float32, -bound, bound)
    bias = jax.random.uniform(k_b, (Cout,), jnp.float32, -bound, bound)

    out = jax.jit(bbox_head_forward)(x, weight, bias)
    out = jax.block_until_ready(out)
    assert out.shape == (N, Cout, H, W), out.shape

    # Cross-check against XLA's conv (same semantics as torch Conv2d, pad=1).
    ref = lax.conv_general_dilated(
        x, weight, window_strides=(1, 1), padding=((1, 1), (1, 1)),
        dimension_numbers=("NCHW", "OIHW", "NCHW"),
    ) + bias.reshape(1, Cout, 1, 1)
    assert jnp.allclose(out, ref, atol=1e-4, rtol=1e-4), float(
        jnp.max(jnp.abs(out - ref)))

    print("KERNEL_OK")
</pallas_src>

<mosaic_0001>
module attributes {stable_mosaic.version = 11 : i64} {
  func.func @kernel(%arg0: memref<8x256xf32, #tpu.memory_space<vmem>>, %arg1: memref<180xf32, #tpu.memory_space<smem>>, %arg2: memref<5xf32, #tpu.memory_space<smem>>, %arg3: memref<10x256xf32, #tpu.memory_space<vmem>>, %arg4: memref<8x512xf32, #tpu.memory_space<vmem>>) attributes {dimension_semantics = [], scalar_prefetch = 0 : i64, scratch_operands = 1 : i64, tpu.core_type = #tpu.core_type<tc>} {
    %cst = arith.constant 0.000000e+00 : f32
    %0 = vector.broadcast %cst : f32 to vector<8x512xf32>
    %c0 = arith.constant 0 : index
    %c0_0 = arith.constant 0 : index
    %1 = vector.load %arg4[%c0, %c0_0] : memref<8x512xf32, #tpu.memory_space<vmem>>, vector<8x512xf32>
    tpu.vector_store %arg4[%c0, %c0_0], %0 {strides = array<i32>} : memref<8x512xf32, #tpu.memory_space<vmem>>, vector<8x512xf32>,
    %c0_1 = arith.constant 0 : index
    %c0_2 = arith.constant 0 : index
    %2 = vector.load %arg0[%c0_1, %c0_2] : memref<8x256xf32, #tpu.memory_space<vmem>>, vector<8x256xf32>
    %c0_3 = arith.constant 0 : index
    %c128 = arith.constant 128 : index
    %3 = vector.load %arg4[%c0_3, %c128] : memref<8x512xf32, #tpu.memory_space<vmem>>, vector<8x256xf32>
    tpu.vector_store %arg4[%c0_3, %c128], %2 {strides = array<i32>} : memref<8x512xf32, #tpu.memory_space<vmem>>, vector<8x256xf32>,
    %4 = tpu.iota {dimensions = array<i32: 1>} : vector<1x256xi32>
    %c16_i32 = arith.constant 16 : i32
    %c0_i32 = arith.constant 0 : i32
    %5 = arith.cmpi eq, %c16_i32, %c0_i32 : i32
    %c1_i32 = arith.constant 1 : i32
    %6 = arith.select %5, %c1_i32, %c16_i32 : i32
    %7 = vector.broadcast %6 : i32 to vector<1x256xi32>
    %8 = arith.remsi %4, %7 : vector<1x256xi32>
    %c0_i32_4 = arith.constant 0 : i32
    %9 = vector.broadcast %c0_i32_4 : i32 to vector<1x256xi32>
    %10 = arith.cmpi ne, %8, %9 : vector<1x256xi32>
    %c0_i32_5 = arith.constant 0 : i32
    %11 = vector.broadcast %c0_i32_5 : i32 to vector<1x256xi32>
    %12 = arith.cmpi slt, %8, %11 : vector<1x256xi32>
    %c0_i32_6 = arith.constant 0 : i32
    %13 = arith.cmpi slt, %6, %c0_i32_6 : i32
    %14 = vector.broadcast %13 : i1 to vector<1x256xi1>
    %15 = vector.broadcast %14 : vector<1x256xi1> to vector<1x256xi1>
    %16 = arith.xori %12, %15 : vector<1x256xi1>
    %17 = arith.andi %16, %10 : vector<1x256xi1>
    %18 = vector.broadcast %6 : i32 to vector<1x256xi32>
    %19 = arith.addi %8, %18 : vector<1x256xi32>
    %20 = arith.select %17, %19, %8 : vector<1x256xi1>, vector<1x256xi32>
    %c1_i32_7 = arith.constant 1 : i32
    %21 = vector.broadcast %c1_i32_7 : i32 to vector<1x256xi32>
    %22 = arith.cmpi sge, %20, %21 : vector<1x256xi32>
    %c15_i32 = arith.constant 15 : i32
    %23 = vector.broadcast %c15_i32 : i32 to vector<1x256xi32>
    %24 = arith.cmpi slt, %20, %23 : vector<1x256xi32>
    %cst_8 = arith.constant 0.000000e+00 : f32
    %25 = vector.broadcast %cst_8 : f32 to vector<1x256xf32>
    %c0_9 = arith.constant 0 : index
    %26 = memref.load %arg2[%c0_9] : memref<5xf32, #tpu.memory_space<smem>>
    %27 = vector.broadcast %26 : f32 to vector<1x256xf32>
    %28 = arith.addf %25, %27 : vector<1x256xf32>
    %cst_10 = arith.constant 0.000000e+00 : f32
    %29 = vector.broadcast %cst_10 : f32 to vector<1x256xf32>
    %c1 = arith.constant 1 : index
    %30 = memref.load %arg2[%c1] : memref<5xf32, #tpu.memory_space<smem>>
    %31 = vector.broadcast %30 : f32 to vector<1x256xf32>
    %32 = arith.addf %29, %31 : vector<1x256xf32>
    %cst_11 = arith.constant 0.000000e+00 : f32
    %33 = vector.broadcast %cst_11 : f32 to vector<1x256xf32>
    %c2 = arith.constant 2 : index
    %34 = memref.load %arg2[%c2] : memref<5xf32, #tpu.memory_space<smem>>
    %35 = vector.broadcast %34 : f32 to vector<1x256xf32>
    %36 = arith.addf %33, %35 : vector<1x256xf32>
    %cst_12 = arith.constant 0.000000e+00 : f32
    %37 = vector.broadcast %cst_12 : f32 to vector<1x256xf32>
    %c3 = arith.constant 3 : index
    %38 = memref.load %arg2[%c3] : memref<5xf32, #tpu.memory_space<smem>>
    %39 = vector.broadcast %38 : f32 to vector<1x256xf32>
    %40 = arith.addf %37, %39 : vector<1x256xf32>
    %cst_13 = arith.constant 0.000000e+00 : f32
    %41 = vector.broadcast %cst_13 : f32 to vector<1x256xf32>
    %c4 = arith.constant 4 : index
    %42 = memref.load %arg2[%c4] : memref<5xf32, #tpu.memory_space<smem>>
    %43 = vector.broadcast %42 : f32 to vector<1x256xf32>
    %44 = arith.addf %41, %43 : vector<1x256xf32>
    %cst_14 = arith.constant 0.000000e+00 : f32
    %45 = vector.broadcast %cst_14 : f32 to vector<1x256xf32>
    %c0_15 = arith.constant 0 : index
    %46 = memref.load %arg2[%c0_15] : memref<5xf32, #tpu.memory_space<smem>>
    %47 = vector.broadcast %46 : f32 to vector<1x256xf32>
    %48 = arith.addf %45, %47 : vector<1x256xf32>
    %cst_16 = arith.constant 0.000000e+00 : f32
    %49 = vector.broadcast %cst_16 : f32 to vector<1x256xf32>
    %c1_17 = arith.constant 1 : index
    %50 = memref.load %arg2[%c1_17] : memref<5xf32, #tpu.memory_space<smem>>
    %51 = vector.broadcast %50 : f32 to vector<1x256xf32>
    %52 = arith.addf %49, %51 : vector<1x256xf32>
    %cst_18 = arith.constant 0.000000e+00 : f32
    %53 = vector.broadcast %cst_18 : f32 to vector<1x256xf32>
    %c2_19 = arith.constant 2 : index
    %54 = memref.load %arg2[%c2_19] : memref<5xf32, #tpu.memory_space<smem>>
    %55 = vector.broadcast %54 : f32 to vector<1x256xf32>
    %56 = arith.addf %53, %55 : vector<1x256xf32>
    %cst_20 = arith.constant 0.000000e+00 : f32
    %57 = vector.broadcast %cst_20 : f32 to vector<1x256xf32>
    %c3_21 = arith.constant 3 : index
    %58 = memref.load %arg2[%c3_21] : memref<5xf32, #tpu.memory_space<smem>>
    %59 = vector.broadcast %58 : f32 to vector<1x256xf32>
    %60 = arith.addf %57, %59 : vector<1x256xf32>
    %cst_22 = arith.constant 0.000000e+00 : f32
    %61 = vector.broadcast %cst_22 : f32 to vector<1x256xf32>
    %c4_23 = arith.constant 4 : index
    %62 = memref.load %arg2[%c4_23] : memref<5xf32, #tpu.memory_space<smem>>
    %63 = vector.broadcast %62 : f32 to vector<1x256xf32>
    %64 = arith.addf %61, %63 : vector<1x256xf32>
    %c0_24 = arith.constant 0 : index
    %c111 = arith.constant 111 : index
    %65 = vector.load %arg4[%c0_24, %c111] : memref<8x512xf32, #tpu.memory_space<vmem>>, vector<8x256xf32>
    %cst_25 = arith.constant 0.000000e+00 : f32
    %66 = vector.shape_cast %22 : vector<1x256xi1> to vector<1x256xi1>
    %67 = vector.broadcast %66 : vector<1x256xi1> to vector<8x256xi1>
    %68 = vector.broadcast %cst_25 : f32 to vector<8x256xf32>
    %69 = arith.select %67, %65, %68 : vector<8x256xi1>, vector<8x256xf32>
    %70 = vector.extract_strided_slice %69 {offsets = [0, 0], sizes = [1, 256], strides = [1, 1]} : vector<8x256xf32> to vector<1x256xf32>
    %c0_26 = arith.constant 0 : index
    %71 = memref.load %arg1[%c0_26] : memref<180xf32, #tpu.memory_space<smem>>
    %72 = vector.broadcast %71 : f32 to vector<1x256xf32>
    %73 = arith.mulf %72, %70 : vector<1x256xf32>
    %74 = arith.addf %28, %73 : vector<1x256xf32>
    %c36 = arith.constant 36 : index
    %75 = memref.load %arg1[%c36] : memref<180xf32, #tpu.memory_space<smem>>
    %76 = vector.broadcast %75 : f32 to vector<1x256xf32>
    %77 = arith.mulf %76, %70 : vector<1x256xf32>
    %78 = arith.addf %32, %77 : vector<1x256xf32>
    %c72 = arith.constant 72 : index
    %79 = memref.load %arg1[%c72] : memref<180xf32, #tpu.memory_space<smem>>
    %80 = vector.broadcast %79 : f32 to vector<1x256xf32>
    %81 = arith.mulf %80, %70 : vector<1x256xf32>
    %82 = arith.addf %36, %81 : vector<1x256xf32>
    %c108 = arith.constant 108 : index
    %83 = memref.load %arg1[%c108] : memref<180xf32, #tpu.memory_space<smem>>
    %84 = vector.broadcast %83 : f32 to vector<1x256xf32>
    %85 = arith.mulf %84, %70 : vector<1x256xf32>
    %86 = arith.addf %40, %85 : vector<1x256xf32>
    %c144 = arith.constant 144 : index
    %87 = memref.load %arg1[%c144] : memref<180xf32, #tpu.memory_space<smem>>
    %88 = vector.broadcast %87 : f32 to vector<1x256xf32>
    %89 = arith.mulf %88, %70 : vector<1x256xf32>
    %90 = arith.addf %44, %89 : vector<1x256xf32>
    %91 = vector.extract_strided_slice %69 {offsets = [1, 0], sizes = [1, 256], strides = [1, 1]} : vector<8x256xf32> to vector<1x256xf32>
    %c9 = arith.constant 9 : index
    %92 = memref.load %arg1[%c9] : memref<180xf32, #tpu.memory_space<smem>>
    %93 = vector.broadcast %92 : f32 to vector<1x256xf32>
    %94 = arith.mulf %93, %91 : vector<1x256xf32>
    %95 = arith.addf %74, %94 : vector<1x256xf32>
    %c45 = arith.constant 45 : index
    %96 = memref.load %arg1[%c45] : memref<180xf32, #tpu.memory_space<smem>>
    %97 = vector.broadcast %96 : f32 to vector<1x256xf32>
    %98 = arith.mulf %97, %91 : vector<1x256xf32>
    %99 = arith.addf %78, %98 : vector<1x256xf32>
    %c81 = arith.constant 81 : index
    %100 = memref.load %arg1[%c81] : memref<180xf32, #tpu.memory_space<smem>>
    %101 = vector.broadcast %100 : f32 to vector<1x256xf32>
    %102 = arith.mulf %101, %91 : vector<1x256xf32>
    %103 = arith.addf %82, %102 : vector<1x256xf32>
    %c117 = arith.constant 117 : index
    %104 = memref.load %arg1[%c117] : memref<180xf32, #tpu.memory_space<smem>>
    %105 = vector.broadcast %104 : f32 to vector<1x256xf32>
    %106 = arith.mulf %105, %91 : vector<1x256xf32>
    %107 = arith.addf %86, %106 : vector<1x256xf32>
    %c153 = arith.constant 153 : index
    %108 = memref.load %arg1[%c153] : memref<180xf32, #tpu.memory_space<smem>>
    %109 = vector.broadcast %108 : f32 to vector<1x256xf32>
    %110 = arith.mulf %109, %91 : vector<1x256xf32>
    %111 = arith.addf %90, %110 : vector<1x256xf32>
    %112 = vector.extract_strided_slice %69 {offsets = [2, 0], sizes = [1, 256], strides = [1, 1]} : vector<8x256xf32> to vector<1x256xf32>
    %c18 = arith.constant 18 : index
    %113 = memref.load %arg1[%c18] : memref<180xf32, #tpu.memory_space<smem>>
    %114 = vector.broadcast %113 : f32 to vector<1x256xf32>
    %115 = arith.mulf %114, %112 : vector<1x256xf32>
    %116 = arith.addf %95, %115 : vector<1x256xf32>
    %c54 = arith.constant 54 : index
    %117 = memref.load %arg1[%c54] : memref<180xf32, #tpu.memory_space<smem>>
    %118 = vector.broadcast %117 : f32 to vector<1x256xf32>
    %119 = arith.mulf %118, %112 : vector<1x256xf32>
    %120 = arith.addf %99, %119 : vector<1x256xf32>
    %c90 = arith.constant 90 : index
    %121 = memref.load %arg1[%c90] : memref<180xf32, #tpu.memory_space<smem>>
    %122 = vector.broadcast %121 : f32 to vector<1x256xf32>
    %123 = arith.mulf %122, %112 : vector<1x256xf32>
    %124 = arith.addf %103, %123 : vector<1x256xf32>
    %c126 = arith.constant 126 : index
    %125 = memref.load %arg1[%c126] : memref<180xf32, #tpu.memory_space<smem>>
    %126 = vector.broadcast %125 : f32 to vector<1x256xf32>
    %127 = arith.mulf %126, %112 : vector<1x256xf32>
    %128 = arith.addf %107, %127 : vector<1x256xf32>
    %c162 = arith.constant 162 : index
    %129 = memref.load %arg1[%c162] : memref<180xf32, #tpu.memory_space<smem>>
    %130 = vector.broadcast %129 : f32 to vector<1x256xf32>
    %131 = arith.mulf %130, %112 : vector<1x256xf32>
    %132 = arith.addf %111, %131 : vector<1x256xf32>
    %133 = vector.extract_strided_slice %69 {offsets = [3, 0], sizes = [1, 256], strides = [1, 1]} : vector<8x256xf32> to vector<1x256xf32>
    %c27 = arith.constant 27 : index
    %134 = memref.load %arg1[%c27] : memref<180xf32, #tpu.memory_space<smem>>
    %135 = vector.broadcast %134 : f32 to vector<1x256xf32>
    %136 = arith.mulf %135, %133 : vector<1x256xf32>
    %137 = arith.addf %116, %136 : vector<1x256xf32>
    %c63 = arith.constant 63 : index
    %138 = memref.load %arg1[%c63] : memref<180xf32, #tpu.memory_space<smem>>
    %139 = vector.broadcast %138 : f32 to vector<1x256xf32>
    %140 = arith.mulf %139, %133 : vector<1x256xf32>
    %141 = arith.addf %120, %140 : vector<1x256xf32>
    %c99 = arith.constant 99 : index
    %142 = memref.load %arg1[%c99] : memref<180xf32, #tpu.memory_space<smem>>
    %143 = vector.broadcast %142 : f32 to vector<1x256xf32>
    %144 = arith.mulf %143, %133 : vector<1x256xf32>
    %145 = arith.addf %124, %144 : vector<1x256xf32>
    %c135 = arith.constant 135 : index
    %146 = memref.load %arg1[%c135] : memref<180xf32, #tpu.memory_space<smem>>
    %147 = vector.broadcast %146 : f32 to vector<1x256xf32>
    %148 = arith.mulf %147, %133 : vector<1x256xf32>
    %149 = arith.addf %128, %148 : vector<1x256xf32>
    %c171 = arith.constant 171 : index
    %150 = memref.load %arg1[%c171] : memref<180xf32, #tpu.memory_space<smem>>
    %151 = vector.broadcast %150 : f32 to vector<1x256xf32>
    %152 = arith.mulf %151, %133 : vector<1x256xf32>
    %153 = arith.addf %132, %152 : vector<1x256xf32>
    %154 = vector.extract_strided_slice %69 {offsets = [4, 0], sizes = [1, 256], strides = [1, 1]} : vector<8x256xf32> to vector<1x256xf32>
    %c0_27 = arith.constant 0 : index
    %155 = memref.load %arg1[%c0_27] : memref<180xf32, #tpu.memory_space<smem>>
    %156 = vector.broadcast %155 : f32 to vector<1x256xf32>
    %157 = arith.mulf %156, %154 : vector<1x256xf32>
    %158 = arith.addf %48, %157 : vector<1x256xf32>
    %c36_28 = arith.constant 36 : index
    %159 = memref.load %arg1[%c36_28] : memref<180xf32, #tpu.memory_space<smem>>
    %160 = vector.broadcast %159 : f32 to vector<1x256xf32>
    %161 = arith.mulf %160, %154 : vector<1x256xf32>
    %162 = arith.addf %52, %161 : vector<1x256xf32>
    %c72_29 = arith.constant 72 : index
    %163 = memref.load %arg1[%c72_29] : memref<180xf32, #tpu.memory_space<smem>>
    %164 = vector.broadcast %163 : f32 to vector<1x256xf32>
    %165 = arith.mulf %164, %154 : vector<1x256xf32>
    %166 = arith.addf %56, %165 : vector<1x256xf32>
    %c108_30 = arith.constant 108 : index
    %167 = memref.load %arg1[%c108_30] : memref<180xf32, #tpu.memory_space<smem>>
    %168 = vector.broadcast %167 : f32 to vector<1x256xf32>
    %169 = arith.mulf %168, %154 : vector<1x256xf32>
    %170 = arith.addf %60, %169 : vector<1x256xf32>
    %c144_31 = arith.constant 144 : index
    %171 = memref.load %arg1[%c144_31] : memref<180xf32, #tpu.memory_space<smem>>
    %172 = vector.broadcast %171 : f32 to vector<1x256xf32>
    %173 = arith.mulf %172, %154 : vector<1x256xf32>
    %174 = arith.addf %64, %173 : vector<1x256xf32>
    %175 = vector.extract_strided_slice %69 {offsets = [5, 0], sizes = [1, 256], strides = [1, 1]} : vector<8x256xf32> to vector<1x256xf32>
    %c9_32 = arith.constant 9 : index
    %176 = memref.load %arg1[%c9_32] : memref<180xf32, #tpu.memory_space<smem>>
    %177 = vector.broadcast %176 : f32 to vector<1x256xf32>
    %178 = arith.mulf %177, %175 : vector<1x256xf32>
    %179 = arith.addf %158, %178 : vector<1x256xf32>
    %c45_33 = arith.constant 45 : index
    %180 = memref.load %arg1[%c45_33] : memref<180xf32, #tpu.memory_space<smem>>
    %181 = vector.broadcast %180 : f32 to vector<1x256xf32>
    %182 = arith.mulf %181, %175 : vector<1x256xf32>
    %183 = arith.addf %162, %182 : vector<1x256xf32>
    %c81_34 = arith.constant 81 : index
    %184 = memref.load %arg1[%c81_34] : memref<180xf32, #tpu.memory_space<smem>>
    %185 = vector.broadcast %184 : f32 to vector<1x256xf32>
    %186 = arith.mulf %185, %175 : vector<1x256xf32>
    %187 = arith.addf %166, %186 : vector<1x256xf32>
    %c117_35 = arith.constant 117 : index
    %188 = memref.load %arg1[%c117_35] : memref<180xf32, #tpu.memory_space<smem>>
    %189 = vector.broadcast %188 : f32 to vector<1x256xf32>
    %190 = arith.mulf %189, %175 : vector<1x256xf32>
    %191 = arith.addf %170, %190 : vector<1x256xf32>
    %c153_36 = arith.constant 153 : index
    %192 = memref.load %arg1[%c153_36] : memref<180xf32, #tpu.memory_space<smem>>
    %193 = vector.broadcast %192 : f32 to vector<1x256xf32>
    %194 = arith.mulf %193, %175 : vector<1x256xf32>
    %195 = arith.addf %174, %194 : vector<1x256xf32>
    %196 = vector.extract_strided_slice %69 {offsets = [6, 0], sizes = [1, 256], strides = [1, 1]} : vector<8x256xf32> to vector<1x256xf32>
    %c18_37 = arith.constant 18 : index
    %197 = memref.load %arg1[%c18_37] : memref<180xf32, #tpu.memory_space<smem>>
    %198 = vector.broadcast %197 : f32 to vector<1x256xf32>
    %199 = arith.mulf %198, %196 : vector<1x256xf32>
    %200 = arith.addf %179, %199 : vector<1x256xf32>
    %c54_38 = arith.constant 54 : index
    %201 = memref.load %arg1[%c54_38] : memref<180xf32, #tpu.memory_space<smem>>
    %202 = vector.broadcast %201 : f32 to vector<1x256xf32>
    %203 = arith.mulf %202, %196 : vector<1x256xf32>
    %204 = arith.addf %183, %203 : vector<1x256xf32>
    %c90_39 = arith.constant 90 : index
    %205 = memref.load %arg1[%c90_39] : memref<180xf32, #tpu.memory_space<smem>>
    %206 = vector.broadcast %205 : f32 to vector<1x256xf32>
    %207 = arith.mulf %206, %196 : vector<1x256xf32>
    %208 = arith.addf %187, %207 : vector<1x256xf32>
    %c126_40 = arith.constant 126 : index
    %209 = memref.load %arg1[%c126_40] : memref<180xf32, #tpu.memory_space<smem>>
    %210 = vector.broadcast %209 : f32 to vector<1x256xf32>
    %211 = arith.mulf %210, %196 : vector<1x256xf32>
    %212 = arith.addf %191, %211 : vector<1x256xf32>
    %c162_41 = arith.constant 162 : index
    %213 = memref.load %arg1[%c162_41] : memref<180xf32, #tpu.memory_space<smem>>
    %214 = vector.broadcast %213 : f32 to vector<1x256xf32>
    %215 = arith.mulf %214, %196 : vector<1x256xf32>
    %216 = arith.addf %195, %215 : vector<1x256xf32>
    %217 = vector.extract_strided_slice %69 {offsets = [7, 0], sizes = [1, 256], strides = [1, 1]} : vector<8x256xf32> to vector<1x256xf32>
    %c27_42 = arith.constant 27 : index
    %218 = memref.load %arg1[%c27_42] : memref<180xf32, #tpu.memory_space<smem>>
    %219 = vector.broadcast %218 : f32 to vector<1x256xf32>
    %220 = arith.mulf %219, %217 : vector<1x256xf32>
    %221 = arith.addf %200, %220 : vector<1x256xf32>
    %c63_43 = arith.constant 63 : index
    %222 = memref.load %arg1[%c63_43] : memref<180xf32, #tpu.memory_space<smem>>
    %223 = vector.broadcast %222 : f32 to vector<1x256xf32>
    %224 = arith.mulf %223, %217 : vector<1x256xf32>
    %225 = arith.addf %204, %224 : vector<1x256xf32>
    %c99_44 = arith.constant 99 : index
    %226 = memref.load %arg1[%c99_44] : memref<180xf32, #tpu.memory_space<smem>>
    %227 = vector.broadcast %226 : f32 to vector<1x256xf32>
    %228 = arith.mulf %227, %217 : vector<1x256xf32>
    %229 = arith.addf %208, %228 : vector<1x256xf32>
    %c135_45 = arith.constant 135 : index
    %230 = memref.load %arg1[%c135_45] : memref<180xf32, #tpu.memory_space<smem>>
    %231 = vector.broadcast %230 : f32 to vector<1x256xf32>
    %232 = arith.mulf %231, %217 : vector<1x256xf32>
    %233 = arith.addf %212, %232 : vector<1x256xf32>
    %c171_46 = arith.constant 171 : index
    %234 = memref.load %arg1[%c171_46] : memref<180xf32, #tpu.memory_space<smem>>
    %235 = vector.broadcast %234 : f32 to vector<1x256xf32>
    %236 = arith.mulf %235, %217 : vector<1x256xf32>
    %237 = arith.addf %216, %236 : vector<1x256xf32>
    %c0_47 = arith.constant 0 : index
    %c112 = arith.constant 112 : index
    %238 = vector.load %arg4[%c0_47, %c112] : memref<8x512xf32, #tpu.memory_space<vmem>>, vector<8x256xf32>
    %239 = vector.extract_strided_slice %238 {offsets = [0, 0], sizes = [1, 256], strides = [1, 1]} : vector<8x256xf32> to vector<1x256xf32>
    %c1_48 = arith.constant 1 : index
    %240 = memref.load %arg1[%c1_48] : memref<180xf32, #tpu.memory_space<smem>>
    %241 = vector.broadcast %240 : f32 to vector<1x256xf32>
    %242 = arith.mulf %241, %239 : vector<1x256xf32>
    %243 = arith.addf %137, %242 : vector<1x256xf32>
    %c37 = arith.constant 37 : index
    %244 = memref.load %arg1[%c37] : memref<180xf32, #tpu.memory_space<smem>>
    %245 = vector.broadcast %244 : f32 to vector<1x256xf32>
    %246 = arith.mulf %245, %239 : vector<1x256xf32>
    %247 = arith.addf %141, %246 : vector<1x256xf32>
    %c73 = arith.constant 73 : index
    %248 = memref.load %arg1[%c73] : memref<180xf32, #tpu.memory_space<smem>>
    %249 = vector.broadcast %248 : f32 to vector<1x256xf32>
    %250 = arith.mulf %249, %239 : vector<1x256xf32>
    %251 = arith.addf %145, %250 : vector<1x256xf32>
    %c109 = arith.constant 109 : index
    %252 = memref.load %arg1[%c109] : memref<180xf32, #tpu.memory_space<smem>>
    %253 = vector.broadcast %252 : f32 to vector<1x256xf32>
    %254 = arith.mulf %253, %239 : vector<1x256xf32>
    %255 = arith.addf %149, %254 : vector<1x256xf32>
    %c145 = arith.constant 145 : index
    %256 = memref.load %arg1[%c145] : memref<180xf32, #tpu.memory_space<smem>>
    %257 = vector.broadcast %256 : f32 to vector<1x256xf32>
    %258 = arith.mulf %257, %239 : vector<1x256xf32>
    %259 = arith.addf %153, %258 : vector<1x256xf32>
    %260 = vector.extract_strided_slice %238 {offsets = [1, 0], sizes = [1, 256], strides = [1, 1]} : vector<8x256xf32> to vector<1x256xf32>
    %c10 = arith.constant 10 : index
    %261 = memref.load %arg1[%c10] : memref<180xf32, #tpu.memory_space<smem>>
    %262 = vector.broadcast %261 : f32 to vector<1x256xf32>
    %263 = arith.mulf %262, %260 : vector<1x256xf32>
    %264 = arith.addf %243, %263 : vector<1x256xf32>
    %c46 = arith.constant 46 : index
    %265 = memref.load %arg1[%c46] : memref<180xf32, #tpu.memory_space<smem>>
    %266 = vector.broadcast %265 : f32 to vector<1x256xf32>
    %267 = arith.mulf %266, %260 : vector<1x256xf32>
    %268 = arith.addf %247, %267 : vector<1x256xf32>
    %c82 = arith.constant 82 : index
    %269 = memref.load %arg1[%c82] : memref<180xf32, #tpu.memory_space<smem>>
    %270 = vector.broadcast %269 : f32 to vector<1x256xf32>
    %271 = arith.mulf %270, %260 : vector<1x256xf32>
    %272 = arith.addf %251, %271 : vector<1x256xf32>
    %c118 = arith.constant 118 : index
    %273 = memref.load %arg1[%c118] : memref<180xf32, #tpu.memory_space<smem>>
    %274 = vector.broadcast %273 : f32 to vector<1x256xf32>
    %275 = arith.mulf %274, %260 : vector<1x256xf32>
    %276 = arith.addf %255, %275 : vector<1x256xf32>
    %c154 = arith.constant 154 : index
    %277 = memref.load %arg1[%c154] : memref<180xf32, #tpu.memory_space<smem>>
    %278 = vector.broadcast %277 : f32 to vector<1x256xf32>
    %279 = arith.mulf %278, %260 : vector<1x256xf32>
    %280 = arith.addf %259, %279 : vector<1x256xf32>
    %281 = vector.extract_strided_slice %238 {offsets = [2, 0], sizes = [1, 256], strides = [1, 1]} : vector<8x256xf32> to vector<1x256xf32>
    %c19 = arith.constant 19 : index
    %282 = memref.load %arg1[%c19] : memref<180xf32, #tpu.memory_space<smem>>
    %283 = vector.broadcast %282 : f32 to vector<1x256xf32>
    %284 = arith.mulf %283, %281 : vector<1x256xf32>
    %285 = arith.addf %264, %284 : vector<1x256xf32>
    %c55 = arith.constant 55 : index
    %286 = memref.load %arg1[%c55] : memref<180xf32, #tpu.memory_space<smem>>
    %287 = vector.broadcast %286 : f32 to vector<1x256xf32>
    %288 = arith.mulf %287, %281 : vector<1x256xf32>
    %289 = arith.addf %268, %288 : vector<1x256xf32>
    %c91 = arith.constant 91 : index
    %290 = memref.load %arg1[%c91] : memref<180xf32, #tpu.memory_space<smem>>
    %291 = vector.broadcast %290 : f32 to vector<1x256xf32>
    %292 = arith.mulf %291, %281 : vector<1x256xf32>
    %293 = arith.addf %272, %292 : vector<1x256xf32>
    %c127 = arith.constant 127 : index
    %294 = memref.load %arg1[%c127] : memref<180xf32, #tpu.memory_space<smem>>
    %295 = vector.broadcast %294 : f32 to vector<1x256xf32>
    %296 = arith.mulf %295, %281 : vector<1x256xf32>
    %297 = arith.addf %276, %296 : vector<1x256xf32>
    %c163 = arith.constant 163 : index
    %298 = memref.load %arg1[%c163] : memref<180xf32, #tpu.memory_space<smem>>
    %299 = vector.broadcast %298 : f32 to vector<1x256xf32>
    %300 = arith.mulf %299, %281 : vector<1x256xf32>
    %301 = arith.addf %280, %300 : vector<1x256xf32>
    %302 = vector.extract_strided_slice %238 {offsets = [3, 0], sizes = [1, 256], strides = [1, 1]} : vector<8x256xf32> to vector<1x256xf32>
    %c28 = arith.constant 28 : index
    %303 = memref.load %arg1[%c28] : memref<180xf32, #tpu.memory_space<smem>>
    %304 = vector.broadcast %303 : f32 to vector<1x256xf32>
    %305 = arith.mulf %304, %302 : vector<1x256xf32>
    %306 = arith.addf %285, %305 : vector<1x256xf32>
    %c64 = arith.constant 64 : index
    %307 = memref.load %arg1[%c64] : memref<180xf32, #tpu.memory_space<smem>>
    %308 = vector.broadcast %307 : f32 to vector<1x256xf32>
    %309 = arith.mulf %308, %302 : vector<1x256xf32>
    %310 = arith.addf %289, %309 : vector<1x256xf32>
    %c100 = arith.constant 100 : index
    %311 = memref.load %arg1[%c100] : memref<180xf32, #tpu.memory_space<smem>>
    %312 = vector.broadcast %311 : f32 to vector<1x256xf32>
    %313 = arith.mulf %312, %302 : vector<1x256xf32>
    %314 = arith.addf %293, %313 : vector<1x256xf32>
    %c136 = arith.constant 136 : index
    %315 = memref.load %arg1[%c136] : memref<180xf32, #tpu.memory_space<smem>>
    %316 = vector.broadcast %315 : f32 to vector<1x256xf32>
    %317 = arith.mulf %316, %302 : vector<1x256xf32>
    %318 = arith.addf %297, %317 : vector<1x256xf32>
    %c172 = arith.constant 172 : index
    %319 = memref.load %arg1[%c172] : memref<180xf32, #tpu.memory_space<smem>>
    %320 = vector.broadcast %319 : f32 to vector<1x256xf32>
    %321 = arith.mulf %320, %302 : vector<1x256xf32>
    %322 = arith.addf %301, %321 : vector<1x256xf32>
    %323 = vector.extract_strided_slice %238 {offsets = [4, 0], sizes = [1, 256], strides = [1, 1]} : vector<8x256xf32> to vector<1x256xf32>
    %c1_49 = arith.constant 1 : index
    %324 = memref.load %arg1[%c1_49] : memref<180xf32, #tpu.memory_space<smem>>
    %325 = vector.broadcast %324 : f32 to vector<1x256xf32>
    %326 = arith.mulf %325, %323 : vector<1x256xf32>
    %327 = arith.addf %221, %326 : vector<1x256xf32>
    %c37_50 = arith.constant 37 : index
    %328 = memref.load %arg1[%c37_50] : memref<180xf32, #tpu.memory_space<smem>>
    %329 = vector.broadcast %328 : f32 to vector<1x256xf32>
    %330 = arith.mulf %329, %323 : vector<1x256xf32>
    %331 = arith.addf %225, %330 : vector<1x256xf32>
    %c73_51 = arith.constant 73 : index
    %332 = memref.load %arg1[%c73_51] : memref<180xf32, #tpu.memory_space<smem>>
    %333 = vector.broadcast %332 : f32 to vector<1x256xf32>
    %334 = arith.mulf %333, %323 : vector<1x256xf32>
    %335 = arith.addf %229, %334 : vector<1x256xf32>
    %c109_52 = arith.constant 109 : index
    %336 = memref.load %arg1[%c109_52] : memref<180xf32, #tpu.memory_space<smem>>
    %337 = vector.broadcast %336 : f32 to vector<1x256xf32>
    %338 = arith.mulf %337, %323 : vector<1x256xf32>
    %339 = arith.addf %233, %338 : vector<1x256xf32>
    %c145_53 = arith.constant 145 : index
    %340 = memref.load %arg1[%c145_53] : memref<180xf32, #tpu.memory_space<smem>>
    %341 = vector.broadcast %340 : f32 to vector<1x256xf32>
    %342 = arith.mulf %341, %323 : vector<1x256xf32>
    %343 = arith.addf %237, %342 : vector<1x256xf32>
    %344 = vector.extract_strided_slice %238 {offsets = [5, 0], sizes = [1, 256], strides = [1, 1]} : vector<8x256xf32> to vector<1x256xf32>
    %c10_54 = arith.constant 10 : index
    %345 = memref.load %arg1[%c10_54] : memref<180xf32, #tpu.memory_space<smem>>
    %346 = vector.broadcast %345 : f32 to vector<1x256xf32>
    %347 = arith.mulf %346, %344 : vector<1x256xf32>
    %348 = arith.addf %327, %347 : vector<1x256xf32>
    %c46_55 = arith.constant 46 : index
    %349 = memref.load %arg1[%c46_55] : memref<180xf32, #tpu.memory_space<smem>>
    %350 = vector.broadcast %349 : f32 to vector<1x256xf32>
    %351 = arith.mulf %350, %344 : vector<1x256xf32>
    %352 = arith.addf %331, %351 : vector<1x256xf32>
    %c82_56 = arith.constant 82 : index
    %353 = memref.load %arg1[%c82_56] : memref<180xf32, #tpu.memory_space<smem>>
    %354 = vector.broadcast %353 : f32 to vector<1x256xf32>
    %355 = arith.mulf %354, %344 : vector<1x256xf32>
    %356 = arith.addf %335, %355 : vector<1x256xf32>
    %c118_57 = arith.constant 118 : index
    %357 = memref.load %arg1[%c118_57] : memref<180xf32, #tpu.memory_space<smem>>
    %358 = vector.broadcast %357 : f32 to vector<1x256xf32>
    %359 = arith.mulf %358, %344 : vector<1x256xf32>
    %360 = arith.addf %339, %359 : vector<1x256xf32>
    %c154_58 = arith.constant 154 : index
    %361 = memref.load %arg1[%c154_58] : memref<180xf32, #tpu.memory_space<smem>>
    %362 = vector.broadcast %361 : f32 to vector<1x256xf32>
    %363 = arith.mulf %362, %344 : vector<1x256xf32>
    %364 = arith.addf %343, %363 : vector<1x256xf32>
    %365 = vector.extract_strided_slice %238 {offsets = [6, 0], sizes = [1, 256], strides = [1, 1]} : vector<8x256xf32> to vector<1x256xf32>
    %c19_59 = arith.constant 19 : index
    %366 = memref.load %arg1[%c19_59] : memref<180xf32, #tpu.memory_space<smem>>
    %367 = vector.broadcast %366 : f32 to vector<1x256xf32>
    %368 = arith.mulf %367, %365 : vector<1x256xf32>
    %369 = arith.addf %348, %368 : vector<1x256xf32>
    %c55_60 = arith.constant 55 : index
    %370 = memref.load %arg1[%c55_60] : memref<180xf32, #tpu.memory_space<smem>>
    %371 = vector.broadcast %370 : f32 to vector<1x256xf32>
    %372 = arith.mulf %371, %365 : vector<1x256xf32>
    %373 = arith.addf %352, %372 : vector<1x256xf32>
    %c91_61 = arith.constant 91 : index
    %374 = memref.load %arg1[%c91_61] : memref<180xf32, #tpu.memory_space<smem>>
    %375 = vector.broadcast %374 : f32 to vector<1x256xf32>
    %376 = arith.mulf %375, %365 : vector<1x256xf32>
    %377 = arith.addf %356, %376 : vector<1x256xf32>
    %c127_62 = arith.constant 127 : index
    %378 = memref.load %arg1[%c127_62] : memref<180xf32, #tpu.memory_space<smem>>
    %379 = vector.broadcast %378 : f32 to vector<1x256xf32>
    %380 = arith.mulf %379, %365 : vector<1x256xf32>
    %381 = arith.addf %360, %380 : vector<1x256xf32>
    %c163_63 = arith.constant 163 : index
    %382 = memref.load %arg1[%c163_63] : memref<180xf32, #tpu.memory_space<smem>>
    %383 = vector.broadcast %382 : f32 to vector<1x256xf32>
    %384 = arith.mulf %383, %365 : vector<1x256xf32>
    %385 = arith.addf %364, %384 : vector<1x256xf32>
    %386 = vector.extract_strided_slice %238 {offsets = [7, 0], sizes = [1, 256], strides = [1, 1]} : vector<8x256xf32> to vector<1x256xf32>
    %c28_64 = arith.constant 28 : index
    %387 = memref.load %arg1[%c28_64] : memref<180xf32, #tpu.memory_space<smem>>
    %388 = vector.broadcast %387 : f32 to vector<1x256xf32>
    %389 = arith.mulf %388, %386 : vector<1x256xf32>
    %390 = arith.addf %369, %389 : vector<1x256xf32>
    %c64_65 = arith.constant 64 : index
    %391 = memref.load %arg1[%c64_65] : memref<180xf32, #tpu.memory_space<smem>>
    %392 = vector.broadcast %391 : f32 to vector<1x256xf32>
    %393 = arith.mulf %392, %386 : vector<1x256xf32>
    %394 = arith.addf %373, %393 : vector<1x256xf32>
    %c100_66 = arith.constant 100 : index
    %395 = memref.load %arg1[%c100_66] : memref<180xf32, #tpu.memory_space<smem>>
    %396 = vector.broadcast %395 : f32 to vector<1x256xf32>
    %397 = arith.mulf %396, %386 : vector<1x256xf32>
    %398 = arith.addf %377, %397 : vector<1x256xf32>
    %c136_67 = arith.constant 136 : index
    %399 = memref.load %arg1[%c136_67] : memref<180xf32, #tpu.memory_space<smem>>
    %400 = vector.broadcast %399 : f32 to vector<1x256xf32>
    %401 = arith.mulf %400, %386 : vector<1x256xf32>
    %402 = arith.addf %381, %401 : vector<1x256xf32>
    %c172_68 = arith.constant 172 : index
    %403 = memref.load %arg1[%c172_68] : memref<180xf32, #tpu.memory_space<smem>>
    %404 = vector.broadcast %403 : f32 to vector<1x256xf32>
    %405 = arith.mulf %404, %386 : vector<1x256xf32>
    %406 = arith.addf %385, %405 : vector<1x256xf32>
    %c0_69 = arith.constant 0 : index
    %c113 = arith.constant 113 : index
    %407 = vector.load %arg4[%c0_69, %c113] : memref<8x512xf32, #tpu.memory_space<vmem>>, vector<8x256xf32>
    %cst_70 = arith.constant 0.000000e+00 : f32
    %408 = vector.shape_cast %24 : vector<1x256xi1> to vector<1x256xi1>
    %409 = vector.broadcast %408 : vector<1x256xi1> to vector<8x256xi1>
    %410 = vector.broadcast %cst_70 : f32 to vector<8x256xf32>
    %411 = arith.select %409, %407, %410 : vector<8x256xi1>, vector<8x256xf32>
    %412 = vector.extract_strided_slice %411 {offsets = [0, 0], sizes = [1, 256], strides = [1, 1]} : vector<8x256xf32> to vector<1x256xf32>
    %c2_71 = arith.constant 2 : index
    %413 = memref.load %arg1[%c2_71] : memref<180xf32, #tpu.memory_space<smem>>
    %414 = vector.broadcast %413 : f32 to vector<1x256xf32>
    %415 = arith.mulf %414, %412 : vector<1x256xf32>
    %416 = arith.addf %306, %415 : vector<1x256xf32>
    %c38 = arith.constant 38 : index
    %417 = memref.load %arg1[%c38] : memref<180xf32, #tpu.memory_space<smem>>
    %418 = vector.broadcast %417 : f32 to vector<1x256xf32>
    %419 = arith.mulf %418, %412 : vector<1x256xf32>
    %420 = arith.addf %310, %419 : vector<1x256xf32>
    %c74 = arith.constant 74 : index
    %421 = memref.load %arg1[%c74] : memref<180xf32, #tpu.memory_space<smem>>
    %422 = vector.broadcast %421 : f32 to vector<1x256xf32>
    %423 = arith.mulf %422, %412 : vector<1x256xf32>
    %424 = arith.addf %314, %423 : vector<1x256xf32>
    %c110 = arith.constant 110 : index
    %425 = memref.load %arg1[%c110] : memref<180xf32, #tpu.memory_space<smem>>
    %426 = vector.broadcast %425 : f32 to vector<1x256xf32>
    %427 = arith.mulf %426, %412 : vector<1x256xf32>
    %428 = arith.addf %318, %427 : vector<1x256xf32>
    %c146 = arith.constant 146 : index
    %429 = memref.load %arg1[%c146] : memref<180xf32, #tpu.memory_space<smem>>
    %430 = vector.broadcast %429 : f32 to vector<1x256xf32>
    %431 = arith.mulf %430, %412 : vector<1x256xf32>
    %432 = arith.addf %322, %431 : vector<1x256xf32>
    %433 = vector.extract_strided_slice %411 {offsets = [1, 0], sizes = [1, 256], strides = [1, 1]} : vector<8x256xf32> to vector<1x256xf32>
    %c11 = arith.constant 11 : index
    %434 = memref.load %arg1[%c11] : memref<180xf32, #tpu.memory_space<smem>>
    %435 = vector.broadcast %434 : f32 to vector<1x256xf32>
    %436 = arith.mulf %435, %433 : vector<1x256xf32>
    %437 = arith.addf %416, %436 : vector<1x256xf32>
    %c47 = arith.constant 47 : index
    %438 = memref.load %arg1[%c47] : memref<180xf32, #tpu.memory_space<smem>>
    %439 = vector.broadcast %438 : f32 to vector<1x256xf32>
    %440 = arith.mulf %439, %433 : vector<1x256xf32>
    %441 = arith.addf %420, %440 : vector<1x256xf32>
    %c83 = arith.constant 83 : index
    %442 = memref.load %arg1[%c83] : memref<180xf32, #tpu.memory_space<smem>>
    %443 = vector.broadcast %442 : f32 to vector<1x256xf32>
    %444 = arith.mulf %443, %433 : vector<1x256xf32>
    %445 = arith.addf %424, %444 : vector<1x256xf32>
    %c119 = arith.constant 119 : index
    %446 = memref.load %arg1[%c119] : memref<180xf32, #tpu.memory_space<smem>>
    %447 = vector.broadcast %446 : f32 to vector<1x256xf32>
    %448 = arith.mulf %447, %433 : vector<1x256xf32>
    %449 = arith.addf %428, %448 : vector<1x256xf32>
    %c155 = arith.constant 155 : index
    %450 = memref.load %arg1[%c155] : memref<180xf32, #tpu.memory_space<smem>>
    %451 = vector.broadcast %450 : f32 to vector<1x256xf32>
    %452 = arith.mulf %451, %433 : vector<1x256xf32>
    %453 = arith.addf %432, %452 : vector<1x256xf32>
    %454 = vector.extract_strided_slice %411 {offsets = [2, 0], sizes = [1, 256], strides = [1, 1]} : vector<8x256xf32> to vector<1x256xf32>
    %c20 = arith.constant 20 : index
    %455 = memref.load %arg1[%c20] : memref<180xf32, #tpu.memory_space<smem>>
    %456 = vector.broadcast %455 : f32 to vector<1x256xf32>
    %457 = arith.mulf %456, %454 : vector<1x256xf32>
    %458 = arith.addf %437, %457 : vector<1x256xf32>
    %c56 = arith.constant 56 : index
    %459 = memref.load %arg1[%c56] : memref<180xf32, #tpu.memory_space<smem>>
    %460 = vector.broadcast %459 : f32 to vector<1x256xf32>
    %461 = arith.mulf %460, %454 : vector<1x256xf32>
    %462 = arith.addf %441, %461 : vector<1x256xf32>
    %c92 = arith.constant 92 : index
    %463 = memref.load %arg1[%c92] : memref<180xf32, #tpu.memory_space<smem>>
    %464 = vector.broadcast %463 : f32 to vector<1x256xf32>
    %465 = arith.mulf %464, %454 : vector<1x256xf32>
    %466 = arith.addf %445, %465 : vector<1x256xf32>
    %c128_72 = arith.constant 128 : index
    %467 = memref.load %arg1[%c128_72] : memref<180xf32, #tpu.memory_space<smem>>
    %468 = vector.broadcast %467 : f32 to vector<1x256xf32>
    %469 = arith.mulf %468, %454 : vector<1x256xf32>
    %470 = arith.addf %449, %469 : vector<1x256xf32>
    %c164 = arith.constant 164 : index
    %471 = memref.load %arg1[%c164] : memref<180xf32, #tpu.memory_space<smem>>
    %472 = vector.broadcast %471 : f32 to vector<1x256xf32>
    %473 = arith.mulf %472, %454 : vector<1x256xf32>
    %474 = arith.addf %453, %473 : vector<1x256xf32>
    %475 = vector.extract_strided_slice %411 {offsets = [3, 0], sizes = [1, 256], strides = [1, 1]} : vector<8x256xf32> to vector<1x256xf32>
    %c29 = arith.constant 29 : index
    %476 = memref.load %arg1[%c29] : memref<180xf32, #tpu.memory_space<smem>>
    %477 = vector.broadcast %476 : f32 to vector<1x256xf32>
    %478 = arith.mulf %477, %475 : vector<1x256xf32>
    %479 = arith.addf %458, %478 : vector<1x256xf32>
    %c65 = arith.constant 65 : index
    %480 = memref.load %arg1[%c65] : memref<180xf32, #tpu.memory_space<smem>>
    %481 = vector.broadcast %480 : f32 to vector<1x256xf32>
    %482 = arith.mulf %481, %475 : vector<1x256xf32>
    %483 = arith.addf %462, %482 : vector<1x256xf32>
    %c101 = arith.constant 101 : index
    %484 = memref.load %arg1[%c101] : memref<180xf32, #tpu.memory_space<smem>>
    %485 = vector.broadcast %484 : f32 to vector<1x256xf32>
    %486 = arith.mulf %485, %475 : vector<1x256xf32>
    %487 = arith.addf %466, %486 : vector<1x256xf32>
    %c137 = arith.constant 137 : index
    %488 = memref.load %arg1[%c137] : memref<180xf32, #tpu.memory_space<smem>>
    %489 = vector.broadcast %488 : f32 to vector<1x256xf32>
    %490 = arith.mulf %489, %475 : vector<1x256xf32>
    %491 = arith.addf %470, %490 : vector<1x256xf32>
    %c173 = arith.constant 173 : index
    %492 = memref.load %arg1[%c173] : memref<180xf32, #tpu.memory_space<smem>>
    %493 = vector.broadcast %492 : f32 to vector<1x256xf32>
    %494 = arith.mulf %493, %475 : vector<1x256xf32>
    %495 = arith.addf %474, %494 : vector<1x256xf32>
    %496 = vector.extract_strided_slice %411 {offsets = [4, 0], sizes = [1, 256], strides = [1, 1]} : vector<8x256xf32> to vector<1x256xf32>
    %c2_73 = arith.constant 2 : index
    %497 = memref.load %arg1[%c2_73] : memref<180xf32, #tpu.memory_space<smem>>
    %498 = vector.broadcast %497 : f32 to vector<1x256xf32>
    %499 = arith.mulf %498, %496 : vector<1x256xf32>
    %500 = arith.addf %390, %499 : vector<1x256xf32>
    %c38_74 = arith.constant 38 : index
    %501 = memref.load %arg1[%c38_74] : memref<180xf32, #tpu.memory_space<smem>>
    %502 = vector.broadcast %501 : f32 to vector<1x256xf32>
    %503 = arith.mulf %502, %496 : vector<1x256xf32>
    %504 = arith.addf %394, %503 : vector<1x256xf32>
    %c74_75 = arith.constant 74 : index
    %505 = memref.load %arg1[%c74_75] : memref<180xf32, #tpu.memory_space<smem>>
    %506 = vector.broadcast %505 : f32 to vector<1x256xf32>
    %507 = arith.mulf %506, %496 : vector<1x256xf32>
    %508 = arith.addf %398, %507 : vector<1x256xf32>
    %c110_76 = arith.constant 110 : index
    %509 = memref.load %arg1[%c110_76] : memref<180xf32, #tpu.memory_space<smem>>
    %510 = vector.broadcast %509 : f32 to vector<1x256xf32>
    %511 = arith.mulf %510, %496 : vector<1x256xf32>
    %512 = arith.addf %402, %511 : vector<1x256xf32>
    %c146_77 = arith.constant 146 : index
    %513 = memref.load %arg1[%c146_77] : memref<180xf32, #tpu.memory_space<smem>>
    %514 = vector.broadcast %513 : f32 to vector<1x256xf32>
    %515 = arith.mulf %514, %496 : vector<1x256xf32>
    %516 = arith.addf %406, %515 : vector<1x256xf32>
    %517 = vector.extract_strided_slice %411 {offsets = [5, 0], sizes = [1, 256], strides = [1, 1]} : vector<8x256xf32> to vector<1x256xf32>
    %c11_78 = arith.constant 11 : index
    %518 = memref.load %arg1[%c11_78] : memref<180xf32, #tpu.memory_space<smem>>
    %519 = vector.broadcast %518 : f32 to vector<1x256xf32>
    %520 = arith.mulf %519, %517 : vector<1x256xf32>
    %521 = arith.addf %500, %520 : vector<1x256xf32>
    %c47_79 = arith.constant 47 : index
    %522 = memref.load %arg1[%c47_79] : memref<180xf32, #tpu.memory_space<smem>>
    %523 = vector.broadcast %522 : f32 to vector<1x256xf32>
    %524 = arith.mulf %523, %517 : vector<1x256xf32>
    %525 = arith.addf %504, %524 : vector<1x256xf32>
    %c83_80 = arith.constant 83 : index
    %526 = memref.load %arg1[%c83_80] : memref<180xf32, #tpu.memory_space<smem>>
    %527 = vector.broadcast %526 : f32 to vector<1x256xf32>
    %528 = arith.mulf %527, %517 : vector<1x256xf32>
    %529 = arith.addf %508, %528 : vector<1x256xf32>
    %c119_81 = arith.constant 119 : index
    %530 = memref.load %arg1[%c119_81] : memref<180xf32, #tpu.memory_space<smem>>
    %531 = vector.broadcast %530 : f32 to vector<1x256xf32>
    %532 = arith.mulf %531, %517 : vector<1x256xf32>
    %533 = arith.addf %512, %532 : vector<1x256xf32>
    %c155_82 = arith.constant 155 : index
    %534 = memref.load %arg1[%c155_82] : memref<180xf32, #tpu.memory_space<smem>>
    %535 = vector.broadcast %534 : f32 to vector<1x256xf32>
    %536 = arith.mulf %535, %517 : vector<1x256xf32>
    %537 = arith.addf %516, %536 : vector<1x256xf32>
    %538 = vector.extract_strided_slice %411 {offsets = [6, 0], sizes = [1, 256], strides = [1, 1]} : vector<8x256xf32> to vector<1x256xf32>
    %c20_83 = arith.constant 20 : index
    %539 = memref.load %arg1[%c20_83] : memref<180xf32, #tpu.memory_space<smem>>
    %540 = vector.broadcast %539 : f32 to vector<1x256xf32>
    %541 = arith.mulf %540, %538 : vector<1x256xf32>
    %542 = arith.addf %521, %541 : vector<1x256xf32>
    %c56_84 = arith.constant 56 : index
    %543 = memref.load %arg1[%c56_84] : memref<180xf32, #tpu.memory_space<smem>>
    %544 = vector.broadcast %543 : f32 to vector<1x256xf32>
    %545 = arith.mulf %544, %538 : vector<1x256xf32>
    %546 = arith.addf %525, %545 : vector<1x256xf32>
    %c92_85 = arith.constant 92 : index
    %547 = memref.load %arg1[%c92_85] : memref<180xf32, #tpu.memory_space<smem>>
    %548 = vector.broadcast %547 : f32 to vector<1x256xf32>
    %549 = arith.mulf %548, %538 : vector<1x256xf32>
    %550 = arith.addf %529, %549 : vector<1x256xf32>
    %c128_86 = arith.constant 128 : index
    %551 = memref.load %arg1[%c128_86] : memref<180xf32, #tpu.memory_space<smem>>
    %552 = vector.broadcast %551 : f32 to vector<1x256xf32>
    %553 = arith.mulf %552, %538 : vector<1x256xf32>
    %554 = arith.addf %533, %553 : vector<1x256xf32>
    %c164_87 = arith.constant 164 : index
    %555 = memref.load %arg1[%c164_87] : memref<180xf32, #tpu.memory_space<smem>>
    %556 = vector.broadcast %555 : f32 to vector<1x256xf32>
    %557 = arith.mulf %556, %538 : vector<1x256xf32>
    %558 = arith.addf %537, %557 : vector<1x256xf32>
    %559 = vector.extract_strided_slice %411 {offsets = [7, 0], sizes = [1, 256], strides = [1, 1]} : vector<8x256xf32> to vector<1x256xf32>
    %c29_88 = arith.constant 29 : index
    %560 = memref.load %arg1[%c29_88] : memref<180xf32, #tpu.memory_space<smem>>
    %561 = vector.broadcast %560 : f32 to vector<1x256xf32>
    %562 = arith.mulf %561, %559 : vector<1x256xf32>
    %563 = arith.addf %542, %562 : vector<1x256xf32>
    %c65_89 = arith.constant 65 : index
    %564 = memref.load %arg1[%c65_89] : memref<180xf32, #tpu.memory_space<smem>>
    %565 = vector.broadcast %564 : f32 to vector<1x256xf32>
    %566 = arith.mulf %565, %559 : vector<1x256xf32>
    %567 = arith.addf %546, %566 : vector<1x256xf32>
    %c101_90 = arith.constant 101 : index
    %568 = memref.load %arg1[%c101_90] : memref<180xf32, #tpu.memory_space<smem>>
    %569 = vector.broadcast %568 : f32 to vector<1x256xf32>
    %570 = arith.mulf %569, %559 : vector<1x256xf32>
    %571 = arith.addf %550, %570 : vector<1x256xf32>
    %c137_91 = arith.constant 137 : index
    %572 = memref.load %arg1[%c137_91] : memref<180xf32, #tpu.memory_space<smem>>
    %573 = vector.broadcast %572 : f32 to vector<1x256xf32>
    %574 = arith.mulf %573, %559 : vector<1x256xf32>
    %575 = arith.addf %554, %574 : vector<1x256xf32>
    %c173_92 = arith.constant 173 : index
    %576 = memref.load %arg1[%c173_92] : memref<180xf32, #tpu.memory_space<smem>>
    %577 = vector.broadcast %576 : f32 to vector<1x256xf32>
    %578 = arith.mulf %577, %559 : vector<1x256xf32>
    %579 = arith.addf %558, %578 : vector<1x256xf32>
    %c0_93 = arith.constant 0 : index
    %c127_94 = arith.constant 127 : index
    %580 = vector.load %arg4[%c0_93, %c127_94] : memref<8x512xf32, #tpu.memory_space<vmem>>, vector<8x256xf32>
    %cst_95 = arith.constant 0.000000e+00 : f32
    %581 = vector.shape_cast %22 : vector<1x256xi1> to vector<1x256xi1>
    %582 = vector.broadcast %581 : vector<1x256xi1> to vector<8x256xi1>
    %583 = vector.broadcast %cst_95 : f32 to vector<8x256xf32>
    %584 = arith.select %582, %580, %583 : vector<8x256xi1>, vector<8x256xf32>
    %585 = vector.extract_strided_slice %584 {offsets = [0, 0], sizes = [1, 256], strides = [1, 1]} : vector<8x256xf32> to vector<1x256xf32>
    %c3_96 = arith.constant 3 : index
    %586 = memref.load %arg1[%c3_96] : memref<180xf32, #tpu.memory_space<smem>>
    %587 = vector.broadcast %586 : f32 to vector<1x256xf32>
    %588 = arith.mulf %587, %585 : vector<1x256xf32>
    %589 = arith.addf %479, %588 : vector<1x256xf32>
    %c39 = arith.constant 39 : index
    %590 = memref.load %arg1[%c39] : memref<180xf32, #tpu.memory_space<smem>>
    %591 = vector.broadcast %590 : f32 to vector<1x256xf32>
    %592 = arith.mulf %591, %585 : vector<1x256xf32>
    %593 = arith.addf %483, %592 : vector<1x256xf32>
    %c75 = arith.constant 75 : index
    %594 = memref.load %arg1[%c75] : memref<180xf32, #tpu.memory_space<smem>>
    %595 = vector.broadcast %594 : f32 to vector<1x256xf32>
    %596 = arith.mulf %595, %585 : vector<1x256xf32>
    %597 = arith.addf %487, %596 : vector<1x256xf32>
    %c111_97 = arith.constant 111 : index
    %598 = memref.load %arg1[%c111_97] : memref<180xf32, #tpu.memory_space<smem>>
    %599 = vector.broadcast %598 : f32 to vector<1x256xf32>
    %600 = arith.mulf %599, %585 : vector<1x256xf32>
    %601 = arith.addf %491, %600 : vector<1x256xf32>
    %c147 = arith.constant 147 : index
    %602 = memref.load %arg1[%c147] : memref<180xf32, #tpu.memory_space<smem>>
    %603 = vector.broadcast %602 : f32 to vector<1x256xf32>
    %604 = arith.mulf %603, %585 : vector<1x256xf32>
    %605 = arith.addf %495, %604 : vector<1x256xf32>
    %606 = vector.extract_strided_slice %584 {offsets = [1, 0], sizes = [1, 256], strides = [1, 1]} : vector<8x256xf32> to vector<1x256xf32>
    %c12 = arith.constant 12 : index
    %607 = memref.load %arg1[%c12] : memref<180xf32, #tpu.memory_space<smem>>
    %608 = vector.broadcast %607 : f32 to vector<1x256xf32>
    %609 = arith.mulf %608, %606 : vector<1x256xf32>
    %610 = arith.addf %589, %609 : vector<1x256xf32>
    %c48 = arith.constant 48 : index
    %611 = memref.load %arg1[%c48] : memref<180xf32, #tpu.memory_space<smem>>
    %612 = vector.broadcast %611 : f32 to vector<1x256xf32>
    %613 = arith.mulf %612, %606 : vector<1x256xf32>
    %614 = arith.addf %593, %613 : vector<1x256xf32>
    %c84 = arith.constant 84 : index
    %615 = memref.load %arg1[%c84] : memref<180xf32, #tpu.memory_space<smem>>
    %616 = vector.broadcast %615 : f32 to vector<1x256xf32>
    %617 = arith.mulf %616, %606 : vector<1x256xf32>
    %618 = arith.addf %597, %617 : vector<1x256xf32>
    %c120 = arith.constant 120 : index
    %619 = memref.load %arg1[%c120] : memref<180xf32, #tpu.memory_space<smem>>
    %620 = vector.broadcast %619 : f32 to vector<1x256xf32>
    %621 = arith.mulf %620, %606 : vector<1x256xf32>
    %622 = arith.addf %601, %621 : vector<1x256xf32>
    %c156 = arith.constant 156 : index
    %623 = memref.load %arg1[%c156] : memref<180xf32, #tpu.memory_space<smem>>
    %624 = vector.broadcast %623 : f32 to vector<1x256xf32>
    %625 = arith.mulf %624, %606 : vector<1x256xf32>
    %626 = arith.addf %605, %625 : vector<1x256xf32>
    %627 = vector.extract_strided_slice %584 {offsets = [2, 0], sizes = [1, 256], strides = [1, 1]} : vector<8x256xf32> to vector<1x256xf32>
    %c21 = arith.constant 21 : index
    %628 = memref.load %arg1[%c21] : memref<180xf32, #tpu.memory_space<smem>>
    %629 = vector.broadcast %628 : f32 to vector<1x256xf32>
    %630 = arith.mulf %629, %627 : vector<1x256xf32>
    %631 = arith.addf %610, %630 : vector<1x256xf32>
    %c57 = arith.constant 57 : index
    %632 = memref.load %arg1[%c57] : memref<180xf32, #tpu.memory_space<smem>>
    %633 = vector.broadcast %632 : f32 to vector<1x256xf32>
    %634 = arith.mulf %633, %627 : vector<1x256xf32>
    %635 = arith.addf %614, %634 : vector<1x256xf32>
    %c93 = arith.constant 93 : index
    %636 = memref.load %arg1[%c93] : memref<180xf32, #tpu.memory_space<smem>>
    %637 = vector.broadcast %636 : f32 to vector<1x256xf32>
    %638 = arith.mulf %637, %627 : vector<1x256xf32>
    %639 = arith.addf %618, %638 : vector<1x256xf32>
    %c129 = arith.constant 129 : index
    %640 = memref.load %arg1[%c129] : memref<180xf32, #tpu.memory_space<smem>>
    %641 = vector.broadcast %640 : f32 to vector<1x256xf32>
    %642 = arith.mulf %641, %627 : vector<1x256xf32>
    %643 = arith.addf %622, %642 : vector<1x256xf32>
    %c165 = arith.constant 165 : index
    %644 = memref.load %arg1[%c165] : memref<180xf32, #tpu.memory_space<smem>>
    %645 = vector.broadcast %644 : f32 to vector<1x256xf32>
    %646 = arith.mulf %645, %627 : vector<1x256xf32>
    %647 = arith.addf %626, %646 : vector<1x256xf32>
    %648 = vector.extract_strided_slice %584 {offsets = [3, 0], sizes = [1, 256], strides = [1, 1]} : vector<8x256xf32> to vector<1x256xf32>
    %c30 = arith.constant 30 : index
    %649 = memref.load %arg1[%c30] : memref<180xf32, #tpu.memory_space<smem>>
    %650 = vector.broadcast %649 : f32 to vector<1x256xf32>
    %651 = arith.mulf %650, %648 : vector<1x256xf32>
    %652 = arith.addf %631, %651 : vector<1x256xf32>
    %c66 = arith.constant 66 : index
    %653 = memref.load %arg1[%c66] : memref<180xf32, #tpu.memory_space<smem>>
    %654 = vector.broadcast %653 : f32 to vector<1x256xf32>
    %655 = arith.mulf %654, %648 : vector<1x256xf32>
    %656 = arith.addf %635, %655 : vector<1x256xf32>
    %c102 = arith.constant 102 : index
    %657 = memref.load %arg1[%c102] : memref<180xf32, #tpu.memory_space<smem>>
    %658 = vector.broadcast %657 : f32 to vector<1x256xf32>
    %659 = arith.mulf %658, %648 : vector<1x256xf32>
    %660 = arith.addf %639, %659 : vector<1x256xf32>
    %c138 = arith.constant 138 : index
    %661 = memref.load %arg1[%c138] : memref<180xf32, #tpu.memory_space<smem>>
    %662 = vector.broadcast %661 : f32 to vector<1x256xf32>
    %663 = arith.mulf %662, %648 : vector<1x256xf32>
    %664 = arith.addf %643, %663 : vector<1x256xf32>
    %c174 = arith.constant 174 : index
    %665 = memref.load %arg1[%c174] : memref<180xf32, #tpu.memory_space<smem>>
    %666 = vector.broadcast %665 : f32 to vector<1x256xf32>
    %667 = arith.mulf %666, %648 : vector<1x256xf32>
    %668 = arith.addf %647, %667 : vector<1x256xf32>
    %669 = vector.extract_strided_slice %584 {offsets = [4, 0], sizes = [1, 256], strides = [1, 1]} : vector<8x256xf32> to vector<1x256xf32>
    %c3_98 = arith.constant 3 : index
    %670 = memref.load %arg1[%c3_98] : memref<180xf32, #tpu.memory_space<smem>>
    %671 = vector.broadcast %670 : f32 to vector<1x256xf32>
    %672 = arith.mulf %671, %669 : vector<1x256xf32>
    %673 = arith.addf %563, %672 : vector<1x256xf32>
    %c39_99 = arith.constant 39 : index
    %674 = memref.load %arg1[%c39_99] : memref<180xf32, #tpu.memory_space<smem>>
    %675 = vector.broadcast %674 : f32 to vector<1x256xf32>
    %676 = arith.mulf %675, %669 : vector<1x256xf32>
    %677 = arith.addf %567, %676 : vector<1x256xf32>
    %c75_100 = arith.constant 75 : index
    %678 = memref.load %arg1[%c75_100] : memref<180xf32, #tpu.memory_space<smem>>
    %679 = vector.broadcast %678 : f32 to vector<1x256xf32>
    %680 = arith.mulf %679, %669 : vector<1x256xf32>
    %681 = arith.addf %571, %680 : vector<1x256xf32>
    %c111_101 = arith.constant 111 : index
    %682 = memref.load %arg1[%c111_101] : memref<180xf32, #tpu.memory_space<smem>>
    %683 = vector.broadcast %682 : f32 to vector<1x256xf32>
    %684 = arith.mulf %683, %669 : vector<1x256xf32>
    %685 = arith.addf %575, %684 : vector<1x256xf32>
    %c147_102 = arith.constant 147 : index
    %686 = memref.load %arg1[%c147_102] : memref<180xf32, #tpu.memory_space<smem>>
    %687 = vector.broadcast %686 : f32 to vector<1x256xf32>
    %688 = arith.mulf %687, %669 : vector<1x256xf32>
    %689 = arith.addf %579, %688 : vector<1x256xf32>
    %690 = vector.extract_strided_slice %584 {offsets = [5, 0], sizes = [1, 256], strides = [1, 1]} : vector<8x256xf32> to vector<1x256xf32>
    %c12_103 = arith.constant 12 : index
    %691 = memref.load %arg1[%c12_103] : memref<180xf32, #tpu.memory_space<smem>>
    %692 = vector.broadcast %691 : f32 to vector<1x256xf32>
    %693 = arith.mulf %692, %690 : vector<1x256xf32>
    %694 = arith.addf %673, %693 : vector<1x256xf32>
    %c48_104 = arith.constant 48 : index
    %695 = memref.load %arg1[%c48_104] : memref<180xf32, #tpu.memory_space<smem>>
    %696 = vector.broadcast %695 : f32 to vector<1x256xf32>
    %697 = arith.mulf %696, %690 : vector<1x256xf32>
    %698 = arith.addf %677, %697 : vector<1x256xf32>
    %c84_105 = arith.constant 84 : index
    %699 = memref.load %arg1[%c84_105] : memref<180xf32, #tpu.memory_space<smem>>
    %700 = vector.broadcast %699 : f32 to vector<1x256xf32>
    %701 = arith.mulf %700, %690 : vector<1x256xf32>
    %702 = arith.addf %681, %701 : vector<1x256xf32>
    %c120_106 = arith.constant 120 : index
    %703 = memref.load %arg1[%c120_106] : memref<180xf32, #tpu.memory_space<smem>>
    %704 = vector.broadcast %703 : f32 to vector<1x256xf32>
    %705 = arith.mulf %704, %690 : vector<1x256xf32>
    %706 = arith.addf %685, %705 : vector<1x256xf32>
    %c156_107 = arith.constant 156 : index
    %707 = memref.load %arg1[%c156_107] : memref<180xf32, #tpu.memory_space<smem>>
    %708 = vector.broadcast %707 : f32 to vector<1x256xf32>
    %709 = arith.mulf %708, %690 : vector<1x256xf32>
    %710 = arith.addf %689, %709 : vector<1x256xf32>
    %711 = vector.extract_strided_slice %584 {offsets = [6, 0], sizes = [1, 256], strides = [1, 1]} : vector<8x256xf32> to vector<1x256xf32>
    %c21_108 = arith.constant 21 : index
    %712 = memref.load %arg1[%c21_108] : memref<180xf32, #tpu.memory_space<smem>>
    %713 = vector.broadcast %712 : f32 to vector<1x256xf32>
    %714 = arith.mulf %713, %711 : vector<1x256xf32>
    %715 = arith.addf %694, %714 : vector<1x256xf32>
    %c57_109 = arith.constant 57 : index
    %716 = memref.load %arg1[%c57_109] : memref<180xf32, #tpu.memory_space<smem>>
    %717 = vector.broadcast %716 : f32 to vector<1x256xf32>
    %718 = arith.mulf %717, %711 : vector<1x256xf32>
    %719 = arith.addf %698, %718 : vector<1x256xf32>
    %c93_110 = arith.constant 93 : index
    %720 = memref.load %arg1[%c93_110] : memref<180xf32, #tpu.memory_space<smem>>
    %721 = vector.broadcast %720 : f32 to vector<1x256xf32>
    %722 = arith.mulf %721, %711 : vector<1x256xf32>
    %723 = arith.addf %702, %722 : vector<1x256xf32>
    %c129_111 = arith.constant 129 : index
    %724 = memref.load %arg1[%c129_111] : memref<180xf32, #tpu.memory_space<smem>>
    %725 = vector.broadcast %724 : f32 to vector<1x256xf32>
    %726 = arith.mulf %725, %711 : vector<1x256xf32>
    %727 = arith.addf %706, %726 : vector<1x256xf32>
    %c165_112 = arith.constant 165 : index
    %728 = memref.load %arg1[%c165_112] : memref<180xf32, #tpu.memory_space<smem>>
    %729 = vector.broadcast %728 : f32 to vector<1x256xf32>
    %730 = arith.mulf %729, %711 : vector<1x256xf32>
    %731 = arith.addf %710, %730 : vector<1x256xf32>
    %732 = vector.extract_strided_slice %584 {offsets = [7, 0], sizes = [1, 256], strides = [1, 1]} : vector<8x256xf32> to vector<1x256xf32>
    %c30_113 = arith.constant 30 : index
    %733 = memref.load %arg1[%c30_113] : memref<180xf32, #tpu.memory_space<smem>>
    %734 = vector.broadcast %733 : f32 to vector<1x256xf32>
    %735 = arith.mulf %734, %732 : vector<1x256xf32>
    %736 = arith.addf %715, %735 : vector<1x256xf32>
    %c66_114 = arith.constant 66 : index
    %737 = memref.load %arg1[%c66_114] : memref<180xf32, #tpu.memory_space<smem>>
    %738 = vector.broadcast %737 : f32 to vector<1x256xf32>
    %739 = arith.mulf %738, %732 : vector<1x256xf32>
    %740 = arith.addf %719, %739 : vector<1x256xf32>
    %c102_115 = arith.constant 102 : index
    %741 = memref.load %arg1[%c102_115] : memref<180xf32, #tpu.memory_space<smem>>
    %742 = vector.broadcast %741 : f32 to vector<1x256xf32>
    %743 = arith.mulf %742, %732 : vector<1x256xf32>
    %744 = arith.addf %723, %743 : vector<1x256xf32>
    %c138_116 = arith.constant 138 : index
    %745 = memref.load %arg1[%c138_116] : memref<180xf32, #tpu.memory_space<smem>>
    %746 = vector.broadcast %745 : f32 to vector<1x256xf32>
    %747 = arith.mulf %746, %732 : vector<1x256xf32>
    %748 = arith.addf %727, %747 : vector<1x256xf32>
    %c174_117 = arith.constant 174 : index
    %749 = memref.load %arg1[%c174_117] : memref<180xf32, #tpu.memory_space<smem>>
    %750 = vector.broadcast %749 : f32 to vector<1x256xf32>
    %751 = arith.mulf %750, %732 : vector<1x256xf32>
    %752 = arith.addf %731, %751 : vector<1x256xf32>
    %c0_118 = arith.constant 0 : index
    %c128_119 = arith.constant 128 : index
    %753 = vector.load %arg4[%c0_118, %c128_119] : memref<8x512xf32, #tpu.memory_space<vmem>>, vector<8x256xf32>
    %754 = vector.extract_strided_slice %753 {offsets = [0, 0], sizes = [1, 256], strides = [1, 1]} : vector<8x256xf32> to vector<1x256xf32>
    %c4_120 = arith.constant 4 : index
    %755 = memref.load %arg1[%c4_120] : memref<180xf32, #tpu.memory_space<smem>>
    %756 = vector.broadcast %755 : f32 to vector<1x256xf32>
    %757 = arith.mulf %756, %754 : vector<1x256xf32>
    %758 = arith.addf %652, %757 : vector<1x256xf32>
    %c40 = arith.constant 40 : index
    %759 = memref.load %arg1[%c40] : memref<180xf32, #tpu.memory_space<smem>>
    %760 = vector.broadcast %759 : f32 to vector<1x256xf32>
    %761 = arith.mulf %760, %754 : vector<1x256xf32>
    %762 = arith.addf %656, %761 : vector<1x256xf32>
    %c76 = arith.constant 76 : index
    %763 = memref.load %arg1[%c76] : memref<180xf32, #tpu.memory_space<smem>>
    %764 = vector.broadcast %763 : f32 to vector<1x256xf32>
    %765 = arith.mulf %764, %754 : vector<1x256xf32>
    %766 = arith.addf %660, %765 : vector<1x256xf32>
    %c112_121 = arith.constant 112 : index
    %767 = memref.load %arg1[%c112_121] : memref<180xf32, #tpu.memory_space<smem>>
    %768 = vector.broadcast %767 : f32 to vector<1x256xf32>
    %769 = arith.mulf %768, %754 : vector<1x256xf32>
    %770 = arith.addf %664, %769 : vector<1x256xf32>
    %c148 = arith.constant 148 : index
    %771 = memref.load %arg1[%c148] : memref<180xf32, #tpu.memory_space<smem>>
    %772 = vector.broadcast %771 : f32 to vector<1x256xf32>
    %773 = arith.mulf %772, %754 : vector<1x256xf32>
    %774 = arith.addf %668, %773 : vector<1x256xf32>
    %775 = vector.extract_strided_slice %753 {offsets = [1, 0], sizes = [1, 256], strides = [1, 1]} : vector<8x256xf32> to vector<1x256xf32>
    %c13 = arith.constant 13 : index
    %776 = memref.load %arg1[%c13] : memref<180xf32, #tpu.memory_space<smem>>
    %777 = vector.broadcast %776 : f32 to vector<1x256xf32>
    %778 = arith.mulf %777, %775 : vector<1x256xf32>
    %779 = arith.addf %758, %778 : vector<1x256xf32>
    %c49 = arith.constant 49 : index
    %780 = memref.load %arg1[%c49] : memref<180xf32, #tpu.memory_space<smem>>
    %781 = vector.broadcast %780 : f32 to vector<1x256xf32>
    %782 = arith.mulf %781, %775 : vector<1x256xf32>
    %783 = arith.addf %762, %782 : vector<1x256xf32>
    %c85 = arith.constant 85 : index
    %784 = memref.load %arg1[%c85] : memref<180xf32, #tpu.memory_space<smem>>
    %785 = vector.broadcast %784 : f32 to vector<1x256xf32>
    %786 = arith.mulf %785, %775 : vector<1x256xf32>
    %787 = arith.addf %766, %786 : vector<1x256xf32>
    %c121 = arith.constant 121 : index
    %788 = memref.load %arg1[%c121] : memref<180xf32, #tpu.memory_space<smem>>
    %789 = vector.broadcast %788 : f32 to vector<1x256xf32>
    %790 = arith.mulf %789, %775 : vector<1x256xf32>
    %791 = arith.addf %770, %790 : vector<1x256xf32>
    %c157 = arith.constant 157 : index
    %792 = memref.load %arg1[%c157] : memref<180xf32, #tpu.memory_space<smem>>
    %793 = vector.broadcast %792 : f32 to vector<1x256xf32>
    %794 = arith.mulf %793, %775 : vector<1x256xf32>
    %795 = arith.addf %774, %794 : vector<1x256xf32>
    %796 = vector.extract_strided_slice %753 {offsets = [2, 0], sizes = [1, 256], strides = [1, 1]} : vector<8x256xf32> to vector<1x256xf32>
    %c22 = arith.constant 22 : index
    %797 = memref.load %arg1[%c22] : memref<180xf32, #tpu.memory_space<smem>>
    %798 = vector.broadcast %797 : f32 to vector<1x256xf32>
    %799 = arith.mulf %798, %796 : vector<1x256xf32>
    %800 = arith.addf %779, %799 : vector<1x256xf32>
    %c58 = arith.constant 58 : index
    %801 = memref.load %arg1[%c58] : memref<180xf32, #tpu.memory_space<smem>>
    %802 = vector.broadcast %801 : f32 to vector<1x256xf32>
    %803 = arith.mulf %802, %796 : vector<1x256xf32>
    %804 = arith.addf %783, %803 : vector<1x256xf32>
    %c94 = arith.constant 94 : index
    %805 = memref.load %arg1[%c94] : memref<180xf32, #tpu.memory_space<smem>>
    %806 = vector.broadcast %805 : f32 to vector<1x256xf32>
    %807 = arith.mulf %806, %796 : vector<1x256xf32>
    %808 = arith.addf %787, %807 : vector<1x256xf32>
    %c130 = arith.constant 130 : index
    %809 = memref.load %arg1[%c130] : memref<180xf32, #tpu.memory_space<smem>>
    %810 = vector.broadcast %809 : f32 to vector<1x256xf32>
    %811 = arith.mulf %810, %796 : vector<1x256xf32>
    %812 = arith.addf %791, %811 : vector<1x256xf32>
    %c166 = arith.constant 166 : index
    %813 = memref.load %arg1[%c166] : memref<180xf32, #tpu.memory_space<smem>>
    %814 = vector.broadcast %813 : f32 to vector<1x256xf32>
    %815 = arith.mulf %814, %796 : vector<1x256xf32>
    %816 = arith.addf %795, %815 : vector<1x256xf32>
    %817 = vector.extract_strided_slice %753 {offsets = [3, 0], sizes = [1, 256], strides = [1, 1]} : vector<8x256xf32> to vector<1x256xf32>
    %c31 = arith.constant 31 : index
    %818 = memref.load %arg1[%c31] : memref<180xf32, #tpu.memory_space<smem>>
    %819 = vector.broadcast %818 : f32 to vector<1x256xf32>
    %820 = arith.mulf %819, %817 : vector<1x256xf32>
    %821 = arith.addf %800, %820 : vector<1x256xf32>
    %c67 = arith.constant 67 : index
    %822 = memref.load %arg1[%c67] : memref<180xf32, #tpu.memory_space<smem>>
    %823 = vector.broadcast %822 : f32 to vector<1x256xf32>
    %824 = arith.mulf %823, %817 : vector<1x256xf32>
    %825 = arith.addf %804, %824 : vector<1x256xf32>
    %c103 = arith.constant 103 : index
    %826 = memref.load %arg1[%c103] : memref<180xf32, #tpu.memory_space<smem>>
    %827 = vector.broadcast %826 : f32 to vector<1x256xf32>
    %828 = arith.mulf %827, %817 : vector<1x256xf32>
    %829 = arith.addf %808, %828 : vector<1x256xf32>
    %c139 = arith.constant 139 : index
    %830 = memref.load %arg1[%c139] : memref<180xf32, #tpu.memory_space<smem>>
    %831 = vector.broadcast %830 : f32 to vector<1x256xf32>
    %832 = arith.mulf %831, %817 : vector<1x256xf32>
    %833 = arith.addf %812, %832 : vector<1x256xf32>
    %c175 = arith.constant 175 : index
    %834 = memref.load %arg1[%c175] : memref<180xf32, #tpu.memory_space<smem>>
    %835 = vector.broadcast %834 : f32 to vector<1x256xf32>
    %836 = arith.mulf %835, %817 : vector<1x256xf32>
    %837 = arith.addf %816, %836 : vector<1x256xf32>
    %838 = vector.extract_strided_slice %753 {offsets = [4, 0], sizes = [1, 256], strides = [1, 1]} : vector<8x256xf32> to vector<1x256xf32>
    %c4_122 = arith.constant 4 : index
    %839 = memref.load %arg1[%c4_122] : memref<180xf32, #tpu.memory_space<smem>>
    %840 = vector.broadcast %839 : f32 to vector<1x256xf32>
    %841 = arith.mulf %840, %838 : vector<1x256xf32>
    %842 = arith.addf %736, %841 : vector<1x256xf32>
    %c40_123 = arith.constant 40 : index
    %843 = memref.load %arg1[%c40_123] : memref<180xf32, #tpu.memory_space<smem>>
    %844 = vector.broadcast %843 : f32 to vector<1x256xf32>
    %845 = arith.mulf %844, %838 : vector<1x256xf32>
    %846 = arith.addf %740, %845 : vector<1x256xf32>
    %c76_124 = arith.constant 76 : index
    %847 = memref.load %arg1[%c76_124] : memref<180xf32, #tpu.memory_space<smem>>
    %848 = vector.broadcast %847 : f32 to vector<1x256xf32>
    %849 = arith.mulf %848, %838 : vector<1x256xf32>
    %850 = arith.addf %744, %849 : vector<1x256xf32>
    %c112_125 = arith.constant 112 : index
    %851 = memref.load %arg1[%c112_125] : memref<180xf32, #tpu.memory_space<smem>>
    %852 = vector.broadcast %851 : f32 to vector<1x256xf32>
    %853 = arith.mulf %852, %838 : vector<1x256xf32>
    %854 = arith.addf %748, %853 : vector<1x256xf32>
    %c148_126 = arith.constant 148 : index
    %855 = memref.load %arg1[%c148_126] : memref<180xf32, #tpu.memory_space<smem>>
    %856 = vector.broadcast %855 : f32 to vector<1x256xf32>
    %857 = arith.mulf %856, %838 : vector<1x256xf32>
    %858 = arith.addf %752, %857 : vector<1x256xf32>
    %859 = vector.extract_strided_slice %753 {offsets = [5, 0], sizes = [1, 256], strides = [1, 1]} : vector<8x256xf32> to vector<1x256xf32>
    %c13_127 = arith.constant 13 : index
    %860 = memref.load %arg1[%c13_127] : memref<180xf32, #tpu.memory_space<smem>>
    %861 = vector.broadcast %860 : f32 to vector<1x256xf32>
    %862 = arith.mulf %861, %859 : vector<1x256xf32>
    %863 = arith.addf %842, %862 : vector<1x256xf32>
    %c49_128 = arith.constant 49 : index
    %864 = memref.load %arg1[%c49_128] : memref<180xf32, #tpu.memory_space<smem>>
    %865 = vector.broadcast %864 : f32 to vector<1x256xf32>
    %866 = arith.mulf %865, %859 : vector<1x256xf32>
    %867 = arith.addf %846, %866 : vector<1x256xf32>
    %c85_129 = arith.constant 85 : index
    %868 = memref.load %arg1[%c85_129] : memref<180xf32, #tpu.memory_space<smem>>
    %869 = vector.broadcast %868 : f32 to vector<1x256xf32>
    %870 = arith.mulf %869, %859 : vector<1x256xf32>
    %871 = arith.addf %850, %870 : vector<1x256xf32>
    %c121_130 = arith.constant 121 : index
    %872 = memref.load %arg1[%c121_130] : memref<180xf32, #tpu.memory_space<smem>>
    %873 = vector.broadcast %872 : f32 to vector<1x256xf32>
    %874 = arith.mulf %873, %859 : vector<1x256xf32>
    %875 = arith.addf %854, %874 : vector<1x256xf32>
    %c157_131 = arith.constant 157 : index
    %876 = memref.load %arg1[%c157_131] : memref<180xf32, #tpu.memory_space<smem>>
    %877 = vector.broadcast %876 : f32 to vector<1x256xf32>
    %878 = arith.mulf %877, %859 : vector<1x256xf32>
    %879 = arith.addf %858, %878 : vector<1x256xf32>
    %880 = vector.extract_strided_slice %753 {offsets = [6, 0], sizes = [1, 256], strides = [1, 1]} : vector<8x256xf32> to vector<1x256xf32>
    %c22_132 = arith.constant 22 : index
    %881 = memref.load %arg1[%c22_132] : memref<180xf32, #tpu.memory_space<smem>>
    %882 = vector.broadcast %881 : f32 to vector<1x256xf32>
    %883 = arith.mulf %882, %880 : vector<1x256xf32>
    %884 = arith.addf %863, %883 : vector<1x256xf32>
    %c58_133 = arith.constant 58 : index
    %885 = memref.load %arg1[%c58_133] : memref<180xf32, #tpu.memory_space<smem>>
    %886 = vector.broadcast %885 : f32 to vector<1x256xf32>
    %887 = arith.mulf %886, %880 : vector<1x256xf32>
    %888 = arith.addf %867, %887 : vector<1x256xf32>
    %c94_134 = arith.constant 94 : index
    %889 = memref.load %arg1[%c94_134] : memref<180xf32, #tpu.memory_space<smem>>
    %890 = vector.broadcast %889 : f32 to vector<1x256xf32>
    %891 = arith.mulf %890, %880 : vector<1x256xf32>
    %892 = arith.addf %871, %891 : vector<1x256xf32>
    %c130_135 = arith.constant 130 : index
    %893 = memref.load %arg1[%c130_135] : memref<180xf32, #tpu.memory_space<smem>>
    %894 = vector.broadcast %893 : f32 to vector<1x256xf32>
    %895 = arith.mulf %894, %880 : vector<1x256xf32>
    %896 = arith.addf %875, %895 : vector<1x256xf32>
    %c166_136 = arith.constant 166 : index
    %897 = memref.load %arg1[%c166_136] : memref<180xf32, #tpu.memory_space<smem>>
    %898 = vector.broadcast %897 : f32 to vector<1x256xf32>
    %899 = arith.mulf %898, %880 : vector<1x256xf32>
    %900 = arith.addf %879, %899 : vector<1x256xf32>
    %901 = vector.extract_strided_slice %753 {offsets = [7, 0], sizes = [1, 256], strides = [1, 1]} : vector<8x256xf32> to vector<1x256xf32>
    %c31_137 = arith.constant 31 : index
    %902 = memref.load %arg1[%c31_137] : memref<180xf32, #tpu.memory_space<smem>>
    %903 = vector.broadcast %902 : f32 to vector<1x256xf32>
    %904 = arith.mulf %903, %901 : vector<1x256xf32>
    %905 = arith.addf %884, %904 : vector<1x256xf32>
    %c67_138 = arith.constant 67 : index
    %906 = memref.load %arg1[%c67_138] : memref<180xf32, #tpu.memory_space<smem>>
    %907 = vector.broadcast %906 : f32 to vector<1x256xf32>
    %908 = arith.mulf %907, %901 : vector<1x256xf32>
    %909 = arith.addf %888, %908 : vector<1x256xf32>
    %c103_139 = arith.constant 103 : index
    %910 = memref.load %arg1[%c103_139] : memref<180xf32, #tpu.memory_space<smem>>
    %911 = vector.broadcast %910 : f32 to vector<1x256xf32>
    %912 = arith.mulf %911, %901 : vector<1x256xf32>
    %913 = arith.addf %892, %912 : vector<1x256xf32>
    %c139_140 = arith.constant 139 : index
    %914 = memref.load %arg1[%c139_140] : memref<180xf32, #tpu.memory_space<smem>>
    %915 = vector.broadcast %914 : f32 to vector<1x256xf32>
    %916 = arith.mulf %915, %901 : vector<1x256xf32>
    %917 = arith.addf %896, %916 : vector<1x256xf32>
    %c175_141 = arith.constant 175 : index
    %918 = memref.load %arg1[%c175_141] : memref<180xf32, #tpu.memory_space<smem>>
    %919 = vector.broadcast %918 : f32 to vector<1x256xf32>
    %920 = arith.mulf %919, %901 : vector<1x256xf32>
    %921 = arith.addf %900, %920 : vector<1x256xf32>
    %c0_142 = arith.constant 0 : index
    %c129_143 = arith.constant 129 : index
    %922 = vector.load %arg4[%c0_142, %c129_143] : memref<8x512xf32, #tpu.memory_space<vmem>>, vector<8x256xf32>
    %cst_144 = arith.constant 0.000000e+00 : f32
    %923 = vector.shape_cast %24 : vector<1x256xi1> to vector<1x256xi1>
    %924 = vector.broadcast %923 : vector<1x256xi1> to vector<8x256xi1>
    %925 = vector.broadcast %cst_144 : f32 to vector<8x256xf32>
    %926 = arith.select %924, %922, %925 : vector<8x256xi1>, vector<8x256xf32>
    %927 = vector.extract_strided_slice %926 {offsets = [0, 0], sizes = [1, 256], strides = [1, 1]} : vector<8x256xf32> to vector<1x256xf32>
    %c5 = arith.constant 5 : index
    %928 = memref.load %arg1[%c5] : memref<180xf32, #tpu.memory_space<smem>>
    %929 = vector.broadcast %928 : f32 to vector<1x256xf32>
    %930 = arith.mulf %929, %927 : vector<1x256xf32>
    %931 = arith.addf %821, %930 : vector<1x256xf32>
    %c41 = arith.constant 41 : index
    %932 = memref.load %arg1[%c41] : memref<180xf32, #tpu.memory_space<smem>>
    %933 = vector.broadcast %932 : f32 to vector<1x256xf32>
    %934 = arith.mulf %933, %927 : vector<1x256xf32>
    %935 = arith.addf %825, %934 : vector<1x256xf32>
    %c77 = arith.constant 77 : index
    %936 = memref.load %arg1[%c77] : memref<180xf32, #tpu.memory_space<smem>>
    %937 = vector.broadcast %936 : f32 to vector<1x256xf32>
    %938 = arith.mulf %937, %927 : vector<1x256xf32>
    %939 = arith.addf %829, %938 : vector<1x256xf32>
    %c113_145 = arith.constant 113 : index
    %940 = memref.load %arg1[%c113_145] : memref<180xf32, #tpu.memory_space<smem>>
    %941 = vector.broadcast %940 : f32 to vector<1x256xf32>
    %942 = arith.mulf %941, %927 : vector<1x256xf32>
    %943 = arith.addf %833, %942 : vector<1x256xf32>
    %c149 = arith.constant 149 : index
    %944 = memref.load %arg1[%c149] : memref<180xf32, #tpu.memory_space<smem>>
    %945 = vector.broadcast %944 : f32 to vector<1x256xf32>
    %946 = arith.mulf %945, %927 : vector<1x256xf32>
    %947 = arith.addf %837, %946 : vector<1x256xf32>
    %948 = vector.extract_strided_slice %926 {offsets = [1, 0], sizes = [1, 256], strides = [1, 1]} : vector<8x256xf32> to vector<1x256xf32>
    %c14 = arith.constant 14 : index
    %949 = memref.load %arg1[%c14] : memref<180xf32, #tpu.memory_space<smem>>
    %950 = vector.broadcast %949 : f32 to vector<1x256xf32>
    %951 = arith.mulf %950, %948 : vector<1x256xf32>
    %952 = arith.addf %931, %951 : vector<1x256xf32>
    %c50 = arith.constant 50 : index
    %953 = memref.load %arg1[%c50] : memref<180xf32, #tpu.memory_space<smem>>
    %954 = vector.broadcast %953 : f32 to vector<1x256xf32>
    %955 = arith.mulf %954, %948 : vector<1x256xf32>
    %956 = arith.addf %935, %955 : vector<1x256xf32>
    %c86 = arith.constant 86 : index
    %957 = memref.load %arg1[%c86] : memref<180xf32, #tpu.memory_space<smem>>
    %958 = vector.broadcast %957 : f32 to vector<1x256xf32>
    %959 = arith.mulf %958, %948 : vector<1x256xf32>
    %960 = arith.addf %939, %959 : vector<1x256xf32>
    %c122 = arith.constant 122 : index
    %961 = memref.load %arg1[%c122] : memref<180xf32, #tpu.memory_space<smem>>
    %962 = vector.broadcast %961 : f32 to vector<1x256xf32>
    %963 = arith.mulf %962, %948 : vector<1x256xf32>
    %964 = arith.addf %943, %963 : vector<1x256xf32>
    %c158 = arith.constant 158 : index
    %965 = memref.load %arg1[%c158] : memref<180xf32, #tpu.memory_space<smem>>
    %966 = vector.broadcast %965 : f32 to vector<1x256xf32>
    %967 = arith.mulf %966, %948 : vector<1x256xf32>
    %968 = arith.addf %947, %967 : vector<1x256xf32>
    %969 = vector.extract_strided_slice %926 {offsets = [2, 0], sizes = [1, 256], strides = [1, 1]} : vector<8x256xf32> to vector<1x256xf32>
    %c23 = arith.constant 23 : index
    %970 = memref.load %arg1[%c23] : memref<180xf32, #tpu.memory_space<smem>>
    %971 = vector.broadcast %970 : f32 to vector<1x256xf32>
    %972 = arith.mulf %971, %969 : vector<1x256xf32>
    %973 = arith.addf %952, %972 : vector<1x256xf32>
    %c59 = arith.constant 59 : index
    %974 = memref.load %arg1[%c59] : memref<180xf32, #tpu.memory_space<smem>>
    %975 = vector.broadcast %974 : f32 to vector<1x256xf32>
    %976 = arith.mulf %975, %969 : vector<1x256xf32>
    %977 = arith.addf %956, %976 : vector<1x256xf32>
    %c95 = arith.constant 95 : index
    %978 = memref.load %arg1[%c95] : memref<180xf32, #tpu.memory_space<smem>>
    %979 = vector.broadcast %978 : f32 to vector<1x256xf32>
    %980 = arith.mulf %979, %969 : vector<1x256xf32>
    %981 = arith.addf %960, %980 : vector<1x256xf32>
    %c131 = arith.constant 131 : index
    %982 = memref.load %arg1[%c131] : memref<180xf32, #tpu.memory_space<smem>>
    %983 = vector.broadcast %982 : f32 to vector<1x256xf32>
    %984 = arith.mulf %983, %969 : vector<1x256xf32>
    %985 = arith.addf %964, %984 : vector<1x256xf32>
    %c167 = arith.constant 167 : index
    %986 = memref.load %arg1[%c167] : memref<180xf32, #tpu.memory_space<smem>>
    %987 = vector.broadcast %986 : f32 to vector<1x256xf32>
    %988 = arith.mulf %987, %969 : vector<1x256xf32>
    %989 = arith.addf %968, %988 : vector<1x256xf32>
    %990 = vector.extract_strided_slice %926 {offsets = [3, 0], sizes = [1, 256], strides = [1, 1]} : vector<8x256xf32> to vector<1x256xf32>
    %c32 = arith.constant 32 : index
    %991 = memref.load %arg1[%c32] : memref<180xf32, #tpu.memory_space<smem>>
    %992 = vector.broadcast %991 : f32 to vector<1x256xf32>
    %993 = arith.mulf %992, %990 : vector<1x256xf32>
    %994 = arith.addf %973, %993 : vector<1x256xf32>
    %c68 = arith.constant 68 : index
    %995 = memref.load %arg1[%c68] : memref<180xf32, #tpu.memory_space<smem>>
    %996 = vector.broadcast %995 : f32 to vector<1x256xf32>
    %997 = arith.mulf %996, %990 : vector<1x256xf32>
    %998 = arith.addf %977, %997 : vector<1x256xf32>
    %c104 = arith.constant 104 : index
    %999 = memref.load %arg1[%c104] : memref<180xf32, #tpu.memory_space<smem>>
    %1000 = vector.broadcast %999 : f32 to vector<1x256xf32>
    %1001 = arith.mulf %1000, %990 : vector<1x256xf32>
    %1002 = arith.addf %981, %1001 : vector<1x256xf32>
    %c140 = arith.constant 140 : index
    %1003 = memref.load %arg1[%c140] : memref<180xf32, #tpu.memory_space<smem>>
    %1004 = vector.broadcast %1003 : f32 to vector<1x256xf32>
    %1005 = arith.mulf %1004, %990 : vector<1x256xf32>
    %1006 = arith.addf %985, %1005 : vector<1x256xf32>
    %c176 = arith.constant 176 : index
    %1007 = memref.load %arg1[%c176] : memref<180xf32, #tpu.memory_space<smem>>
    %1008 = vector.broadcast %1007 : f32 to vector<1x256xf32>
    %1009 = arith.mulf %1008, %990 : vector<1x256xf32>
    %1010 = arith.addf %989, %1009 : vector<1x256xf32>
    %1011 = vector.extract_strided_slice %926 {offsets = [4, 0], sizes = [1, 256], strides = [1, 1]} : vector<8x256xf32> to vector<1x256xf32>
    %c5_146 = arith.constant 5 : index
    %1012 = memref.load %arg1[%c5_146] : memref<180xf32, #tpu.memory_space<smem>>
    %1013 = vector.broadcast %1012 : f32 to vector<1x256xf32>
    %1014 = arith.mulf %1013, %1011 : vector<1x256xf32>
    %1015 = arith.addf %905, %1014 : vector<1x256xf32>
    %c41_147 = arith.constant 41 : index
    %1016 = memref.load %arg1[%c41_147] : memref<180xf32, #tpu.memory_space<smem>>
    %1017 = vector.broadcast %1016 : f32 to vector<1x256xf32>
    %1018 = arith.mulf %1017, %1011 : vector<1x256xf32>
    %1019 = arith.addf %909, %1018 : vector<1x256xf32>
    %c77_148 = arith.constant 77 : index
    %1020 = memref.load %arg1[%c77_148] : memref<180xf32, #tpu.memory_space<smem>>
    %1021 = vector.broadcast %1020 : f32 to vector<1x256xf32>
    %1022 = arith.mulf %1021, %1011 : vector<1x256xf32>
    %1023 = arith.addf %913, %1022 : vector<1x256xf32>
    %c113_149 = arith.constant 113 : index
    %1024 = memref.load %arg1[%c113_149] : memref<180xf32, #tpu.memory_space<smem>>
    %1025 = vector.broadcast %1024 : f32 to vector<1x256xf32>
    %1026 = arith.mulf %1025, %1011 : vector<1x256xf32>
    %1027 = arith.addf %917, %1026 : vector<1x256xf32>
    %c149_150 = arith.constant 149 : index
    %1028 = memref.load %arg1[%c149_150] : memref<180xf32, #tpu.memory_space<smem>>
    %1029 = vector.broadcast %1028 : f32 to vector<1x256xf32>
    %1030 = arith.mulf %1029, %1011 : vector<1x256xf32>
    %1031 = arith.addf %921, %1030 : vector<1x256xf32>
    %1032 = vector.extract_strided_slice %926 {offsets = [5, 0], sizes = [1, 256], strides = [1, 1]} : vector<8x256xf32> to vector<1x256xf32>
    %c14_151 = arith.constant 14 : index
    %1033 = memref.load %arg1[%c14_151] : memref<180xf32, #tpu.memory_space<smem>>
    %1034 = vector.broadcast %1033 : f32 to vector<1x256xf32>
    %1035 = arith.mulf %1034, %1032 : vector<1x256xf32>
    %1036 = arith.addf %1015, %1035 : vector<1x256xf32>
    %c50_152 = arith.constant 50 : index
    %1037 = memref.load %arg1[%c50_152] : memref<180xf32, #tpu.memory_space<smem>>
    %1038 = vector.broadcast %1037 : f32 to vector<1x256xf32>
    %1039 = arith.mulf %1038, %1032 : vector<1x256xf32>
    %1040 = arith.addf %1019, %1039 : vector<1x256xf32>
    %c86_153 = arith.constant 86 : index
    %1041 = memref.load %arg1[%c86_153] : memref<180xf32, #tpu.memory_space<smem>>
    %1042 = vector.broadcast %1041 : f32 to vector<1x256xf32>
    %1043 = arith.mulf %1042, %1032 : vector<1x256xf32>
    %1044 = arith.addf %1023, %1043 : vector<1x256xf32>
    %c122_154 = arith.constant 122 : index
    %1045 = memref.load %arg1[%c122_154] : memref<180xf32, #tpu.memory_space<smem>>
    %1046 = vector.broadcast %1045 : f32 to vector<1x256xf32>
    %1047 = arith.mulf %1046, %1032 : vector<1x256xf32>
    %1048 = arith.addf %1027, %1047 : vector<1x256xf32>
    %c158_155 = arith.constant 158 : index
    %1049 = memref.load %arg1[%c158_155] : memref<180xf32, #tpu.memory_space<smem>>
    %1050 = vector.broadcast %1049 : f32 to vector<1x256xf32>
    %1051 = arith.mulf %1050, %1032 : vector<1x256xf32>
    %1052 = arith.addf %1031, %1051 : vector<1x256xf32>
    %1053 = vector.extract_strided_slice %926 {offsets = [6, 0], sizes = [1, 256], strides = [1, 1]} : vector<8x256xf32> to vector<1x256xf32>
    %c23_156 = arith.constant 23 : index
    %1054 = memref.load %arg1[%c23_156] : memref<180xf32, #tpu.memory_space<smem>>
    %1055 = vector.broadcast %1054 : f32 to vector<1x256xf32>
    %1056 = arith.mulf %1055, %1053 : vector<1x256xf32>
    %1057 = arith.addf %1036, %1056 : vector<1x256xf32>
    %c59_157 = arith.constant 59 : index
    %1058 = memref.load %arg1[%c59_157] : memref<180xf32, #tpu.memory_space<smem>>
    %1059 = vector.broadcast %1058 : f32 to vector<1x256xf32>
    %1060 = arith.mulf %1059, %1053 : vector<1x256xf32>
    %1061 = arith.addf %1040, %1060 : vector<1x256xf32>
    %c95_158 = arith.constant 95 : index
    %1062 = memref.load %arg1[%c95_158] : memref<180xf32, #tpu.memory_space<smem>>
    %1063 = vector.broadcast %1062 : f32 to vector<1x256xf32>
    %1064 = arith.mulf %1063, %1053 : vector<1x256xf32>
    %1065 = arith.addf %1044, %1064 : vector<1x256xf32>
    %c131_159 = arith.constant 131 : index
    %1066 = memref.load %arg1[%c131_159] : memref<180xf32, #tpu.memory_space<smem>>
    %1067 = vector.broadcast %1066 : f32 to vector<1x256xf32>
    %1068 = arith.mulf %1067, %1053 : vector<1x256xf32>
    %1069 = arith.addf %1048, %1068 : vector<1x256xf32>
    %c167_160 = arith.constant 167 : index
    %1070 = memref.load %arg1[%c167_160] : memref<180xf32, #tpu.memory_space<smem>>
    %1071 = vector.broadcast %1070 : f32 to vector<1x256xf32>
    %1072 = arith.mulf %1071, %1053 : vector<1x256xf32>
    %1073 = arith.addf %1052, %1072 : vector<1x256xf32>
    %1074 = vector.extract_strided_slice %926 {offsets = [7, 0], sizes = [1, 256], strides = [1, 1]} : vector<8x256xf32> to vector<1x256xf32>
    %c32_161 = arith.constant 32 : index
    %1075 = memref.load %arg1[%c32_161] : memref<180xf32, #tpu.memory_space<smem>>
    %1076 = vector.broadcast %1075 : f32 to vector<1x256xf32>
    %1077 = arith.mulf %1076, %1074 : vector<1x256xf32>
    %1078 = arith.addf %1057, %1077 : vector<1x256xf32>
    %c68_162 = arith.constant 68 : index
    %1079 = memref.load %arg1[%c68_162] : memref<180xf32, #tpu.memory_space<smem>>
    %1080 = vector.broadcast %1079 : f32 to vector<1x256xf32>
    %1081 = arith.mulf %1080, %1074 : vector<1x256xf32>
    %1082 = arith.addf %1061, %1081 : vector<1x256xf32>
    %c104_163 = arith.constant 104 : index
    %1083 = memref.load %arg1[%c104_163] : memref<180xf32, #tpu.memory_space<smem>>
    %1084 = vector.broadcast %1083 : f32 to vector<1x256xf32>
    %1085 = arith.mulf %1084, %1074 : vector<1x256xf32>
    %1086 = arith.addf %1065, %1085 : vector<1x256xf32>
    %c140_164 = arith.constant 140 : index
    %1087 = memref.load %arg1[%c140_164] : memref<180xf32, #tpu.memory_space<smem>>
    %1088 = vector.broadcast %1087 : f32 to vector<1x256xf32>
    %1089 = arith.mulf %1088, %1074 : vector<1x256xf32>
    %1090 = arith.addf %1069, %1089 : vector<1x256xf32>
    %c176_165 = arith.constant 176 : index
    %1091 = memref.load %arg1[%c176_165] : memref<180xf32, #tpu.memory_space<smem>>
    %1092 = vector.broadcast %1091 : f32 to vector<1x256xf32>
    %1093 = arith.mulf %1092, %1074 : vector<1x256xf32>
    %1094 = arith.addf %1073, %1093 : vector<1x256xf32>
    %c0_166 = arith.constant 0 : index
    %c143 = arith.constant 143 : index
    %1095 = vector.load %arg4[%c0_166, %c143] : memref<8x512xf32, #tpu.memory_space<vmem>>, vector<8x256xf32>
    %cst_167 = arith.constant 0.000000e+00 : f32
    %1096 = vector.shape_cast %22 : vector<1x256xi1> to vector<1x256xi1>
    %1097 = vector.broadcast %1096 : vector<1x256xi1> to vector<8x256xi1>
    %1098 = vector.broadcast %cst_167 : f32 to vector<8x256xf32>
    %1099 = arith.select %1097, %1095, %1098 : vector<8x256xi1>, vector<8x256xf32>
    %1100 = vector.extract_strided_slice %1099 {offsets = [0, 0], sizes = [1, 256], strides = [1, 1]} : vector<8x256xf32> to vector<1x256xf32>
    %c6 = arith.constant 6 : index
    %1101 = memref.load %arg1[%c6] : memref<180xf32, #tpu.memory_space<smem>>
    %1102 = vector.broadcast %1101 : f32 to vector<1x256xf32>
    %1103 = arith.mulf %1102, %1100 : vector<1x256xf32>
    %1104 = arith.addf %994, %1103 : vector<1x256xf32>
    %c42 = arith.constant 42 : index
    %1105 = memref.load %arg1[%c42] : memref<180xf32, #tpu.memory_space<smem>>
    %1106 = vector.broadcast %1105 : f32 to vector<1x256xf32>
    %1107 = arith.mulf %1106, %1100 : vector<1x256xf32>
    %1108 = arith.addf %998, %1107 : vector<1x256xf32>
    %c78 = arith.constant 78 : index
    %1109 = memref.load %arg1[%c78] : memref<180xf32, #tpu.memory_space<smem>>
    %1110 = vector.broadcast %1109 : f32 to vector<1x256xf32>
    %1111 = arith.mulf %1110, %1100 : vector<1x256xf32>
    %1112 = arith.addf %1002, %1111 : vector<1x256xf32>
    %c114 = arith.constant 114 : index
    %1113 = memref.load %arg1[%c114] : memref<180xf32, #tpu.memory_space<smem>>
    %1114 = vector.broadcast %1113 : f32 to vector<1x256xf32>
    %1115 = arith.mulf %1114, %1100 : vector<1x256xf32>
    %1116 = arith.addf %1006, %1115 : vector<1x256xf32>
    %c150 = arith.constant 150 : index
    %1117 = memref.load %arg1[%c150] : memref<180xf32, #tpu.memory_space<smem>>
    %1118 = vector.broadcast %1117 : f32 to vector<1x256xf32>
    %1119 = arith.mulf %1118, %1100 : vector<1x256xf32>
    %1120 = arith.addf %1010, %1119 : vector<1x256xf32>
    %1121 = vector.extract_strided_slice %1099 {offsets = [1, 0], sizes = [1, 256], strides = [1, 1]} : vector<8x256xf32> to vector<1x256xf32>
    %c15 = arith.constant 15 : index
    %1122 = memref.load %arg1[%c15] : memref<180xf32, #tpu.memory_space<smem>>
    %1123 = vector.broadcast %1122 : f32 to vector<1x256xf32>
    %1124 = arith.mulf %1123, %1121 : vector<1x256xf32>
    %1125 = arith.addf %1104, %1124 : vector<1x256xf32>
    %c51 = arith.constant 51 : index
    %1126 = memref.load %arg1[%c51] : memref<180xf32, #tpu.memory_space<smem>>
    %1127 = vector.broadcast %1126 : f32 to vector<1x256xf32>
    %1128 = arith.mulf %1127, %1121 : vector<1x256xf32>
    %1129 = arith.addf %1108, %1128 : vector<1x256xf32>
    %c87 = arith.constant 87 : index
    %1130 = memref.load %arg1[%c87] : memref<180xf32, #tpu.memory_space<smem>>
    %1131 = vector.broadcast %1130 : f32 to vector<1x256xf32>
    %1132 = arith.mulf %1131, %1121 : vector<1x256xf32>
    %1133 = arith.addf %1112, %1132 : vector<1x256xf32>
    %c123 = arith.constant 123 : index
    %1134 = memref.load %arg1[%c123] : memref<180xf32, #tpu.memory_space<smem>>
    %1135 = vector.broadcast %1134 : f32 to vector<1x256xf32>
    %1136 = arith.mulf %1135, %1121 : vector<1x256xf32>
    %1137 = arith.addf %1116, %1136 : vector<1x256xf32>
    %c159 = arith.constant 159 : index
    %1138 = memref.load %arg1[%c159] : memref<180xf32, #tpu.memory_space<smem>>
    %1139 = vector.broadcast %1138 : f32 to vector<1x256xf32>
    %1140 = arith.mulf %1139, %1121 : vector<1x256xf32>
    %1141 = arith.addf %1120, %1140 : vector<1x256xf32>
    %1142 = vector.extract_strided_slice %1099 {offsets = [2, 0], sizes = [1, 256], strides = [1, 1]} : vector<8x256xf32> to vector<1x256xf32>
    %c24 = arith.constant 24 : index
    %1143 = memref.load %arg1[%c24] : memref<180xf32, #tpu.memory_space<smem>>
    %1144 = vector.broadcast %1143 : f32 to vector<1x256xf32>
    %1145 = arith.mulf %1144, %1142 : vector<1x256xf32>
    %1146 = arith.addf %1125, %1145 : vector<1x256xf32>
    %c60 = arith.constant 60 : index
    %1147 = memref.load %arg1[%c60] : memref<180xf32, #tpu.memory_space<smem>>
    %1148 = vector.broadcast %1147 : f32 to vector<1x256xf32>
    %1149 = arith.mulf %1148, %1142 : vector<1x256xf32>
    %1150 = arith.addf %1129, %1149 : vector<1x256xf32>
    %c96 = arith.constant 96 : index
    %1151 = memref.load %arg1[%c96] : memref<180xf32, #tpu.memory_space<smem>>
    %1152 = vector.broadcast %1151 : f32 to vector<1x256xf32>
    %1153 = arith.mulf %1152, %1142 : vector<1x256xf32>
    %1154 = arith.addf %1133, %1153 : vector<1x256xf32>
    %c132 = arith.constant 132 : index
    %1155 = memref.load %arg1[%c132] : memref<180xf32, #tpu.memory_space<smem>>
    %1156 = vector.broadcast %1155 : f32 to vector<1x256xf32>
    %1157 = arith.mulf %1156, %1142 : vector<1x256xf32>
    %1158 = arith.addf %1137, %1157 : vector<1x256xf32>
    %c168 = arith.constant 168 : index
    %1159 = memref.load %arg1[%c168] : memref<180xf32, #tpu.memory_space<smem>>
    %1160 = vector.broadcast %1159 : f32 to vector<1x256xf32>
    %1161 = arith.mulf %1160, %1142 : vector<1x256xf32>
    %1162 = arith.addf %1141, %1161 : vector<1x256xf32>
    %1163 = vector.extract_strided_slice %1099 {offsets = [3, 0], sizes = [1, 256], strides = [1, 1]} : vector<8x256xf32> to vector<1x256xf32>
    %c33 = arith.constant 33 : index
    %1164 = memref.load %arg1[%c33] : memref<180xf32, #tpu.memory_space<smem>>
    %1165 = vector.broadcast %1164 : f32 to vector<1x256xf32>
    %1166 = arith.mulf %1165, %1163 : vector<1x256xf32>
    %1167 = arith.addf %1146, %1166 : vector<1x256xf32>
    %c69 = arith.constant 69 : index
    %1168 = memref.load %arg1[%c69] : memref<180xf32, #tpu.memory_space<smem>>
    %1169 = vector.broadcast %1168 : f32 to vector<1x256xf32>
    %1170 = arith.mulf %1169, %1163 : vector<1x256xf32>
    %1171 = arith.addf %1150, %1170 : vector<1x256xf32>
    %c105 = arith.constant 105 : index
    %1172 = memref.load %arg1[%c105] : memref<180xf32, #tpu.memory_space<smem>>
    %1173 = vector.broadcast %1172 : f32 to vector<1x256xf32>
    %1174 = arith.mulf %1173, %1163 : vector<1x256xf32>
    %1175 = arith.addf %1154, %1174 : vector<1x256xf32>
    %c141 = arith.constant 141 : index
    %1176 = memref.load %arg1[%c141] : memref<180xf32, #tpu.memory_space<smem>>
    %1177 = vector.broadcast %1176 : f32 to vector<1x256xf32>
    %1178 = arith.mulf %1177, %1163 : vector<1x256xf32>
    %1179 = arith.addf %1158, %1178 : vector<1x256xf32>
    %c177 = arith.constant 177 : index
    %1180 = memref.load %arg1[%c177] : memref<180xf32, #tpu.memory_space<smem>>
    %1181 = vector.broadcast %1180 : f32 to vector<1x256xf32>
    %1182 = arith.mulf %1181, %1163 : vector<1x256xf32>
    %1183 = arith.addf %1162, %1182 : vector<1x256xf32>
    %1184 = vector.extract_strided_slice %1099 {offsets = [4, 0], sizes = [1, 256], strides = [1, 1]} : vector<8x256xf32> to vector<1x256xf32>
    %c6_168 = arith.constant 6 : index
    %1185 = memref.load %arg1[%c6_168] : memref<180xf32, #tpu.memory_space<smem>>
    %1186 = vector.broadcast %1185 : f32 to vector<1x256xf32>
    %1187 = arith.mulf %1186, %1184 : vector<1x256xf32>
    %1188 = arith.addf %1078, %1187 : vector<1x256xf32>
    %c42_169 = arith.constant 42 : index
    %1189 = memref.load %arg1[%c42_169] : memref<180xf32, #tpu.memory_space<smem>>
    %1190 = vector.broadcast %1189 : f32 to vector<1x256xf32>
    %1191 = arith.mulf %1190, %1184 : vector<1x256xf32>
    %1192 = arith.addf %1082, %1191 : vector<1x256xf32>
    %c78_170 = arith.constant 78 : index
    %1193 = memref.load %arg1[%c78_170] : memref<180xf32, #tpu.memory_space<smem>>
    %1194 = vector.broadcast %1193 : f32 to vector<1x256xf32>
    %1195 = arith.mulf %1194, %1184 : vector<1x256xf32>
    %1196 = arith.addf %1086, %1195 : vector<1x256xf32>
    %c114_171 = arith.constant 114 : index
    %1197 = memref.load %arg1[%c114_171] : memref<180xf32, #tpu.memory_space<smem>>
    %1198 = vector.broadcast %1197 : f32 to vector<1x256xf32>
    %1199 = arith.mulf %1198, %1184 : vector<1x256xf32>
    %1200 = arith.addf %1090, %1199 : vector<1x256xf32>
    %c150_172 = arith.constant 150 : index
    %1201 = memref.load %arg1[%c150_172] : memref<180xf32, #tpu.memory_space<smem>>
    %1202 = vector.broadcast %1201 : f32 to vector<1x256xf32>
    %1203 = arith.mulf %1202, %1184 : vector<1x256xf32>
    %1204 = arith.addf %1094, %1203 : vector<1x256xf32>
    %1205 = vector.extract_strided_slice %1099 {offsets = [5, 0], sizes = [1, 256], strides = [1, 1]} : vector<8x256xf32> to vector<1x256xf32>
    %c15_173 = arith.constant 15 : index
    %1206 = memref.load %arg1[%c15_173] : memref<180xf32, #tpu.memory_space<smem>>
    %1207 = vector.broadcast %1206 : f32 to vector<1x256xf32>
    %1208 = arith.mulf %1207, %1205 : vector<1x256xf32>
    %1209 = arith.addf %1188, %1208 : vector<1x256xf32>
    %c51_174 = arith.constant 51 : index
    %1210 = memref.load %arg1[%c51_174] : memref<180xf32, #tpu.memory_space<smem>>
    %1211 = vector.broadcast %1210 : f32 to vector<1x256xf32>
    %1212 = arith.mulf %1211, %1205 : vector<1x256xf32>
    %1213 = arith.addf %1192, %1212 : vector<1x256xf32>
    %c87_175 = arith.constant 87 : index
    %1214 = memref.load %arg1[%c87_175] : memref<180xf32, #tpu.memory_space<smem>>
    %1215 = vector.broadcast %1214 : f32 to vector<1x256xf32>
    %1216 = arith.mulf %1215, %1205 : vector<1x256xf32>
    %1217 = arith.addf %1196, %1216 : vector<1x256xf32>
    %c123_176 = arith.constant 123 : index
    %1218 = memref.load %arg1[%c123_176] : memref<180xf32, #tpu.memory_space<smem>>
    %1219 = vector.broadcast %1218 : f32 to vector<1x256xf32>
    %1220 = arith.mulf %1219, %1205 : vector<1x256xf32>
    %1221 = arith.addf %1200, %1220 : vector<1x256xf32>
    %c159_177 = arith.constant 159 : index
    %1222 = memref.load %arg1[%c159_177] : memref<180xf32, #tpu.memory_space<smem>>
    %1223 = vector.broadcast %1222 : f32 to vector<1x256xf32>
    %1224 = arith.mulf %1223, %1205 : vector<1x256xf32>
    %1225 = arith.addf %1204, %1224 : vector<1x256xf32>
    %1226 = vector.extract_strided_slice %1099 {offsets = [6, 0], sizes = [1, 256], strides = [1, 1]} : vector<8x256xf32> to vector<1x256xf32>
    %c24_178 = arith.constant 24 : index
    %1227 = memref.load %arg1[%c24_178] : memref<180xf32, #tpu.memory_space<smem>>
    %1228 = vector.broadcast %1227 : f32 to vector<1x256xf32>
    %1229 = arith.mulf %1228, %1226 : vector<1x256xf32>
    %1230 = arith.addf %1209, %1229 : vector<1x256xf32>
    %c60_179 = arith.constant 60 : index
    %1231 = memref.load %arg1[%c60_179] : memref<180xf32, #tpu.memory_space<smem>>
    %1232 = vector.broadcast %1231 : f32 to vector<1x256xf32>
    %1233 = arith.mulf %1232, %1226 : vector<1x256xf32>
    %1234 = arith.addf %1213, %1233 : vector<1x256xf32>
    %c96_180 = arith.constant 96 : index
    %1235 = memref.load %arg1[%c96_180] : memref<180xf32, #tpu.memory_space<smem>>
    %1236 = vector.broadcast %1235 : f32 to vector<1x256xf32>
    %1237 = arith.mulf %1236, %1226 : vector<1x256xf32>
    %1238 = arith.addf %1217, %1237 : vector<1x256xf32>
    %c132_181 = arith.constant 132 : index
    %1239 = memref.load %arg1[%c132_181] : memref<180xf32, #tpu.memory_space<smem>>
    %1240 = vector.broadcast %1239 : f32 to vector<1x256xf32>
    %1241 = arith.mulf %1240, %1226 : vector<1x256xf32>
    %1242 = arith.addf %1221, %1241 : vector<1x256xf32>
    %c168_182 = arith.constant 168 : index
    %1243 = memref.load %arg1[%c168_182] : memref<180xf32, #tpu.memory_space<smem>>
    %1244 = vector.broadcast %1243 : f32 to vector<1x256xf32>
    %1245 = arith.mulf %1244, %1226 : vector<1x256xf32>
    %1246 = arith.addf %1225, %1245 : vector<1x256xf32>
    %1247 = vector.extract_strided_slice %1099 {offsets = [7, 0], sizes = [1, 256], strides = [1, 1]} : vector<8x256xf32> to vector<1x256xf32>
    %c33_183 = arith.constant 33 : index
    %1248 = memref.load %arg1[%c33_183] : memref<180xf32, #tpu.memory_space<smem>>
    %1249 = vector.broadcast %1248 : f32 to vector<1x256xf32>
    %1250 = arith.mulf %1249, %1247 : vector<1x256xf32>
    %1251 = arith.addf %1230, %1250 : vector<1x256xf32>
    %c69_184 = arith.constant 69 : index
    %1252 = memref.load %arg1[%c69_184] : memref<180xf32, #tpu.memory_space<smem>>
    %1253 = vector.broadcast %1252 : f32 to vector<1x256xf32>
    %1254 = arith.mulf %1253, %1247 : vector<1x256xf32>
    %1255 = arith.addf %1234, %1254 : vector<1x256xf32>
    %c105_185 = arith.constant 105 : index
    %1256 = memref.load %arg1[%c105_185] : memref<180xf32, #tpu.memory_space<smem>>
    %1257 = vector.broadcast %1256 : f32 to vector<1x256xf32>
    %1258 = arith.mulf %1257, %1247 : vector<1x256xf32>
    %1259 = arith.addf %1238, %1258 : vector<1x256xf32>
    %c141_186 = arith.constant 141 : index
    %1260 = memref.load %arg1[%c141_186] : memref<180xf32, #tpu.memory_space<smem>>
    %1261 = vector.broadcast %1260 : f32 to vector<1x256xf32>
    %1262 = arith.mulf %1261, %1247 : vector<1x256xf32>
    %1263 = arith.addf %1242, %1262 : vector<1x256xf32>
    %c177_187 = arith.constant 177 : index
    %1264 = memref.load %arg1[%c177_187] : memref<180xf32, #tpu.memory_space<smem>>
    %1265 = vector.broadcast %1264 : f32 to vector<1x256xf32>
    %1266 = arith.mulf %1265, %1247 : vector<1x256xf32>
    %1267 = arith.addf %1246, %1266 : vector<1x256xf32>
    %c0_188 = arith.constant 0 : index
    %c144_189 = arith.constant 144 : index
    %1268 = vector.load %arg4[%c0_188, %c144_189] : memref<8x512xf32, #tpu.memory_space<vmem>>, vector<8x256xf32>
    %1269 = vector.extract_strided_slice %1268 {offsets = [0, 0], sizes = [1, 256], strides = [1, 1]} : vector<8x256xf32> to vector<1x256xf32>
    %c7 = arith.constant 7 : index
    %1270 = memref.load %arg1[%c7] : memref<180xf32, #tpu.memory_space<smem>>
    %1271 = vector.broadcast %1270 : f32 to vector<1x256xf32>
    %1272 = arith.mulf %1271, %1269 : vector<1x256xf32>
    %1273 = arith.addf %1167, %1272 : vector<1x256xf32>
    %c43 = arith.constant 43 : index
    %1274 = memref.load %arg1[%c43] : memref<180xf32, #tpu.memory_space<smem>>
    %1275 = vector.broadcast %1274 : f32 to vector<1x256xf32>
    %1276 = arith.mulf %1275, %1269 : vector<1x256xf32>
    %1277 = arith.addf %1171, %1276 : vector<1x256xf32>
    %c79 = arith.constant 79 : index
    %1278 = memref.load %arg1[%c79] : memref<180xf32, #tpu.memory_space<smem>>
    %1279 = vector.broadcast %1278 : f32 to vector<1x256xf32>
    %1280 = arith.mulf %1279, %1269 : vector<1x256xf32>
    %1281 = arith.addf %1175, %1280 : vector<1x256xf32>
    %c115 = arith.constant 115 : index
    %1282 = memref.load %arg1[%c115] : memref<180xf32, #tpu.memory_space<smem>>
    %1283 = vector.broadcast %1282 : f32 to vector<1x256xf32>
    %1284 = arith.mulf %1283, %1269 : vector<1x256xf32>
    %1285 = arith.addf %1179, %1284 : vector<1x256xf32>
    %c151 = arith.constant 151 : index
    %1286 = memref.load %arg1[%c151] : memref<180xf32, #tpu.memory_space<smem>>
    %1287 = vector.broadcast %1286 : f32 to vector<1x256xf32>
    %1288 = arith.mulf %1287, %1269 : vector<1x256xf32>
    %1289 = arith.addf %1183, %1288 : vector<1x256xf32>
    %1290 = vector.extract_strided_slice %1268 {offsets = [1, 0], sizes = [1, 256], strides = [1, 1]} : vector<8x256xf32> to vector<1x256xf32>
    %c16 = arith.constant 16 : index
    %1291 = memref.load %arg1[%c16] : memref<180xf32, #tpu.memory_space<smem>>
    %1292 = vector.broadcast %1291 : f32 to vector<1x256xf32>
    %1293 = arith.mulf %1292, %1290 : vector<1x256xf32>
    %1294 = arith.addf %1273, %1293 : vector<1x256xf32>
    %c52 = arith.constant 52 : index
    %1295 = memref.load %arg1[%c52] : memref<180xf32, #tpu.memory_space<smem>>
    %1296 = vector.broadcast %1295 : f32 to vector<1x256xf32>
    %1297 = arith.mulf %1296, %1290 : vector<1x256xf32>
    %1298 = arith.addf %1277, %1297 : vector<1x256xf32>
    %c88 = arith.constant 88 : index
    %1299 = memref.load %arg1[%c88] : memref<180xf32, #tpu.memory_space<smem>>
    %1300 = vector.broadcast %1299 : f32 to vector<1x256xf32>
    %1301 = arith.mulf %1300, %1290 : vector<1x256xf32>
    %1302 = arith.addf %1281, %1301 : vector<1x256xf32>
    %c124 = arith.constant 124 : index
    %1303 = memref.load %arg1[%c124] : memref<180xf32, #tpu.memory_space<smem>>
    %1304 = vector.broadcast %1303 : f32 to vector<1x256xf32>
    %1305 = arith.mulf %1304, %1290 : vector<1x256xf32>
    %1306 = arith.addf %1285, %1305 : vector<1x256xf32>
    %c160 = arith.constant 160 : index
    %1307 = memref.load %arg1[%c160] : memref<180xf32, #tpu.memory_space<smem>>
    %1308 = vector.broadcast %1307 : f32 to vector<1x256xf32>
    %1309 = arith.mulf %1308, %1290 : vector<1x256xf32>
    %1310 = arith.addf %1289, %1309 : vector<1x256xf32>
    %1311 = vector.extract_strided_slice %1268 {offsets = [2, 0], sizes = [1, 256], strides = [1, 1]} : vector<8x256xf32> to vector<1x256xf32>
    %c25 = arith.constant 25 : index
    %1312 = memref.load %arg1[%c25] : memref<180xf32, #tpu.memory_space<smem>>
    %1313 = vector.broadcast %1312 : f32 to vector<1x256xf32>
    %1314 = arith.mulf %1313, %1311 : vector<1x256xf32>
    %1315 = arith.addf %1294, %1314 : vector<1x256xf32>
    %c61 = arith.constant 61 : index
    %1316 = memref.load %arg1[%c61] : memref<180xf32, #tpu.memory_space<smem>>
    %1317 = vector.broadcast %1316 : f32 to vector<1x256xf32>
    %1318 = arith.mulf %1317, %1311 : vector<1x256xf32>
    %1319 = arith.addf %1298, %1318 : vector<1x256xf32>
    %c97 = arith.constant 97 : index
    %1320 = memref.load %arg1[%c97] : memref<180xf32, #tpu.memory_space<smem>>
    %1321 = vector.broadcast %1320 : f32 to vector<1x256xf32>
    %1322 = arith.mulf %1321, %1311 : vector<1x256xf32>
    %1323 = arith.addf %1302, %1322 : vector<1x256xf32>
    %c133 = arith.constant 133 : index
    %1324 = memref.load %arg1[%c133] : memref<180xf32, #tpu.memory_space<smem>>
    %1325 = vector.broadcast %1324 : f32 to vector<1x256xf32>
    %1326 = arith.mulf %1325, %1311 : vector<1x256xf32>
    %1327 = arith.addf %1306, %1326 : vector<1x256xf32>
    %c169 = arith.constant 169 : index
    %1328 = memref.load %arg1[%c169] : memref<180xf32, #tpu.memory_space<smem>>
    %1329 = vector.broadcast %1328 : f32 to vector<1x256xf32>
    %1330 = arith.mulf %1329, %1311 : vector<1x256xf32>
    %1331 = arith.addf %1310, %1330 : vector<1x256xf32>
    %1332 = vector.extract_strided_slice %1268 {offsets = [3, 0], sizes = [1, 256], strides = [1, 1]} : vector<8x256xf32> to vector<1x256xf32>
    %c34 = arith.constant 34 : index
    %1333 = memref.load %arg1[%c34] : memref<180xf32, #tpu.memory_space<smem>>
    %1334 = vector.broadcast %1333 : f32 to vector<1x256xf32>
    %1335 = arith.mulf %1334, %1332 : vector<1x256xf32>
    %1336 = arith.addf %1315, %1335 : vector<1x256xf32>
    %c70 = arith.constant 70 : index
    %1337 = memref.load %arg1[%c70] : memref<180xf32, #tpu.memory_space<smem>>
    %1338 = vector.broadcast %1337 : f32 to vector<1x256xf32>
    %1339 = arith.mulf %1338, %1332 : vector<1x256xf32>
    %1340 = arith.addf %1319, %1339 : vector<1x256xf32>
    %c106 = arith.constant 106 : index
    %1341 = memref.load %arg1[%c106] : memref<180xf32, #tpu.memory_space<smem>>
    %1342 = vector.broadcast %1341 : f32 to vector<1x256xf32>
    %1343 = arith.mulf %1342, %1332 : vector<1x256xf32>
    %1344 = arith.addf %1323, %1343 : vector<1x256xf32>
    %c142 = arith.constant 142 : index
    %1345 = memref.load %arg1[%c142] : memref<180xf32, #tpu.memory_space<smem>>
    %1346 = vector.broadcast %1345 : f32 to vector<1x256xf32>
    %1347 = arith.mulf %1346, %1332 : vector<1x256xf32>
    %1348 = arith.addf %1327, %1347 : vector<1x256xf32>
    %c178 = arith.constant 178 : index
    %1349 = memref.load %arg1[%c178] : memref<180xf32, #tpu.memory_space<smem>>
    %1350 = vector.broadcast %1349 : f32 to vector<1x256xf32>
    %1351 = arith.mulf %1350, %1332 : vector<1x256xf32>
    %1352 = arith.addf %1331, %1351 : vector<1x256xf32>
    %1353 = vector.extract_strided_slice %1268 {offsets = [4, 0], sizes = [1, 256], strides = [1, 1]} : vector<8x256xf32> to vector<1x256xf32>
    %c7_190 = arith.constant 7 : index
    %1354 = memref.load %arg1[%c7_190] : memref<180xf32, #tpu.memory_space<smem>>
    %1355 = vector.broadcast %1354 : f32 to vector<1x256xf32>
    %1356 = arith.mulf %1355, %1353 : vector<1x256xf32>
    %1357 = arith.addf %1251, %1356 : vector<1x256xf32>
    %c43_191 = arith.constant 43 : index
    %1358 = memref.load %arg1[%c43_191] : memref<180xf32, #tpu.memory_space<smem>>
    %1359 = vector.broadcast %1358 : f32 to vector<1x256xf32>
    %1360 = arith.mulf %1359, %1353 : vector<1x256xf32>
    %1361 = arith.addf %1255, %1360 : vector<1x256xf32>
    %c79_192 = arith.constant 79 : index
    %1362 = memref.load %arg1[%c79_192] : memref<180xf32, #tpu.memory_space<smem>>
    %1363 = vector.broadcast %1362 : f32 to vector<1x256xf32>
    %1364 = arith.mulf %1363, %1353 : vector<1x256xf32>
    %1365 = arith.addf %1259, %1364 : vector<1x256xf32>
    %c115_193 = arith.constant 115 : index
    %1366 = memref.load %arg1[%c115_193] : memref<180xf32, #tpu.memory_space<smem>>
    %1367 = vector.broadcast %1366 : f32 to vector<1x256xf32>
    %1368 = arith.mulf %1367, %1353 : vector<1x256xf32>
    %1369 = arith.addf %1263, %1368 : vector<1x256xf32>
    %c151_194 = arith.constant 151 : index
    %1370 = memref.load %arg1[%c151_194] : memref<180xf32, #tpu.memory_space<smem>>
    %1371 = vector.broadcast %1370 : f32 to vector<1x256xf32>
    %1372 = arith.mulf %1371, %1353 : vector<1x256xf32>
    %1373 = arith.addf %1267, %1372 : vector<1x256xf32>
    %1374 = vector.extract_strided_slice %1268 {offsets = [5, 0], sizes = [1, 256], strides = [1, 1]} : vector<8x256xf32> to vector<1x256xf32>
    %c16_195 = arith.constant 16 : index
    %1375 = memref.load %arg1[%c16_195] : memref<180xf32, #tpu.memory_space<smem>>
    %1376 = vector.broadcast %1375 : f32 to vector<1x256xf32>
    %1377 = arith.mulf %1376, %1374 : vector<1x256xf32>
    %1378 = arith.addf %1357, %1377 : vector<1x256xf32>
    %c52_196 = arith.constant 52 : index
    %1379 = memref.load %arg1[%c52_196] : memref<180xf32, #tpu.memory_space<smem>>
    %1380 = vector.broadcast %1379 : f32 to vector<1x256xf32>
    %1381 = arith.mulf %1380, %1374 : vector<1x256xf32>
    %1382 = arith.addf %1361, %1381 : vector<1x256xf32>
    %c88_197 = arith.constant 88 : index
    %1383 = memref.load %arg1[%c88_197] : memref<180xf32, #tpu.memory_space<smem>>
    %1384 = vector.broadcast %1383 : f32 to vector<1x256xf32>
    %1385 = arith.mulf %1384, %1374 : vector<1x256xf32>
    %1386 = arith.addf %1365, %1385 : vector<1x256xf32>
    %c124_198 = arith.constant 124 : index
    %1387 = memref.load %arg1[%c124_198] : memref<180xf32, #tpu.memory_space<smem>>
    %1388 = vector.broadcast %1387 : f32 to vector<1x256xf32>
    %1389 = arith.mulf %1388, %1374 : vector<1x256xf32>
    %1390 = arith.addf %1369, %1389 : vector<1x256xf32>
    %c160_199 = arith.constant 160 : index
    %1391 = memref.load %arg1[%c160_199] : memref<180xf32, #tpu.memory_space<smem>>
    %1392 = vector.broadcast %1391 : f32 to vector<1x256xf32>
    %1393 = arith.mulf %1392, %1374 : vector<1x256xf32>
    %1394 = arith.addf %1373, %1393 : vector<1x256xf32>
    %1395 = vector.extract_strided_slice %1268 {offsets = [6, 0], sizes = [1, 256], strides = [1, 1]} : vector<8x256xf32> to vector<1x256xf32>
    %c25_200 = arith.constant 25 : index
    %1396 = memref.load %arg1[%c25_200] : memref<180xf32, #tpu.memory_space<smem>>
    %1397 = vector.broadcast %1396 : f32 to vector<1x256xf32>
    %1398 = arith.mulf %1397, %1395 : vector<1x256xf32>
    %1399 = arith.addf %1378, %1398 : vector<1x256xf32>
    %c61_201 = arith.constant 61 : index
    %1400 = memref.load %arg1[%c61_201] : memref<180xf32, #tpu.memory_space<smem>>
    %1401 = vector.broadcast %1400 : f32 to vector<1x256xf32>
    %1402 = arith.mulf %1401, %1395 : vector<1x256xf32>
    %1403 = arith.addf %1382, %1402 : vector<1x256xf32>
    %c97_202 = arith.constant 97 : index
    %1404 = memref.load %arg1[%c97_202] : memref<180xf32, #tpu.memory_space<smem>>
    %1405 = vector.broadcast %1404 : f32 to vector<1x256xf32>
    %1406 = arith.mulf %1405, %1395 : vector<1x256xf32>
    %1407 = arith.addf %1386, %1406 : vector<1x256xf32>
    %c133_203 = arith.constant 133 : index
    %1408 = memref.load %arg1[%c133_203] : memref<180xf32, #tpu.memory_space<smem>>
    %1409 = vector.broadcast %1408 : f32 to vector<1x256xf32>
    %1410 = arith.mulf %1409, %1395 : vector<1x256xf32>
    %1411 = arith.addf %1390, %1410 : vector<1x256xf32>
    %c169_204 = arith.constant 169 : index
    %1412 = memref.load %arg1[%c169_204] : memref<180xf32, #tpu.memory_space<smem>>
    %1413 = vector.broadcast %1412 : f32 to vector<1x256xf32>
    %1414 = arith.mulf %1413, %1395 : vector<1x256xf32>
    %1415 = arith.addf %1394, %1414 : vector<1x256xf32>
    %1416 = vector.extract_strided_slice %1268 {offsets = [7, 0], sizes = [1, 256], strides = [1, 1]} : vector<8x256xf32> to vector<1x256xf32>
    %c34_205 = arith.constant 34 : index
    %1417 = memref.load %arg1[%c34_205] : memref<180xf32, #tpu.memory_space<smem>>
    %1418 = vector.broadcast %1417 : f32 to vector<1x256xf32>
    %1419 = arith.mulf %1418, %1416 : vector<1x256xf32>
    %1420 = arith.addf %1399, %1419 : vector<1x256xf32>
    %c70_206 = arith.constant 70 : index
    %1421 = memref.load %arg1[%c70_206] : memref<180xf32, #tpu.memory_space<smem>>
    %1422 = vector.broadcast %1421 : f32 to vector<1x256xf32>
    %1423 = arith.mulf %1422, %1416 : vector<1x256xf32>
    %1424 = arith.addf %1403, %1423 : vector<1x256xf32>
    %c106_207 = arith.constant 106 : index
    %1425 = memref.load %arg1[%c106_207] : memref<180xf32, #tpu.memory_space<smem>>
    %1426 = vector.broadcast %1425 : f32 to vector<1x256xf32>
    %1427 = arith.mulf %1426, %1416 : vector<1x256xf32>
    %1428 = arith.addf %1407, %1427 : vector<1x256xf32>
    %c142_208 = arith.constant 142 : index
    %1429 = memref.load %arg1[%c142_208] : memref<180xf32, #tpu.memory_space<smem>>
    %1430 = vector.broadcast %1429 : f32 to vector<1x256xf32>
    %1431 = arith.mulf %1430, %1416 : vector<1x256xf32>
    %1432 = arith.addf %1411, %1431 : vector<1x256xf32>
    %c178_209 = arith.constant 178 : index
    %1433 = memref.load %arg1[%c178_209] : memref<180xf32, #tpu.memory_space<smem>>
    %1434 = vector.broadcast %1433 : f32 to vector<1x256xf32>
    %1435 = arith.mulf %1434, %1416 : vector<1x256xf32>
    %1436 = arith.addf %1415, %1435 : vector<1x256xf32>
    %c0_210 = arith.constant 0 : index
    %c145_211 = arith.constant 145 : index
    %1437 = vector.load %arg4[%c0_210, %c145_211] : memref<8x512xf32, #tpu.memory_space<vmem>>, vector<8x256xf32>
    %cst_212 = arith.constant 0.000000e+00 : f32
    %1438 = vector.shape_cast %24 : vector<1x256xi1> to vector<1x256xi1>
    %1439 = vector.broadcast %1438 : vector<1x256xi1> to vector<8x256xi1>
    %1440 = vector.broadcast %cst_212 : f32 to vector<8x256xf32>
    %1441 = arith.select %1439, %1437, %1440 : vector<8x256xi1>, vector<8x256xf32>
    %1442 = vector.extract_strided_slice %1441 {offsets = [0, 0], sizes = [1, 256], strides = [1, 1]} : vector<8x256xf32> to vector<1x256xf32>
    %c8 = arith.constant 8 : index
    %1443 = memref.load %arg1[%c8] : memref<180xf32, #tpu.memory_space<smem>>
    %1444 = vector.broadcast %1443 : f32 to vector<1x256xf32>
    %1445 = arith.mulf %1444, %1442 : vector<1x256xf32>
    %1446 = arith.addf %1336, %1445 : vector<1x256xf32>
    %c44 = arith.constant 44 : index
    %1447 = memref.load %arg1[%c44] : memref<180xf32, #tpu.memory_space<smem>>
    %1448 = vector.broadcast %1447 : f32 to vector<1x256xf32>
    %1449 = arith.mulf %1448, %1442 : vector<1x256xf32>
    %1450 = arith.addf %1340, %1449 : vector<1x256xf32>
    %c80 = arith.constant 80 : index
    %1451 = memref.load %arg1[%c80] : memref<180xf32, #tpu.memory_space<smem>>
    %1452 = vector.broadcast %1451 : f32 to vector<1x256xf32>
    %1453 = arith.mulf %1452, %1442 : vector<1x256xf32>
    %1454 = arith.addf %1344, %1453 : vector<1x256xf32>
    %c116 = arith.constant 116 : index
    %1455 = memref.load %arg1[%c116] : memref<180xf32, #tpu.memory_space<smem>>
    %1456 = vector.broadcast %1455 : f32 to vector<1x256xf32>
    %1457 = arith.mulf %1456, %1442 : vector<1x256xf32>
    %1458 = arith.addf %1348, %1457 : vector<1x256xf32>
    %c152 = arith.constant 152 : index
    %1459 = memref.load %arg1[%c152] : memref<180xf32, #tpu.memory_space<smem>>
    %1460 = vector.broadcast %1459 : f32 to vector<1x256xf32>
    %1461 = arith.mulf %1460, %1442 : vector<1x256xf32>
    %1462 = arith.addf %1352, %1461 : vector<1x256xf32>
    %1463 = vector.extract_strided_slice %1441 {offsets = [1, 0], sizes = [1, 256], strides = [1, 1]} : vector<8x256xf32> to vector<1x256xf32>
    %c17 = arith.constant 17 : index
    %1464 = memref.load %arg1[%c17] : memref<180xf32, #tpu.memory_space<smem>>
    %1465 = vector.broadcast %1464 : f32 to vector<1x256xf32>
    %1466 = arith.mulf %1465, %1463 : vector<1x256xf32>
    %1467 = arith.addf %1446, %1466 : vector<1x256xf32>
    %c53 = arith.constant 53 : index
    %1468 = memref.load %arg1[%c53] : memref<180xf32, #tpu.memory_space<smem>>
    %1469 = vector.broadcast %1468 : f32 to vector<1x256xf32>
    %1470 = arith.mulf %1469, %1463 : vector<1x256xf32>
    %1471 = arith.addf %1450, %1470 : vector<1x256xf32>
    %c89 = arith.constant 89 : index
    %1472 = memref.load %arg1[%c89] : memref<180xf32, #tpu.memory_space<smem>>
    %1473 = vector.broadcast %1472 : f32 to vector<1x256xf32>
    %1474 = arith.mulf %1473, %1463 : vector<1x256xf32>
    %1475 = arith.addf %1454, %1474 : vector<1x256xf32>
    %c125 = arith.constant 125 : index
    %1476 = memref.load %arg1[%c125] : memref<180xf32, #tpu.memory_space<smem>>
    %1477 = vector.broadcast %1476 : f32 to vector<1x256xf32>
    %1478 = arith.mulf %1477, %1463 : vector<1x256xf32>
    %1479 = arith.addf %1458, %1478 : vector<1x256xf32>
    %c161 = arith.constant 161 : index
    %1480 = memref.load %arg1[%c161] : memref<180xf32, #tpu.memory_space<smem>>
    %1481 = vector.broadcast %1480 : f32 to vector<1x256xf32>
    %1482 = arith.mulf %1481, %1463 : vector<1x256xf32>
    %1483 = arith.addf %1462, %1482 : vector<1x256xf32>
    %1484 = vector.extract_strided_slice %1441 {offsets = [2, 0], sizes = [1, 256], strides = [1, 1]} : vector<8x256xf32> to vector<1x256xf32>
    %c26 = arith.constant 26 : index
    %1485 = memref.load %arg1[%c26] : memref<180xf32, #tpu.memory_space<smem>>
    %1486 = vector.broadcast %1485 : f32 to vector<1x256xf32>
    %1487 = arith.mulf %1486, %1484 : vector<1x256xf32>
    %1488 = arith.addf %1467, %1487 : vector<1x256xf32>
    %c62 = arith.constant 62 : index
    %1489 = memref.load %arg1[%c62] : memref<180xf32, #tpu.memory_space<smem>>
    %1490 = vector.broadcast %1489 : f32 to vector<1x256xf32>
    %1491 = arith.mulf %1490, %1484 : vector<1x256xf32>
    %1492 = arith.addf %1471, %1491 : vector<1x256xf32>
    %c98 = arith.constant 98 : index
    %1493 = memref.load %arg1[%c98] : memref<180xf32, #tpu.memory_space<smem>>
    %1494 = vector.broadcast %1493 : f32 to vector<1x256xf32>
    %1495 = arith.mulf %1494, %1484 : vector<1x256xf32>
    %1496 = arith.addf %1475, %1495 : vector<1x256xf32>
    %c134 = arith.constant 134 : index
    %1497 = memref.load %arg1[%c134] : memref<180xf32, #tpu.memory_space<smem>>
    %1498 = vector.broadcast %1497 : f32 to vector<1x256xf32>
    %1499 = arith.mulf %1498, %1484 : vector<1x256xf32>
    %1500 = arith.addf %1479, %1499 : vector<1x256xf32>
    %c170 = arith.constant 170 : index
    %1501 = memref.load %arg1[%c170] : memref<180xf32, #tpu.memory_space<smem>>
    %1502 = vector.broadcast %1501 : f32 to vector<1x256xf32>
    %1503 = arith.mulf %1502, %1484 : vector<1x256xf32>
    %1504 = arith.addf %1483, %1503 : vector<1x256xf32>
    %1505 = vector.extract_strided_slice %1441 {offsets = [3, 0], sizes = [1, 256], strides = [1, 1]} : vector<8x256xf32> to vector<1x256xf32>
    %c35 = arith.constant 35 : index
    %1506 = memref.load %arg1[%c35] : memref<180xf32, #tpu.memory_space<smem>>
    %1507 = vector.broadcast %1506 : f32 to vector<1x256xf32>
    %1508 = arith.mulf %1507, %1505 : vector<1x256xf32>
    %1509 = arith.addf %1488, %1508 : vector<1x256xf32>
    %c71 = arith.constant 71 : index
    %1510 = memref.load %arg1[%c71] : memref<180xf32, #tpu.memory_space<smem>>
    %1511 = vector.broadcast %1510 : f32 to vector<1x256xf32>
    %1512 = arith.mulf %1511, %1505 : vector<1x256xf32>
    %1513 = arith.addf %1492, %1512 : vector<1x256xf32>
    %c107 = arith.constant 107 : index
    %1514 = memref.load %arg1[%c107] : memref<180xf32, #tpu.memory_space<smem>>
    %1515 = vector.broadcast %1514 : f32 to vector<1x256xf32>
    %1516 = arith.mulf %1515, %1505 : vector<1x256xf32>
    %1517 = arith.addf %1496, %1516 : vector<1x256xf32>
    %c143_213 = arith.constant 143 : index
    %1518 = memref.load %arg1[%c143_213] : memref<180xf32, #tpu.memory_space<smem>>
    %1519 = vector.broadcast %1518 : f32 to vector<1x256xf32>
    %1520 = arith.mulf %1519, %1505 : vector<1x256xf32>
    %1521 = arith.addf %1500, %1520 : vector<1x256xf32>
    %c179 = arith.constant 179 : index
    %1522 = memref.load %arg1[%c179] : memref<180xf32, #tpu.memory_space<smem>>
    %1523 = vector.broadcast %1522 : f32 to vector<1x256xf32>
    %1524 = arith.mulf %1523, %1505 : vector<1x256xf32>
    %1525 = arith.addf %1504, %1524 : vector<1x256xf32>
    %1526 = vector.extract_strided_slice %1441 {offsets = [4, 0], sizes = [1, 256], strides = [1, 1]} : vector<8x256xf32> to vector<1x256xf32>
    %c8_214 = arith.constant 8 : index
    %1527 = memref.load %arg1[%c8_214] : memref<180xf32, #tpu.memory_space<smem>>
    %1528 = vector.broadcast %1527 : f32 to vector<1x256xf32>
    %1529 = arith.mulf %1528, %1526 : vector<1x256xf32>
    %1530 = arith.addf %1420, %1529 : vector<1x256xf32>
    %c44_215 = arith.constant 44 : index
    %1531 = memref.load %arg1[%c44_215] : memref<180xf32, #tpu.memory_space<smem>>
    %1532 = vector.broadcast %1531 : f32 to vector<1x256xf32>
    %1533 = arith.mulf %1532, %1526 : vector<1x256xf32>
    %1534 = arith.addf %1424, %1533 : vector<1x256xf32>
    %c80_216 = arith.constant 80 : index
    %1535 = memref.load %arg1[%c80_216] : memref<180xf32, #tpu.memory_space<smem>>
    %1536 = vector.broadcast %1535 : f32 to vector<1x256xf32>
    %1537 = arith.mulf %1536, %1526 : vector<1x256xf32>
    %1538 = arith.addf %1428, %1537 : vector<1x256xf32>
    %c116_217 = arith.constant 116 : index
    %1539 = memref.load %arg1[%c116_217] : memref<180xf32, #tpu.memory_space<smem>>
    %1540 = vector.broadcast %1539 : f32 to vector<1x256xf32>
    %1541 = arith.mulf %1540, %1526 : vector<1x256xf32>
    %1542 = arith.addf %1432, %1541 : vector<1x256xf32>
    %c152_218 = arith.constant 152 : index
    %1543 = memref.load %arg1[%c152_218] : memref<180xf32, #tpu.memory_space<smem>>
    %1544 = vector.broadcast %1543 : f32 to vector<1x256xf32>
    %1545 = arith.mulf %1544, %1526 : vector<1x256xf32>
    %1546 = arith.addf %1436, %1545 : vector<1x256xf32>
    %1547 = vector.extract_strided_slice %1441 {offsets = [5, 0], sizes = [1, 256], strides = [1, 1]} : vector<8x256xf32> to vector<1x256xf32>
    %c17_219 = arith.constant 17 : index
    %1548 = memref.load %arg1[%c17_219] : memref<180xf32, #tpu.memory_space<smem>>
    %1549 = vector.broadcast %1548 : f32 to vector<1x256xf32>
    %1550 = arith.mulf %1549, %1547 : vector<1x256xf32>
    %1551 = arith.addf %1530, %1550 : vector<1x256xf32>
    %c53_220 = arith.constant 53 : index
    %1552 = memref.load %arg1[%c53_220] : memref<180xf32, #tpu.memory_space<smem>>
    %1553 = vector.broadcast %1552 : f32 to vector<1x256xf32>
    %1554 = arith.mulf %1553, %1547 : vector<1x256xf32>
    %1555 = arith.addf %1534, %1554 : vector<1x256xf32>
    %c89_221 = arith.constant 89 : index
    %1556 = memref.load %arg1[%c89_221] : memref<180xf32, #tpu.memory_space<smem>>
    %1557 = vector.broadcast %1556 : f32 to vector<1x256xf32>
    %1558 = arith.mulf %1557, %1547 : vector<1x256xf32>
    %1559 = arith.addf %1538, %1558 : vector<1x256xf32>
    %c125_222 = arith.constant 125 : index
    %1560 = memref.load %arg1[%c125_222] : memref<180xf32, #tpu.memory_space<smem>>
    %1561 = vector.broadcast %1560 : f32 to vector<1x256xf32>
    %1562 = arith.mulf %1561, %1547 : vector<1x256xf32>
    %1563 = arith.addf %1542, %1562 : vector<1x256xf32>
    %c161_223 = arith.constant 161 : index
    %1564 = memref.load %arg1[%c161_223] : memref<180xf32, #tpu.memory_space<smem>>
    %1565 = vector.broadcast %1564 : f32 to vector<1x256xf32>
    %1566 = arith.mulf %1565, %1547 : vector<1x256xf32>
    %1567 = arith.addf %1546, %1566 : vector<1x256xf32>
    %1568 = vector.extract_strided_slice %1441 {offsets = [6, 0], sizes = [1, 256], strides = [1, 1]} : vector<8x256xf32> to vector<1x256xf32>
    %c26_224 = arith.constant 26 : index
    %1569 = memref.load %arg1[%c26_224] : memref<180xf32, #tpu.memory_space<smem>>
    %1570 = vector.broadcast %1569 : f32 to vector<1x256xf32>
    %1571 = arith.mulf %1570, %1568 : vector<1x256xf32>
    %1572 = arith.addf %1551, %1571 : vector<1x256xf32>
    %c62_225 = arith.constant 62 : index
    %1573 = memref.load %arg1[%c62_225] : memref<180xf32, #tpu.memory_space<smem>>
    %1574 = vector.broadcast %1573 : f32 to vector<1x256xf32>
    %1575 = arith.mulf %1574, %1568 : vector<1x256xf32>
    %1576 = arith.addf %1555, %1575 : vector<1x256xf32>
    %c98_226 = arith.constant 98 : index
    %1577 = memref.load %arg1[%c98_226] : memref<180xf32, #tpu.memory_space<smem>>
    %1578 = vector.broadcast %1577 : f32 to vector<1x256xf32>
    %1579 = arith.mulf %1578, %1568 : vector<1x256xf32>
    %1580 = arith.addf %1559, %1579 : vector<1x256xf32>
    %c134_227 = arith.constant 134 : index
    %1581 = memref.load %arg1[%c134_227] : memref<180xf32, #tpu.memory_space<smem>>
    %1582 = vector.broadcast %1581 : f32 to vector<1x256xf32>
    %1583 = arith.mulf %1582, %1568 : vector<1x256xf32>
    %1584 = arith.addf %1563, %1583 : vector<1x256xf32>
    %c170_228 = arith.constant 170 : index
    %1585 = memref.load %arg1[%c170_228] : memref<180xf32, #tpu.memory_space<smem>>
    %1586 = vector.broadcast %1585 : f32 to vector<1x256xf32>
    %1587 = arith.mulf %1586, %1568 : vector<1x256xf32>
    %1588 = arith.addf %1567, %1587 : vector<1x256xf32>
    %1589 = vector.extract_strided_slice %1441 {offsets = [7, 0], sizes = [1, 256], strides = [1, 1]} : vector<8x256xf32> to vector<1x256xf32>
    %c35_229 = arith.constant 35 : index
    %1590 = memref.load %arg1[%c35_229] : memref<180xf32, #tpu.memory_space<smem>>
    %1591 = vector.broadcast %1590 : f32 to vector<1x256xf32>
    %1592 = arith.mulf %1591, %1589 : vector<1x256xf32>
    %1593 = arith.addf %1572, %1592 : vector<1x256xf32>
    %c71_230 = arith.constant 71 : index
    %1594 = memref.load %arg1[%c71_230] : memref<180xf32, #tpu.memory_space<smem>>
    %1595 = vector.broadcast %1594 : f32 to vector<1x256xf32>
    %1596 = arith.mulf %1595, %1589 : vector<1x256xf32>
    %1597 = arith.addf %1576, %1596 : vector<1x256xf32>
    %c107_231 = arith.constant 107 : index
    %1598 = memref.load %arg1[%c107_231] : memref<180xf32, #tpu.memory_space<smem>>
    %1599 = vector.broadcast %1598 : f32 to vector<1x256xf32>
    %1600 = arith.mulf %1599, %1589 : vector<1x256xf32>
    %1601 = arith.addf %1580, %1600 : vector<1x256xf32>
    %c143_232 = arith.constant 143 : index
    %1602 = memref.load %arg1[%c143_232] : memref<180xf32, #tpu.memory_space<smem>>
    %1603 = vector.broadcast %1602 : f32 to vector<1x256xf32>
    %1604 = arith.mulf %1603, %1589 : vector<1x256xf32>
    %1605 = arith.addf %1584, %1604 : vector<1x256xf32>
    %c179_233 = arith.constant 179 : index
    %1606 = memref.load %arg1[%c179_233] : memref<180xf32, #tpu.memory_space<smem>>
    %1607 = vector.broadcast %1606 : f32 to vector<1x256xf32>
    %1608 = arith.mulf %1607, %1589 : vector<1x256xf32>
    %1609 = arith.addf %1588, %1608 : vector<1x256xf32>
    %c0_234 = arith.constant 0 : index
    %c0_235 = arith.constant 0 : index
    %1610 = vector.load %arg3[%c0_234, %c0_235] : memref<10x256xf32, #tpu.memory_space<vmem>>, vector<1x256xf32>
    tpu.vector_store %arg3[%c0_234, %c0_235], %1509 {strides = array<i32>} : memref<10x256xf32, #tpu.memory_space<vmem>>, vector<1x256xf32>,
    %c1_236 = arith.constant 1 : index
    %c0_237 = arith.constant 0 : index
    %1611 = vector.load %arg3[%c1_236, %c0_237] : memref<10x256xf32, #tpu.memory_space<vmem>>, vector<1x256xf32>
    tpu.vector_store %arg3[%c1_236, %c0_237], %1513 {strides = array<i32>} : memref<10x256xf32, #tpu.memory_space<vmem>>, vector<1x256xf32>,
    %c2_238 = arith.constant 2 : index
    %c0_239 = arith.constant 0 : index
    %1612 = vector.load %arg3[%c2_238, %c0_239] : memref<10x256xf32, #tpu.memory_space<vmem>>, vector<1x256xf32>
    tpu.vector_store %arg3[%c2_238, %c0_239], %1517 {strides = array<i32>} : memref<10x256xf32, #tpu.memory_space<vmem>>, vector<1x256xf32>,
    %c3_240 = arith.constant 3 : index
    %c0_241 = arith.constant 0 : index
    %1613 = vector.load %arg3[%c3_240, %c0_241] : memref<10x256xf32, #tpu.memory_space<vmem>>, vector<1x256xf32>
    tpu.vector_store %arg3[%c3_240, %c0_241], %1521 {strides = array<i32>} : memref<10x256xf32, #tpu.memory_space<vmem>>, vector<1x256xf32>,
    %c4_242 = arith.constant 4 : index
    %c0_243 = arith.constant 0 : index
    %1614 = vector.load %arg3[%c4_242, %c0_243] : memref<10x256xf32, #tpu.memory_space<vmem>>, vector<1x256xf32>
    tpu.vector_store %arg3[%c4_242, %c0_243], %1525 {strides = array<i32>} : memref<10x256xf32, #tpu.memory_space<vmem>>, vector<1x256xf32>,
    %c5_244 = arith.constant 5 : index
    %c0_245 = arith.constant 0 : index
    %1615 = vector.load %arg3[%c5_244, %c0_245] : memref<10x256xf32, #tpu.memory_space<vmem>>, vector<1x256xf32>
    tpu.vector_store %arg3[%c5_244, %c0_245], %1593 {strides = array<i32>} : memref<10x256xf32, #tpu.memory_space<vmem>>, vector<1x256xf32>,
    %c6_246 = arith.constant 6 : index
    %c0_247 = arith.constant 0 : index
    %1616 = vector.load %arg3[%c6_246, %c0_247] : memref<10x256xf32, #tpu.memory_space<vmem>>, vector<1x256xf32>
    tpu.vector_store %arg3[%c6_246, %c0_247], %1597 {strides = array<i32>} : memref<10x256xf32, #tpu.memory_space<vmem>>, vector<1x256xf32>,
    %c7_248 = arith.constant 7 : index
    %c0_249 = arith.constant 0 : index
    %1617 = vector.load %arg3[%c7_248, %c0_249] : memref<10x256xf32, #tpu.memory_space<vmem>>, vector<1x256xf32>
    tpu.vector_store %arg3[%c7_248, %c0_249], %1601 {strides = array<i32>} : memref<10x256xf32, #tpu.memory_space<vmem>>, vector<1x256xf32>,
    %c8_250 = arith.constant 8 : index
    %c0_251 = arith.constant 0 : index
    %1618 = vector.load %arg3[%c8_250, %c0_251] : memref<10x256xf32, #tpu.memory_space<vmem>>, vector<1x256xf32>
    tpu.vector_store %arg3[%c8_250, %c0_251], %1605 {strides = array<i32>} : memref<10x256xf32, #tpu.memory_space<vmem>>, vector<1x256xf32>,
    %c9_252 = arith.constant 9 : index
    %c0_253 = arith.constant 0 : index
    %1619 = vector.load %arg3[%c9_252, %c0_253] : memref<10x256xf32, #tpu.memory_space<vmem>>, vector<1x256xf32>
    tpu.vector_store %arg3[%c9_252, %c0_253], %1609 {strides = array<i32>} : memref<10x256xf32, #tpu.memory_space<vmem>>, vector<1x256xf32>,
    return
  }
}

</mosaic_0001>

<bundles_post_ra>
// kernel: bbox_head_forward.1
= control target key start
LH: loop header
LB: loop body
LE: loop exit
PB: predicated region body
PF: predicated region fallthrough
CT: control target
= control target key end

     0   :  { %s6028_s0 = inlined_call_operand.vmem [shape: f32[8,256], index: 0, kind: input, shape index: {}]   ;;  %s6029_s1 = inlined_call_operand.vmem [shape: f32[180], index: 1, kind: input, shape index: {}]   ;;  %s6030_s2 = inlined_call_operand.vmem [shape: f32[5], index: 2, kind: input, shape index: {}]   ;;  %s6031_s3 = inlined_call_operand.vmem [shape: f32[10,256], index: 3, kind: output, shape index: {}]  }
   0x1   :  { %6221 = sst [smem:[#allocation109_spill]] %s6028_s0 }
   0x2   :  { %6222 = sst [smem:[#allocation110_spill]] %s6031_s3 }
   0x3   :  { %8 = vsyncpa [#allocation4], 0  ;;  %s18_s14 = sshll.u32 %s6029_s1, 4  ;;  %s19_s14 = int_to_ptr.vmem [resolvable:$true] %s18_s14 }
   0x4   :  { %9 = vsyncpa [#allocation6], 0  ;;  %s28_s17 = sshll.u32 %s6030_s2, 4  ;;  %s2968_s18 = scalar_lea.vmem %s19_s14, 32  ;;  %s29_s17 = int_to_ptr.vmem [resolvable:$true] %s28_s17 }
   0x5   :  { %p2969_p0 = scmp.ne.s32.totalorder %s19_s14, %s2968_s18  ;;  %p2973_p1 = scmp.lt.s32.totalorder %s19_s14, %s19_s14 }
   0x6   :  { %p2974_p2 = scmp.lt.s32.totalorder %s2968_s18, %s2968_s18 }
   0x8   :  { %p2975_p3 = por %p2974_p2, %p2973_p1 }
   0xa   :  { %p2976_p4 = pnand %p2975_p3, %p2969_p0 }
   0xc   :  { %2979 = shalt.err (!%p2976_p4)
}
   0xd   :  { %s2996_s19 = smov [#allocation3]   ;;  %s2980_s20 = scalar_lea.vmem %s29_s17, 16 }
   0xe   :  { %21 = dma.vmem_to_smem %s19_s14, 32, %s2996_s19, [#allocation4]  }
   0xf   :  { %p2981_p5 = scmp.ne.s32.totalorder %s29_s17, %s2980_s20  ;;  %p2985_p6 = scmp.lt.s32.totalorder %s29_s17, %s29_s17 }
  0x10   :  { %p2986_p7 = scmp.lt.s32.totalorder %s2980_s20, %s2980_s20 }
  0x12   :  { %p2987_p8 = por %p2986_p7, %p2985_p6 }
  0x14   :  { %p2988_p9 = pnand %p2987_p8, %p2981_p5 }
  0x16   :  { %2991 = shalt.err (!%p2988_p9)
}
  0x17   :  { %s2997_s1 = smov [#allocation5]  }
  0x18   :  { %31 = dma.vmem_to_smem %s29_s17, 16, %s2997_s1, [#allocation6]  }
  0x19   :  { %2992 = dma.done.wait [#allocation4], 32  }
  0x1a   :  { %2993 = vsyncadd [#allocation4], 4294967264 }
  0x1b   :  { %2994 = dma.done.wait [#allocation6], 16  }
  0x1c   :  { %2995 = vsyncadd [#allocation6], 4294967280 }
  0x1d   :  { %38 = sfence }
  0x1e   :  { %v3037_v0 = vld [vmem:[%s6028_s0 + $0x8] sm:$0xff]  ;;  %s2785_s22 = sld [smem:[#allocation3 + $0x1]]  ;;  %v6051_v1 = vmov 0.0   ;;  %s2999_s23 = smov 17   ;;  %v3044_v2 = vld [vmem:[%s6028_s0] sm:$0xff]  ;;  %vm109_vm0 = vcmask 138240  }
  0x1f   :  { %103 = vrot.lane.b32.xlu0 %v6051_v1, %s2999_s23  ;;  %107 = vrot.lane.b32.xlu1 %v3037_v0, %s2999_s23  ;;  %s2786_s24 = sld [smem:[#allocation3 + $0x25]]  ;;  %s6032_s28 = smov 16   ;;  %vm340_vm3 = vcmask 130048   ;;  %vm782_vm4 = vcmask 121856   ;;  %vm1005_vm7 = vcmask 7168   ;;  %vm1444_vm8 = vcmask 1039360  }
  0x20   :  { %s2787_s27 = sld [smem:[#allocation3 + $0x49]]  ;;  %s6230_s3 = smov 16   ;;  %vm1667_vm9 = vcmask 924672   ;;  %vm1898_vm10 = vcmask 916480   ;;  %vm2336_vm11 = vcmask 908288  }
  0x21   :  { %s2788_s29 = sld [smem:[#allocation3 + $0x6d]] }
  0x22   :  { %s2789_s30 = sld [smem:[#allocation3 + $0x91]] }
  0x23   :  { %105 = vrot.lane.b32.xlu0 %v3044_v2, %s2999_s23  ;;  %s2790_s4 = sld [smem:[#allocation3 + $0xa]] }
  0x24   :  { %v327_v3 = vstv %s2785_s22  ;;  %s2791_s5 = sld [smem:[#allocation3 + $0x2e]] }
  0x25   :  { %v328_v4 = vmul.f32 0.0, %v327_v3  ;;  %v329_v5 = vmul.f32 %v327_v3, %v3044_v2  ;;  %v348_v6 = vstv %s2786_s24  ;;  %v330_v7 = vmul.f32 %v327_v3, %v3037_v0  ;;  %s2792_s6 = sld [smem:[#allocation3 + $0x52]] }
  0x26   :  { %v349_v8 = vmul.f32 0.0, %v348_v6  ;;  %v350_v9 = vmul.f32 %v348_v6, %v3044_v2  ;;  %v351_v10 = vmul.f32 %v348_v6, %v3037_v0  ;;  %v368_v11 = vstv %s2787_s27  ;;  %s2793_s7 = sld [smem:[#allocation3 + $0x76]] }
  0x27   :  { %334 = vrot.lane.b32.xlu1 %v328_v4, %s6032_s28  ;;  %336 = vrot.lane.b32.xlu0 %v329_v5, %s6032_s28  ;;  %v369_v12 = vmul.f32 0.0, %v368_v11  ;;  %v370_v13 = vmul.f32 %v368_v11, %v3044_v2  ;;  %v388_v14 = vstv %s2788_s29  ;;  %v371_v15 = vmul.f32 %v368_v11, %v3037_v0  ;;  %s2794_s8 = sld [smem:[#allocation3 + $0x9a]] }
  0x28   :  { %v389_v16 = vmul.f32 0.0, %v388_v14  ;;  %v390_v17 = vmul.f32 %v388_v14, %v3044_v2  ;;  %v391_v18 = vmul.f32 %v388_v14, %v3037_v0  ;;  %v408_v19 = vstv %s2789_s30  ;;  %s2795_s9 = sld [smem:[#allocation3 + $0x13]] }
  0x29   :  { %v428_v20 = vstv %s2790_s4  ;;  %v409_v21 = vmul.f32 0.0, %v408_v19  ;;  %v410_v22 = vmul.f32 %v408_v19, %v3044_v2  ;;  %v411_v24 = vmul.f32 %v408_v19, %v3037_v0  ;;  %s2796_s10 = sld [smem:[#allocation3 + $0x37]] }
  0x2a   :  { %v429_v23 = vmul.f32 0.0, %v428_v20  ;;  %v430_v26 = vmul.f32 %v428_v20, %v3044_v2  ;;  %v431_v27 = vmul.f32 %v428_v20, %v3037_v0  ;;  %v451_v28 = vstv %s2791_s5  ;;  %s2797_s11 = sld [smem:[#allocation3 + $0x5b]] }
  0x2b   :  { %338 = vrot.lane.b32.xlu1 %v330_v7, %s6032_s28  ;;  %355 = vrot.lane.b32.xlu0 %v349_v8, %s6032_s28  ;;  %v452_v31 = vmul.f32 0.0, %v451_v28  ;;  %v453_v32 = vmul.f32 %v451_v28, %v3044_v2  ;;  %v474_v33 = vstv %s2792_s6  ;;  %v454_v36 = vmul.f32 %v451_v28, %v3037_v0  ;;  %s2798_s12 = sld [smem:[#allocation3 + $0x7f]] }
  0x2c   :  { %v435_v25 = vrot.slane %v429_v23, 1  ;;  %v436_v29 = vrot.slane %v430_v26, 1  ;;  %v437_v30 = vrot.slane %v431_v27, 1  ;;  %v475_v37 = vmul.f32 0.0, %v474_v33  ;;  %s2799_s13 = sld [smem:[#allocation3 + $0xa3]] }
  0x2d   :  { %v458_v34 = vrot.slane %v452_v31, 1  ;;  %v459_v35 = vrot.slane %v453_v32, 1  ;;  %v460_v38 = vrot.slane %v454_v36, 1  ;;  %v476_v40 = vmul.f32 %v474_v33, %v3044_v2  ;;  %s2800_s14 = sld [smem:[#allocation3 + $0x1c]] }
  0x2e   :  { %v481_v39 = vrot.slane %v475_v37, 1  ;;  %v477_v41 = vmul.f32 %v474_v33, %v3037_v0  ;;  %v497_v42 = vstv %s2793_s7  ;;  %v520_v47 = vstv %s2794_s8  ;;  %s2801_s15 = sld [smem:[#allocation3 + $0x40]] }
  0x2f   :  { %357 = vrot.lane.b32.xlu1 %v350_v9, %s6032_s28  ;;  %359 = vrot.lane.b32.xlu0 %v351_v10, %s6032_s28  ;;  %v482_v43 = vrot.slane %v476_v40, 1  ;;  %v498_v45 = vmul.f32 0.0, %v497_v42  ;;  %v499_v46 = vmul.f32 %v497_v42, %v3044_v2  ;;  %v500_v50 = vmul.f32 %v497_v42, %v3037_v0  ;;  %s3116_s16 = sld [smem:[#allocation3 + $0x64]] }
  0x30   :  { %v483_v44 = vrot.slane %v477_v41, 1  ;;  %v521_v51 = vmul.f32 0.0, %v520_v47  ;;  %v522_v54 = vmul.f32 %v520_v47, %v3044_v2  ;;  %v523_v55 = vmul.f32 %v520_v47, %v3037_v0  ;;  %s3118_s17 = sld [smem:[#allocation3 + $0x88]] }
  0x31   :  { %v504_v48 = vrot.slane %v498_v45, 1  ;;  %v505_v49 = vrot.slane %v499_v46, 1  ;;  %v506_v52 = vrot.slane %v500_v50, 1  ;;  %v543_v56 = vstv %s2795_s9  ;;  %s3120_s18 = sld [smem:[#allocation3 + $0xac]] }
  0x32   :  { %v527_v53 = vrot.slane %v521_v51, 1  ;;  %v528_v57 = vrot.slane %v522_v54, 1  ;;  %v529_v58 = vrot.slane %v523_v55, 1  ;;  %v544_v59 = vmul.f32 0.0, %v543_v56  ;;  %s3122_s19 = sld [smem:[#allocation5]] }
  0x33   :  { %375 = vrot.lane.b32.xlu1 %v369_v12, %s6032_s28  ;;  %377 = vrot.lane.b32.xlu0 %v370_v13, %s6032_s28  ;;  %v545_v60 = vmul.f32 %v543_v56, %v3044_v2  ;;  %v566_v61 = vstv %s2796_s10  ;;  %v546_v3 = vmul.f32 %v543_v56, %v3037_v0  ;;  %v589_v9 = vstv %s2797_s11  ;;  %s3127_s20 = sld [smem:[#allocation3]] }
  0x34   :  { %v550_v62 = vrot.slane %v544_v59, 2  ;;  %v567_v4 = vmul.f32 0.0, %v566_v61  ;;  %v568_v7 = vmul.f32 %v566_v61, %v3044_v2  ;;  %v569_v8 = vmul.f32 %v566_v61, %v3037_v0  ;;  %s3129_s1 = sld [smem:[#allocation3 + $0x9]] }
  0x35   :  { %v551_v63 = vrot.slane %v545_v60, 2  ;;  %v552_v5 = vrot.slane %v546_v3, 2  ;;  %v590_v12 = vmul.f32 0.0, %v589_v9  ;;  %v591_v13 = vmul.f32 %v589_v9, %v3044_v2  ;;  %s3131_s2 = sld [smem:[#allocation3 + $0x12]] }
  0x36   :  { %v573_v6 = vrot.slane %v567_v4, 2  ;;  %v574_v10 = vrot.slane %v568_v7, 2  ;;  %v575_v11 = vrot.slane %v569_v8, 2  ;;  %v612_v14 = vstv %s2798_s12  ;;  %s3133_s21 = sld [smem:[#allocation3 + $0x1b]] }
  0x37   :  { %379 = vrot.lane.b32.xlu1 %v371_v15, %s6032_s28  ;;  %395 = vrot.lane.b32.xlu0 %v389_v16, %s6032_s28  ;;  %v596_v15 = vrot.slane %v590_v12, 2  ;;  %v597_v16 = vrot.slane %v591_v13, 2  ;;  %v635_v23 = vstv %s2799_s13  ;;  %v658_v28 = vstv %s2800_s14  ;;  %s3139_s22 = sld [smem:[#allocation5 + $0x1]] }
  0x38   :  { %v636_v26 = vmul.f32 0.0, %v635_v23  ;;  %v637_v27 = vmul.f32 %v635_v23, %v3044_v2  ;;  %6223 = sst [smem:[#allocation9_spill]] %s3122_s19  ;;  %v638_v31 = vmul.f32 %v635_v23, %v3037_v0  ;;  %v659_v32 = vmul.f32 0.0, %v658_v28 }
  0x39   :  { %v661_v36 = vmul.f32 %v658_v28, %v3037_v0  ;;  %v681_v37 = vstv %s2801_s15  ;;  %s3141_s23 = sld [smem:[#allocation3 + $0x24]]  ;;  %v704_v42 = vstv %s3116_s16  ;;  %v6047_v47 = vlaneseq }
  0x3a   :  { %6224 = sst [smem:[#allocation10_spill]] %s3129_s1  ;;  %v644_v33 = vrot.slane %v638_v31, 2  ;;  %v682_v40 = vmul.f32 0.0, %v681_v37  ;;  %v683_v41 = vmul.f32 %v681_v37, %v3044_v2  ;;  %v684_v45 = vmul.f32 %v681_v37, %v3037_v0 }
  0x3b   :  { %397 = vrot.lane.b32.xlu1 %v390_v17, %s6032_s28  ;;  %399 = vrot.lane.b32.xlu0 %v391_v18, %s6032_s28  ;;  %v592_v17 = vmul.f32 %v589_v9, %v3037_v0  ;;  %v613_v18 = vmul.f32 0.0, %v612_v14  ;;  %s3143_s24 = sld [smem:[#allocation3 + $0x2d]]  ;;  %v705_v46 = vmul.f32 0.0, %v704_v42  ;;  %v706_v50 = vmul.f32 %v704_v42, %v3044_v2 }
  0x3c   :  { %6225 = sst [smem:[#allocation11_spill]] %s3133_s21  ;;  %v707_v51 = vmul.f32 %v704_v42, %v3037_v0  ;;  %v117_v8 = vstv %s3127_s20 }
  0x3d   :  { %v598_v19 = vrot.slane %v592_v17, 2  ;;  %v619_v20 = vrot.slane %v613_v18, 2  ;;  %s3145_s25 = sld [smem:[#allocation3 + $0x36]]  ;;  %v712_v54 = vrot.slane %v706_v50, 3 }
  0x3e   :  { %s3150_s26 = sld [smem:[#allocation3 + $0x3f]]  ;;  %v713_v55 = vrot.slane %v707_v51, 3 }
  0x3f   :  { %415 = vrot.lane.b32.xlu1 %v409_v21, %s6032_s28  ;;  %417 = vrot.lane.b32.xlu0 %v410_v22, %s6032_s28  ;;  %v614_v21 = vmul.f32 %v612_v14, %v3044_v2  ;;  %v615_v22 = vmul.f32 %v612_v14, %v3037_v0  ;;  %s3153_s27 = sld [smem:[#allocation5 + $0x2]] }
  0x40   :  { %s3155_s29 = sld [smem:[#allocation3 + $0x48]] }
  0x41   :  { %s3157_s30 = sld [smem:[#allocation3 + $0x51]] }
  0x42   :  { %s3162_s4 = sld [smem:[#allocation3 + $0x5a]] }
  0x43   :  { %419 = vrot.lane.b32.xlu1 %v411_v24, %s6032_s28  ;;  %438 = vrot.lane.b32.xlu0 %v435_v25, %s6032_s28  ;;  %v620_v24 = vrot.slane %v614_v21, 2  ;;  %v621_v25 = vrot.slane %v615_v22, 2  ;;  %s3164_s5 = sld [smem:[#allocation3 + $0x63]] }
  0x44   :  { %s3166_s6 = sld [smem:[#allocation5 + $0x3]] }
  0x45   :  { %s3168_s7 = sld [smem:[#allocation3 + $0x6c]] }
  0x46   :  { %s3174_s8 = sld [smem:[#allocation3 + $0x75]] }
  0x47   :  { %440 = vrot.lane.b32.xlu1 %v436_v29, %s6032_s28  ;;  %442 = vrot.lane.b32.xlu0 %v437_v30, %s6032_s28  ;;  %v642_v29 = vrot.slane %v636_v26, 2  ;;  %v643_v30 = vrot.slane %v637_v27, 2  ;;  %s3177_s9 = sld [smem:[#allocation3 + $0x7e]] }
  0x48   :  { %s3179_s10 = sld [smem:[#allocation3 + $0x87]] }
  0x49   :  { %6226 = sst [smem:[#allocation12_spill]] %s3164_s5 }
  0x4a   :  { %6227 = sst [smem:[#allocation13_spill]] %s3166_s6 }
  0x4b   :  { %461 = vrot.lane.b32.xlu1 %v458_v34, %s6032_s28  ;;  %463 = vrot.lane.b32.xlu0 %v459_v35, %s6032_s28  ;;  %v665_v34 = vrot.slane %v659_v32, 3  ;;  %v660_v35 = vmul.f32 %v658_v28, %v3044_v2  ;;  %s3184_s11 = sld [smem:[#allocation5 + $0x4]] }
  0x4c   :  { %s3189_s12 = sld [smem:[#allocation3 + $0x90]] }
  0x4d   :  { %s3192_s13 = sld [smem:[#allocation3 + $0x99]] }
  0x4e   :  { %s3194_s14 = sld [smem:[#allocation3 + $0xa2]] }
  0x4f   :  { %465 = vrot.lane.b32.xlu1 %v460_v38, %s6032_s28  ;;  %484 = vrot.lane.b32.xlu0 %v481_v39, %s6032_s28  ;;  %v666_v38 = vrot.slane %v660_v35, 3  ;;  %v667_v39 = vrot.slane %v661_v36, 3  ;;  %s3200_s15 = sld [smem:[#allocation3 + $0xab]] }
  0x50   :  { %s3204_s16 = sld [smem:[#allocation3 + $0x7]] }
  0x51   :  { %s3225_s0 = sld [smem:[#allocation3 + $0x10]] }
  0x52   :  { %s3231_s19 = sld [smem:[#allocation3 + $0x34]] }
  0x53   :  { %486 = vrot.lane.b32.xlu1 %v482_v43, %s6032_s28  ;;  %488 = vrot.lane.b32.xlu0 %v483_v44, %s6032_s28  ;;  %v688_v43 = vrot.slane %v682_v40, 3  ;;  %v689_v44 = vrot.slane %v683_v41, 3  ;;  %s3245_s21 = sld [smem:[#allocation3 + $0x58]] }
  0x54   :  { %s3255_s5 = sld [smem:[#allocation3 + $0x7c]] }
  0x55   :  { %s3265_s6 = sld [smem:[#allocation3 + $0xa0]] }
  0x56   :  { %s6261_s20 = sld [smem:[#allocation9_spill]] }
  0x57   :  { %507 = vrot.lane.b32.xlu1 %v504_v48, %s6032_s28  ;;  %509 = vrot.lane.b32.xlu0 %v505_v49, %s6032_s28  ;;  %v690_v48 = vrot.slane %v684_v45, 3  ;;  %v711_v49 = vrot.slane %v705_v46, 3 }
  0x5b   :  { %511 = vrot.lane.b32.xlu1 %v506_v52, %s6032_s28  ;;  %530 = vrot.lane.b32.xlu0 %v527_v53, %s6032_s28  ;;  %v727_v52 = vstv %s3118_s17  ;;  %v3182_v53 = vand.u32 127, %v6047_v47  ;;  %s3206_s17 = sld [smem:[#allocation3 + $0x2b]]  ;;  %v2078_v37 = vstv %s3265_s6 }
  0x5c   :  { %v728_v56 = vmul.f32 0.0, %v727_v52  ;;  %v730_v60 = vmul.f32 %v727_v52, %v3037_v0  ;;  %v3402_v21 = vmul.f32 %v2078_v37, %v3037_v0  ;;  %s3404_s6 = sld [smem:[#allocation3 + $0x22]]  ;;  %v3412_v23 = vmul.f32 0.0, %v2078_v37 }
  0x5d   :  { %6228 = vst [vmem:[#allocation14_spill] sm:$0xff] %v3182_v53  ;;  %v3197_v59 = vadd.s32 128, %v3182_v53  ;;  %v6050_v4 = vand.u32 15, %v3182_v53 }
  0x5e   :  { %v734_v61 = vrot.slane %v728_v56, 3  ;;  %6245 = vst [vmem:[#allocation26_spill] sm:$0xff] %v3402_v21  ;;  %6246 = vst [vmem:[#allocation27_spill] sm:$0xff] %v3412_v23  ;;  %v6266_v21 = vmov 0.0  }
  0x5f   :  { %532 = vrot.lane.b32.xlu1 %v528_v57, %s6032_s28  ;;  %534 = vrot.lane.b32.xlu0 %v529_v58, %s6032_s28  ;;  %v729_v57 = vmul.f32 %v727_v52, %v3044_v2  ;;  %v750_v58 = vstv %s3120_s18  ;;  %6229 = vst [vmem:[#allocation15_spill] sm:$0xff] %v3197_v59  ;;  %s3211_s18 = sld [smem:[#allocation3 + $0x4f]]  ;;  %vm3309_vm1 = vcmp.ge.s32.totalorder %v6050_v4, 1  ;;  %v2055_v4 = vstv %s3255_s5 }
  0x60   :  { %v752_v12 = vmul.f32 %v750_v58, %v3044_v2  ;;  %v753_v13 = vmul.f32 %v750_v58, %v3037_v0  ;;  %s3392_s5 = sld [smem:[#allocation3 + $0xa9]] }
  0x61   :  { %v1906_v40 = vstv %s3206_s17  ;;  %s3427_s17 = sld [smem:[#allocation3 + $0x6a]] }
  0x62   :  { %v758_v27 = vrot.slane %v752_v12, 3  ;;  %v759_v28 = vrot.slane %v753_v13, 3  ;;  %v3283_v50 = vmul.f32 %v1906_v40, %v3044_v2  ;;  %v3286_v51 = vmul.f32 %v1906_v40, %v3037_v0 }
  0x63   :  { %553 = vrot.lane.b32.xlu1 %v550_v62, %s6032_s28  ;;  %555 = vrot.lane.b32.xlu0 %v551_v63, %s6032_s28  ;;  %v735_v62 = vrot.slane %v729_v57, 3  ;;  %v751_v63 = vmul.f32 0.0, %v750_v58  ;;  %v3288_v52 = vmul.f32 0.0, %v1906_v40  ;;  %v2032_v13 = vstv %s3245_s21  ;;  %s3381_s21 = sld [smem:[#allocation3 + $0x85]] }
  0x64   :  { %v3376_v31 = vmul.f32 0.0, %v2032_v13 }
  0x66   :  { %6240 = vst [vmem:[#allocation21_spill] sm:$0xff] %v3376_v31 }
  0x67   :  { %557 = vrot.lane.b32.xlu1 %v552_v5, %s6032_s28  ;;  %576 = vrot.lane.b32.xlu0 %v573_v6, %s6032_s28  ;;  %v6049_v5 = vand.u32 15, %v3197_v59  ;;  %v736_v6 = vrot.slane %v730_v60, 3 }
  0x69   :  { %vm3315_vm2 = vcmp.ge.s32.totalorder %v6049_v5, 1 }
  0x6b   :  { %578 = vrot.lane.b32.xlu1 %v574_v10, %s6032_s28  ;;  %580 = vrot.lane.b32.xlu0 %v575_v11, %s6032_s28  ;;  %v757_v10 = vrot.slane %v751_v63, 3  ;;  %v147_v11 = vstv %s3129_s1  ;;  %s3239_s1 = sld [smem:[#allocation3 + $0x97]]  ;;  %v6234_v63 = vmov 0 }
  0x6c   :  { %v6235_v63 = vsel %vm3315_vm2, 4294967295, %v6234_v63 }
  0x6d   :  { %6236 = vst [vmem:[#allocation17_spill] sm:$0xff] %v6235_v63 }
  0x6f   :  { %599 = vrot.lane.b32.xlu1 %v596_v15, %s6032_s28  ;;  %601 = vrot.lane.b32.xlu0 %v597_v16, %s6032_s28 }
  0x73   :  { %603 = vrot.lane.b32.xlu1 %v598_v19, %s6032_s28  ;;  %622 = vrot.lane.b32.xlu0 %v619_v20, %s6032_s28 }
  0x77   :  { %624 = vrot.lane.b32.xlu1 %v620_v24, %s6032_s28  ;;  %626 = vrot.lane.b32.xlu0 %v621_v25, %s6032_s28 }
  0x7b   :  { %645 = vrot.lane.b32.xlu1 %v642_v29, %s6032_s28  ;;  %647 = vrot.lane.b32.xlu0 %v643_v30, %s6032_s28  ;;  %v3389_v29 = vmul.f32 %v2078_v37, %v3044_v2 }
  0x7d   :  { %6244 = vst [vmem:[#allocation25_spill] sm:$0xff] %v3389_v29 }
  0x7f   :  { %649 = vrot.lane.b32.xlu1 %v644_v33, %s6032_s28  ;;  %668 = vrot.lane.b32.xlu0 %v665_v34, %s6032_s28  ;;  %v1885_v34 = vstv %s3204_s16  ;;  %v3361_v33 = vmul.f32 %v2032_v13, %v3044_v2  ;;  %s3415_s16 = sld [smem:[#allocation3 + $0x46]] }
  0x80   :  { %v3274_v45 = vmul.f32 %v1885_v34, %v3044_v2  ;;  %v3277_v46 = vmul.f32 %v1885_v34, %v3037_v0 }
  0x81   :  { %6238 = vst [vmem:[#allocation19_spill] sm:$0xff] %v3361_v33 }
  0x83   :  { %670 = vrot.lane.b32.xlu1 %v666_v38, %s6032_s28  ;;  %672 = vrot.lane.b32.xlu0 %v667_v39, %s6032_s28  ;;  %v3384_v39 = vmul.f32 %v2055_v4, %v3037_v0  ;;  %v3386_v38 = vmul.f32 0.0, %v2055_v4 }
  0x85   :  { %6242 = vst [vmem:[#allocation23_spill] sm:$0xff] %v3384_v39  ;;  %6243 = vst [vmem:[#allocation24_spill] sm:$0xff] %v3386_v38  ;;  %v6275_v39 = vstv %s3141_s23 }
  0x87   :  { %691 = vrot.lane.b32.xlu1 %v688_v43, %s6032_s28  ;;  %693 = vrot.lane.b32.xlu0 %v689_v44, %s6032_s28  ;;  %v1926_v43 = vstv %s3211_s18  ;;  %s3433_s18 = sld [smem:[#allocation3 + $0x8e]] }
  0x88   :  { %v3298_v57 = vmul.f32 %v1926_v43, %v3044_v2  ;;  %v3301_v58 = vmul.f32 %v1926_v43, %v3037_v0 }
  0x8b   :  { %695 = vrot.lane.b32.xlu1 %v690_v48, %s6032_s28  ;;  %714 = vrot.lane.b32.xlu0 %v711_v49, %s6032_s28  ;;  %v3279_v48 = vmul.f32 0.0, %v1885_v34  ;;  %v1986_v49 = vstv %s3225_s0  ;;  %s3328_s0 = sld [smem:[#allocation3 + $0x3d]] }
  0x8c   :  { %v3325_v12 = vmul.f32 0.0, %v1986_v49 }
  0x8f   :  { %716 = vrot.lane.b32.xlu1 %v712_v54, %s6032_s28  ;;  %718 = vrot.lane.b32.xlu0 %v713_v55, %s6032_s28  ;;  %s3216_s28 = sld [smem:[#allocation3 + $0x73]]  ;;  %v2009_v54 = vstv %s3231_s19 }
  0x90   :  { %v3338_v34 = vmul.f32 %v2009_v54, %v3044_v2  ;;  %v3341_v40 = vmul.f32 %v2009_v54, %v3037_v0  ;;  %s3352_s19 = sld [smem:[#allocation3 + $0x61]]  ;;  %v3358_v41 = vmul.f32 0.0, %v2009_v54 }
  0x91   :  { %v3208_v3 = vpop.permute.xlu0 %103  ;;  %v3220_v9 = vpop.permute.xlu1 %107  ;;  %v2124_v54 = vstv %s3328_s0  ;;  %s3452_s0 = sld [smem:[#allocation3 + $0x2]] }
  0x92   :  { %6237 = vst [vmem:[#allocation18_spill] sm:$0xff] %v3358_v41  ;;  %v3450_v37 = vmul.f32 %v2124_v54, %v3044_v2  ;;  %v3459_v7 = vmul.f32 0.0, %v2124_v54 }
  0x93   :  { %737 = vrot.lane.b32.xlu1 %v734_v61, %s6230_s3  ;;  %739 = vrot.lane.b32.xlu0 %v735_v62, %s6230_s3  ;;  %v1966_v61 = vstv %s3239_s1  ;;  %v6231_v62 = vmov 0  ;;  %s3002_s1 = smov 1  }
  0x94   :  { %v6232_v62 = vsel %vm3309_vm1, 4294967295, %v6231_v62  ;;  %v3346_v47 = vmul.f32 %v1966_v61, %v3044_v2  ;;  %v3349_v5 = vmul.f32 %v1966_v61, %v3037_v0  ;;  %v3367_v32 = vmul.f32 0.0, %v1966_v61  ;;  %6250 = vst [vmem:[#allocation31_spill] sm:$0xff] %v3450_v37  ;;  %6254 = vst [vmem:[#allocation33_spill] sm:$0xff] %v3459_v7 }
  0x95   :  { %v3233_v18 = vpop.permute.xlu0 %105  ;;  %v1946_v44 = vstv %s3216_s28  ;;  %6233 = vst [vmem:[#allocation16_spill] sm:$0xff] %v6232_v62  ;;  %s3001_s28 = smov 15   ;;  %v3379_v61 = vmul.f32 %v2055_v4, %v3044_v2  ;;  %v6260_v62 = vstv %s3143_s24 }
  0x96   :  { %v3304_v60 = vmul.f32 %v1946_v44, %v3044_v2  ;;  %v110_v4 = vsel %vm109_vm0, %v3208_v3, %v3233_v18  ;;  %v111_v24 = vsel %vm109_vm0, %v3233_v18, %v3220_v9  ;;  %v2147_v20 = vstv %s3352_s19  ;;  %s3003_s19 = smov 127  }
  0x97   :  { %741 = vrot.lane.b32.xlu1 %v736_v6, %s6230_s3  ;;  %760 = vrot.lane.b32.xlu0 %v757_v10, %s6230_s3  ;;  %v3320_v6 = vmul.f32 %v1986_v49, %v3044_v2  ;;  %v3323_v10 = vmul.f32 %v1986_v49, %v3037_v0  ;;  %v3343_v49 = vmul.f32 0.0, %v1946_v44  ;;  %6241 = vst [vmem:[#allocation22_spill] sm:$0xff] %v3379_v61  ;;  %v3437_v25 = vsel %vm3309_vm1, %v110_v4, 0.0  ;;  %6252 = sst [smem:[#allocation10_spill]] %s3452_s0 }
  0x98   :  { %v3441_v22 = vsel %vm3315_vm2, %v111_v24, 0.0  ;;  %v3457_v18 = vmul.f32 %v2124_v54, %v3037_v0  ;;  %v3468_v24 = vmul.f32 %v2147_v20, %v3044_v2  ;;  %v118_v54 = vmul.f32 %v117_v8, %v3437_v25 }
  0x99   :  { %v3257_v35 = vpop.permute.xlu1 %334  ;;  %v3259_v36 = vpop.permute.xlu0 %336  ;;  %v148_v19 = vmul.f32 %v147_v11, %v3437_v25  ;;  %v119_v17 = vmul.f32 %v117_v8, %v3441_v22  ;;  %v6259_v4 = vstv %s3141_s23  ;;  %v160_v59 = vmul.f32 %v6260_v62, %v3437_v25  ;;  %s3551_s23 = sld [smem:[#allocation3 + $0xd]] }
  0x9a   :  { %6253 = vst [vmem:[#allocation32_spill] sm:$0xff] %v3457_v18  ;;  %6256 = vst [vmem:[#allocation35_spill] sm:$0xff] %v3468_v24  ;;  %v124_v63 = vmul.f32 %v6259_v4, %v3437_v25  ;;  %v3504_v4 = vmul.f32 %v2147_v20, %v3037_v0  ;;  %v3506_v62 = vmul.f32 0.0, %v2147_v20  ;;  %v6274_v8 = vstv %s3139_s22 }
  0x9b   :  { %762 = vrot.lane.b32.xlu1 %v758_v27, %s6230_s3  ;;  %764 = vrot.lane.b32.xlu0 %v759_v28, %s6230_s3  ;;  %s3291_s3 = sld [smem:[#allocation3 + $0x19]]  ;;  %v3332_v27 = vmul.f32 0.0, %v1926_v43  ;;  %v3335_v28 = vmul.f32 %v1946_v44, %v3037_v0  ;;  %v3364_v44 = vmul.f32 %v2032_v13, %v3037_v0  ;;  %v152_v18 = vrot.slane %v148_v19, 1 }
  0x9c   :  { %6263 = vst [vmem:[#allocation38_spill] sm:$0xff] %v3504_v4  ;;  %6264 = vst [vmem:[#allocation39_spill] sm:$0xff] %v3506_v62  ;;  %v126_v24 = vadd.f32 %v124_v63, %v6274_v8  ;;  %v164_v38 = vrot.slane %v160_v59, 1  ;;  %v6276_v61 = vstv %s3143_s24  ;;  %s3567_s24 = sld [smem:[#allocation3 + $0x1f]] }
  0x9d   :  { %v3293_v55 = vpop.permute.xlu1 %338  ;;  %v3295_v56 = vpop.permute.xlu0 %355  ;;  %6239 = vst [vmem:[#allocation20_spill] sm:$0xff] %v3364_v44  ;;  %v161_v31 = vmul.f32 %v6276_v61, %v3441_v22  ;;  %v6280_v61 = vstv %s3145_s25 }
  0x9e   :  { %v168_v8 = vadd.f32 %v164_v38, %v126_v24  ;;  %v6289_v24 = vstv %s3145_s25  ;;  %s3608_s25 = sld [smem:[#allocation3 + $0x20]] }
  0x9f   :  { %776 = vrot.lane.b32.xlu1 %v6051_v1, %s3001_s28  ;;  %778 = vrot.lane.b32.xlu0 %v3044_v2, %s3001_s28 }
  0xa1   :  { %v3354_v43 = vpop.permute.xlu1 %357  ;;  %v3356_v42 = vpop.permute.xlu0 %359  ;;  %v2101_v30 = vstv %s3291_s3  ;;  %s3508_s3 = sld [smem:[#allocation3 + $0xc]] }
  0xa2   :  { %v3422_v15 = vmul.f32 %v2101_v30, %v3044_v2  ;;  %v3425_v3 = vmul.f32 %v2101_v30, %v3037_v0  ;;  %v3447_v9 = vmul.f32 0.0, %v2101_v30  ;;  %v149_v30 = vmul.f32 %v147_v11, %v3441_v22 }
  0xa3   :  { %780 = vrot.lane.b32.xlu1 %v3037_v0, %s3001_s28  ;;  %999 = vrot.lane.b32.xlu0 %v6051_v1, %s3002_s1  ;;  %s3461_s28 = sld [smem:[#allocation3 + $0xb]]  ;;  %v2170_v1 = vstv %s3381_s21 }
  0xa4   :  { %6247 = vst [vmem:[#allocation28_spill] sm:$0xff] %v3422_v15  ;;  %6248 = vst [vmem:[#allocation29_spill] sm:$0xff] %v3425_v3  ;;  %s3499_s21 = sld [smem:[#allocation3 + $0x3]]  ;;  %v3514_v11 = vmul.f32 %v2170_v1, %v3044_v2  ;;  %v3517_v23 = vmul.f32 %v2170_v1, %v3037_v0  ;;  %v3519_v20 = vmul.f32 0.0, %v2170_v1  ;;  %v6271_v15 = vstv %s6261_s20 }
  0xa5   :  { %v3394_v26 = vpop.permute.xlu1 %375  ;;  %v3396_v13 = vpop.permute.xlu0 %377  ;;  %6249 = vst [vmem:[#allocation30_spill] sm:$0xff] %v3447_v9  ;;  %v120_v7 = vadd.f32 %v118_v54, %v6271_v15  ;;  %v6272_v37 = vmov %v6271_v15  ;;  %v153_v29 = vrot.slane %v149_v30, 1  ;;  %v125_v1 = vmul.f32 %v6275_v39, %v3441_v22  ;;  %s3541_s20 = sld [smem:[#allocation3 + $0x4]] }
  0xa6   :  { %6267 = vst [vmem:[#allocation41_spill] sm:$0xff] %v3514_v11  ;;  %6268 = vst [vmem:[#allocation42_spill] sm:$0xff] %v3517_v23  ;;  %v121_v9 = vadd.f32 %v119_v17, %v6272_v37  ;;  %v6278_v17 = vstv %s3131_s2  ;;  %v220_v30 = vmul.f32 %v6280_v61, %v3437_v25  ;;  %s3561_s2 = sld [smem:[#allocation3 + $0x16]]  ;;  %v2193_v61 = vstv %s3392_s5 }
  0xa7   :  { %1001 = vrot.lane.b32.xlu1 %v3044_v2, %s3002_s1  ;;  %1003 = vrot.lane.b32.xlu0 %v3037_v0, %s3002_s1  ;;  %s3471_s1 = sld [smem:[#allocation3 + $0x14]]  ;;  %6269 = vst [vmem:[#allocation43_spill] sm:$0xff] %v3519_v20  ;;  %v208_v19 = vmul.f32 %v6278_v17, %v3437_v25  ;;  %v6279_v63 = vmov %v6278_v17  ;;  %v6283_v23 = vstv %s3139_s22  ;;  %v165_v20 = vrot.slane %v161_v31, 1  ;;  %s6085_s22 = smov 112  }
  0xa8   :  { %6265 = sst [smem:[#allocation40_spill]] %s3508_s3  ;;  %v209_v59 = vmul.f32 %v6279_v63, %v3441_v22  ;;  %v156_v63 = vadd.f32 %v152_v18, %v120_v7  ;;  %v157_v62 = vadd.f32 %v153_v29, %v121_v9  ;;  %v127_v17 = vadd.f32 %v125_v1, %v6283_v23 }
  0xa9   :  { %v3443_v14 = vpop.permute.xlu1 %379  ;;  %v3445_v16 = vpop.permute.xlu0 %395  ;;  %6255 = sst [smem:[#allocation34_spill]] %s3461_s28  ;;  %v212_v7 = vrot.slane %v208_v19, 2  ;;  %v6285_v9 = vstv %s3155_s29  ;;  %v224_v38 = vrot.slane %v220_v30, 2  ;;  %v6288_v23 = vstv %s3150_s26 }
  0xaa   :  { %s3485_s28 = sld [smem:[#allocation3 + $0x1d]]  ;;  %v213_v29 = vrot.slane %v209_v59, 2  ;;  %v130_v18 = vmul.f32 %v6285_v9, %v3437_v25  ;;  %v280_v31 = vmul.f32 %v6288_v23, %v3437_v25  ;;  %v221_v1 = vmul.f32 %v6289_v24, %v3441_v22 }
  0xab   :  { %1438 = vrot.lane.b32.xlu1 %v3044_v2, %s3003_s19  ;;  %1440 = vrot.lane.b32.xlu0 %v3037_v0, %s3003_s19  ;;  %6262 = sst [smem:[#allocation9_spill]] %s3499_s21  ;;  %v3599_v19 = vmul.f32 %v2193_v61, %v3044_v2  ;;  %v216_v59 = vadd.f32 %v212_v7, %v156_v63  ;;  %v3606_v9 = vmul.f32 0.0, %v2193_v61  ;;  %v169_v23 = vadd.f32 %v165_v20, %v127_v17 }
  0xac   :  { %s3521_s3 = sld [smem:[#allocation3 + $0x15]]  ;;  %v217_v30 = vadd.f32 %v213_v29, %v157_v62  ;;  %v6293_v63 = vstv %s3153_s27  ;;  %v6295_v29 = vstv %s3157_s30  ;;  %v225_v20 = vrot.slane %v221_v1, 2 }
  0xad   :  { %6257 = sst [smem:[#allocation36_spill]] %s3471_s1  ;;  %v3493_v53 = vpop.permute.xlu1 %397  ;;  %v3495_v3 = vpop.permute.xlu0 %399  ;;  %v132_v62 = vadd.f32 %v130_v18, %v6293_v63  ;;  %v173_v41 = vmul.f32 %v6295_v29, %v3441_v22  ;;  %v341_v18 = vsel %vm340_vm3, %v3257_v35, %v3259_v36 }
  0xae   :  { %s3586_s5 = sld [smem:[#allocation3 + $0xe]] }
  0xaf   :  { %1442 = vrot.lane.b32.xlu1 %v6266_v21, %s3003_s19  ;;  %s3527_s19 = sld [smem:[#allocation3 + $0x1e]]  ;;  %v177_v29 = vrot.slane %v173_v41, 1 }
  0xb0   :  { %6258 = sst [smem:[#allocation37_spill]] %s3485_s28  ;;  %s3004_s28 = smov 113  }
  0xb1   :  { %1661 = vrot.lane.b32.xlu0 %v3044_v2, %s3004_s28  ;;  %v3537_v44 = vpop.permute.xlu1 %415  ;;  %v3539_v15 = vpop.permute.xlu0 %417  ;;  %6291 = sst [smem:[#allocation48_spill]] %s3608_s25 }
  0xb2   :  { %6270 = sst [smem:[#allocation44_spill]] %s3521_s3 }
  0xb3   :  { %s6277_s3 = sld [smem:[#allocation11_spill]]  ;;  %1663 = vrot.lane.b32.xlu1 %v3037_v0, %s3004_s28 }
  0xb4   :  { %6287 = sst [smem:[#allocation46_spill]] %s3586_s5 }
  0xb5   :  { %6273 = sst [smem:[#allocation45_spill]] %s3527_s19  ;;  %1665 = vrot.lane.b32.xlu0 %v6266_v21, %s3004_s28  ;;  %v3574_v11 = vpop.permute.xlu1 %419  ;;  %v3576_v4 = vpop.permute.xlu0 %438 }
  0xb6   :  { %s3578_s28 = sld [smem:[#allocation3 + $0x5]] }
  0xb7   :  { %1892 = vrot.lane.b32.xlu1 %v3274_v45, %s6085_s22  ;;  %s3624_s25 = sld [smem:[#allocation3 + $0xf]] }
  0xb8   :  { %s3676_s27 = sld [smem:[#allocation3 + $0x38]] }
  0xb9   :  { %v6281_v37 = vstv %s6277_s3  ;;  %1894 = vrot.lane.b32.xlu0 %v3277_v46, %s6085_s22  ;;  %s3601_s3 = sld [smem:[#allocation3 + $0x17]]  ;;  %v228_v46 = vadd.f32 %v224_v38, %v168_v8  ;;  %v3610_v2 = vpop.permute.xlu1 %440  ;;  %v3612_v24 = vpop.permute.xlu0 %442 }
  0xba   :  { %v268_v39 = vmul.f32 %v6281_v37, %v3437_v25  ;;  %v6282_v54 = vmov %v6281_v37  ;;  %v6286_v37 = vstv %s3157_s30  ;;  %s3614_s22 = sld [smem:[#allocation3 + $0x6]] }
  0xbb   :  { %v269_v21 = vmul.f32 %v6282_v54, %v3441_v22  ;;  %v172_v33 = vmul.f32 %v6286_v37, %v3437_v25  ;;  %v3604_v54 = vmul.f32 %v2193_v61, %v3037_v0  ;;  %v6294_v61 = vstv %s3155_s29  ;;  %s3634_s29 = sld [smem:[#allocation3 + $0x18]] }
  0xbc   :  { %6284 = sst [smem:[#allocation11_spill]] %s3578_s28  ;;  %v272_v45 = vrot.slane %v268_v39, 3  ;;  %v131_v7 = vmul.f32 %v6294_v61, %v3441_v22  ;;  %v6297_v39 = vstv %s3150_s26 }
  0xbd   :  { %v273_v37 = vrot.slane %v269_v21, 3  ;;  %v176_v0 = vrot.slane %v172_v33, 1  ;;  %6296 = sst [smem:[#allocation50_spill]] %s3624_s25  ;;  %v284_v21 = vrot.slane %v280_v31, 3  ;;  %v281_v8 = vmul.f32 %v6297_v39, %v3441_v22  ;;  %v3650_v35 = vpop.permute.xlu1 %461 }
  0xbe   :  { %v276_v17 = vadd.f32 %v272_v45, %v216_v59  ;;  %v6300_v31 = vstv %s3162_s4  ;;  %s3642_s26 = sld [smem:[#allocation3 + $0x21]]  ;;  %v361_v59 = vsel %vm340_vm3, %v3295_v56, %v3354_v43  ;;  %v229_v45 = vadd.f32 %v225_v20, %v169_v23 }
  0xbf   :  { %6290 = sst [smem:[#allocation47_spill]] %s3601_s3  ;;  %s6298_s3 = smov 112   ;;  %v277_v38 = vadd.f32 %v273_v37, %v217_v30  ;;  %v232_v1 = vmul.f32 %v6300_v31, %v3437_v25  ;;  %v3652_v30 = vpop.permute.xlu0 %463  ;;  %v180_v37 = vadd.f32 %v176_v0, %v132_v62  ;;  %v133_v61 = vadd.f32 %v131_v7, %v6293_v63 }
  0xc0   :  { %6292 = sst [smem:[#allocation49_spill]] %s3614_s22  ;;  %1896 = vrot.lane.b32.xlu1 %v3279_v48, %s6298_s3  ;;  %1913 = vrot.lane.b32.xlu0 %v3283_v50, %s6298_s3  ;;  %v342_v48 = vsel %vm340_vm3, %v3259_v36, %v3293_v55  ;;  %v288_v50 = vadd.f32 %v284_v21, %v228_v46  ;;  %v6304_v39 = vstv %s3168_s7  ;;  %v285_v55 = vrot.slane %v281_v8, 3 }
  0xc1   :  { %6299 = sst [smem:[#allocation51_spill]] %s3634_s29  ;;  %v136_v36 = vmul.f32 %v6304_v39, %v3437_v25  ;;  %v6306_v56 = vstv %s3174_s8  ;;  %v6307_v23 = vmov %v6304_v39  ;;  %v3678_v41 = vadd.f32 %v341_v18, %v276_v17 }
  0xc2   :  { %s3654_s30 = sld [smem:[#allocation3 + $0x26]]  ;;  %v184_v46 = vmul.f32 %v6306_v56, %v3437_v25  ;;  %v137_v21 = vmul.f32 %v6307_v23, %v3441_v22  ;;  %v6308_v20 = vmov %v6306_v56  ;;  %v3680_v62 = vadd.f32 %v342_v48, %v277_v38  ;;  %v3695_v38 = vpop.permute.xlu1 %465 }
  0xc3   :  { %s6303_s29 = sld [smem:[#allocation12_spill]]  ;;  %v185_v31 = vmul.f32 %v6308_v20, %v3441_v22  ;;  %v236_v0 = vrot.slane %v232_v1, 2  ;;  %v289_v63 = vadd.f32 %v285_v55, %v229_v45  ;;  %v6313_v17 = vstv %s3162_s4  ;;  %v3697_v48 = vpop.permute.xlu0 %484 }
  0xc4   :  { %6301 = sst [smem:[#allocation52_spill]] %s3642_s26  ;;  %1915 = vrot.lane.b32.xlu1 %v3286_v51, %s6298_s3  ;;  %1917 = vrot.lane.b32.xlu0 %v3288_v52, %s6298_s3  ;;  %v3687_v51 = vadd.f32 %v361_v59, %v288_v50  ;;  %v362_v52 = vsel %vm340_vm3, %v3354_v43, %v3356_v42  ;;  %v233_v18 = vmul.f32 %v6313_v17, %v3441_v22  ;;  %v6314_v50 = vstv %s3189_s12 }
  0xc5   :  { %s3661_s26 = sld [smem:[#allocation3 + $0x2f]]  ;;  %v240_v1 = vadd.f32 %v236_v0, %v180_v37  ;;  %v181_v39 = vadd.f32 %v177_v29, %v133_v61  ;;  %v142_v59 = vmul.f32 %v6314_v50, %v3437_v25  ;;  %v6315_v45 = vstv %s3192_s13 }
  0xc6   :  { %6309 = sst [smem:[#allocation54_spill]] %s3676_s27  ;;  %v196_v42 = vmul.f32 %v6315_v45, %v3437_v25  ;;  %v188_v56 = vrot.slane %v184_v46, 1  ;;  %v381_v61 = vsel %vm340_vm3, %v3394_v26, %v3396_v13  ;;  %v6320_v29 = vmov %v6314_v50  ;;  %v3739_v26 = vpop.permute.xlu1 %486 }
  0xc7   :  { %s3685_s7 = sld [smem:[#allocation3 + $0x41]]  ;;  %v6321_v46 = vmov %v6315_v45  ;;  %v6324_v0 = vstv %s3177_s9  ;;  %v3741_v45 = vpop.permute.xlu0 %488 }
  0xc8   :  { %6302 = sst [smem:[#allocation53_spill]] %s3654_s30  ;;  %1933 = vrot.lane.b32.xlu1 %v3298_v57, %s6298_s3  ;;  %1935 = vrot.lane.b32.xlu0 %v3301_v58, %s6298_s3  ;;  %v237_v57 = vrot.slane %v233_v18, 2  ;;  %v244_v17 = vmul.f32 %v6324_v0, %v3437_v25 }
  0xc9   :  { %v6311_v7 = vstv %s6303_s29  ;;  %s3699_s8 = sld [smem:[#allocation3 + $0xb2]] }
  0xca   :  { %v292_v8 = vmul.f32 %v6311_v7, %v3437_v25  ;;  %s3707_s4 = sld [smem:[#allocation3 + $0x27]]  ;;  %v189_v7 = vrot.slane %v185_v31, 1  ;;  %v6323_v31 = vstv %s6303_s29 }
  0xcb   :  { %6305 = sst [smem:[#allocation12_spill]] %s3661_s26  ;;  %v293_v58 = vmul.f32 %v6323_v31, %v3441_v22  ;;  %v241_v31 = vadd.f32 %v237_v57, %v181_v39  ;;  %v3773_v57 = vpop.permute.xlu0 %509 }
  0xcc   :  { %s6310_s26 = sld [smem:[#allocation13_spill]]  ;;  %v296_v37 = vrot.slane %v292_v8, 3  ;;  %v6325_v8 = vmov %v6324_v0  ;;  %1937 = vrot.lane.b32.xlu1 %v3332_v27, %s6298_s3  ;;  %1953 = vrot.lane.b32.xlu0 %v3304_v60, %s6298_s3 }
  0xcd   :  { %6312 = sst [smem:[#allocation13_spill]] %s3685_s7  ;;  %v245_v50 = vmul.f32 %v6325_v8, %v3441_v22  ;;  %v297_v27 = vrot.slane %v293_v58, 3 }
  0xce   :  { %s3717_s7 = sld [smem:[#allocation3 + $0x30]]  ;;  %v300_v18 = vadd.f32 %v296_v37, %v240_v1  ;;  %v6329_v1 = vstv %s3194_s14  ;;  %v3771_v37 = vpop.permute.xlu1 %507 }
  0xcf   :  { %s3743_s12 = sld [smem:[#allocation3 + $0x42]]  ;;  %v6332_v58 = vmov %v6329_v1 }
  0xd0   :  { %6316 = sst [smem:[#allocation55_spill]] %s3707_s4  ;;  %1955 = vrot.lane.b32.xlu1 %v3335_v28, %s6298_s3  ;;  %1957 = vrot.lane.b32.xlu0 %v3343_v49, %s6298_s3  ;;  %v401_v28 = vsel %vm340_vm3, %v3445_v16, %v3493_v53 }
  0xd1   :  { %s3749_s13 = sld [smem:[#allocation3 + $0x28]] }
  0xd2   :  { %v6317_v43 = vstv %s6310_s26  ;;  %s3728_s26 = sld [smem:[#allocation3 + $0x39]] }
  0xd3   :  { %v138_v55 = vadd.f32 %v136_v36, %v6317_v43  ;;  %v6318_v23 = vmov %v6317_v43  ;;  %v143_v36 = vmul.f32 %v6320_v29, %v3441_v22  ;;  %v3745_v43 = vadd.f32 %v362_v52, %v289_v63  ;;  %s3756_s9 = sld [smem:[#allocation3 + $0x31]] }
  0xd4   :  { %v139_v20 = vadd.f32 %v137_v21, %v6318_v23  ;;  %6319 = sst [smem:[#allocation56_spill]] %s3717_s7  ;;  %v197_v21 = vmul.f32 %v6321_v46, %v3441_v22  ;;  %v6327_v23 = vstv %s3184_s11  ;;  %v200_v46 = vrot.slane %v196_v42, 1  ;;  %1973 = vrot.lane.b32.xlu1 %v3346_v47, %s6298_s3  ;;  %1975 = vrot.lane.b32.xlu0 %v3349_v5, %s6298_s3 }
  0xd5   :  { %6326 = sst [smem:[#allocation58_spill]] %s3743_s12  ;;  %v144_v29 = vadd.f32 %v142_v59, %v6327_v23  ;;  %v192_v0 = vadd.f32 %v188_v56, %v138_v55  ;;  %v6328_v63 = vstv %s3179_s10  ;;  %v256_v59 = vmul.f32 %v6329_v1, %v3437_v25 }
  0xd6   :  { %v193_v8 = vadd.f32 %v189_v7, %v139_v20  ;;  %v304_v52 = vmul.f32 %v6328_v63, %v3437_v25  ;;  %v6330_v39 = vmov %v6327_v23  ;;  %v201_v55 = vrot.slane %v197_v21, 1  ;;  %s3766_s29 = sld [smem:[#allocation3 + $0x3a]] }
  0xd7   :  { %v145_v42 = vadd.f32 %v143_v36, %v6330_v39  ;;  %v248_v56 = vrot.slane %v244_v17, 2  ;;  %v249_v20 = vrot.slane %v245_v50, 2  ;;  %v6331_v60 = vmov %v6328_v63  ;;  %s3775_s12 = sld [smem:[#allocation3 + $0x43]] }
  0xd8   :  { %6322 = sst [smem:[#allocation57_spill]] %s3728_s26  ;;  %v305_v7 = vmul.f32 %v6331_v60, %v3441_v22  ;;  %v3777_v23 = vadd.f32 %v381_v61, %v300_v18  ;;  %v382_v36 = vsel %vm340_vm3, %v3396_v13, %v3443_v14  ;;  %v204_v21 = vadd.f32 %v200_v46, %v144_v29  ;;  %1977 = vrot.lane.b32.xlu1 %v3367_v32, %s6298_s3  ;;  %v6395_v61 = vld [vmem:[#allocation25_spill] sm:$0xff] }
  0xd9   :  { %v257_v17 = vmul.f32 %v6332_v58, %v3441_v22  ;;  %s3785_s11 = sld [smem:[#allocation3 + $0x29]]  ;;  %v301_v50 = vadd.f32 %v297_v27, %v241_v31  ;;  %v252_v63 = vadd.f32 %v248_v56, %v192_v0  ;;  %v253_v1 = vadd.f32 %v249_v20, %v193_v8  ;;  %v3804_v0 = vpop.permute.xlu1 %511  ;;  %v3806_v8 = vpop.permute.xlu0 %530 }
  0xda   :  { %s3792_s10 = sld [smem:[#allocation3 + $0x32]]  ;;  %v308_v14 = vrot.slane %v304_v52, 3  ;;  %v260_v13 = vrot.slane %v256_v59, 2  ;;  %v6335_v18 = vstv %s3200_s15  ;;  %v205_v46 = vadd.f32 %v201_v55, %v145_v42 }
  0xdb   :  { %v316_v29 = vmul.f32 %v6335_v18, %v3437_v25  ;;  %s3797_s14 = sld [smem:[#allocation3 + $0x3b]]  ;;  %v3799_v31 = vadd.f32 %v382_v36, %v301_v50  ;;  %v309_v49 = vrot.slane %v305_v7, 3  ;;  %v2216_v52 = vstv %s3404_s6 }
  0xdc   :  { %v402_v25 = vsel %vm340_vm3, %v3493_v53, %v3495_v3  ;;  %v264_v59 = vadd.f32 %v260_v13, %v204_v21  ;;  %v261_v39 = vrot.slane %v257_v17, 2  ;;  %v6338_v42 = vmov %v6335_v18  ;;  %s3827_s6 = sld [smem:[#allocation3 + $0x33]] }
  0xdd   :  { %v317_v55 = vmul.f32 %v6338_v42, %v3441_v22  ;;  %v312_v16 = vadd.f32 %v308_v14, %v252_v63  ;;  %v313_v27 = vadd.f32 %v309_v49, %v253_v1  ;;  %v421_v56 = vsel %vm340_vm3, %v3537_v44, %v3539_v15  ;;  %v3854_v21 = vpop.permute.xlu1 %532  ;;  %v3856_v58 = vpop.permute.xlu0 %534  ;;  %s3859_s26 = sld [smem:[#allocation3 + $0x45]]  ;;  %v6366_v42 = vld [vmem:[#allocation19_spill] sm:$0xff] }
  0xde   :  { %v2239_v53 = vstv %s3415_s16  ;;  %v320_v3 = vrot.slane %v316_v29, 3  ;;  %v265_v22 = vadd.f32 %v261_v39, %v205_v46  ;;  %s3845_s16 = sld [smem:[#allocation3 + $0x3c]]  ;;  %v422_v36 = vsel %vm340_vm3, %v3539_v15, %v3574_v11 }
  0xdf   :  { %6333 = sst [smem:[#allocation59_spill]] %s3785_s11  ;;  %v3847_v44 = vadd.f32 %v401_v28, %v312_v16  ;;  %v3849_v7 = vadd.f32 %v402_v25, %v313_v27  ;;  %v2262_v17 = vstv %s3427_s17  ;;  %v321_v63 = vrot.slane %v317_v55, 3 }
  0xe0   :  { %6334 = sst [smem:[#allocation60_spill]] %s3792_s10  ;;  %v324_v50 = vadd.f32 %v320_v3, %v264_v59  ;;  %v3861_v1 = vmul.f32 0.0, %v2216_v52  ;;  %v444_v11 = vsel %vm340_vm3, %v3576_v4, %v3610_v2  ;;  %v445_v15 = vsel %vm340_vm3, %v3610_v2, %v3612_v24 }
  0xe1   :  { %6336 = sst [smem:[#allocation61_spill]] %s3797_s14  ;;  %v6345_v13 = vrot.slane %v3320_v6, 1  ;;  %v3882_v29 = vmul.f32 0.0, %v2239_v53  ;;  %v325_v4 = vadd.f32 %v321_v63, %v265_v22  ;;  %v467_v32 = vsel %vm340_vm3, %v3650_v35, %v3652_v30  ;;  %v3896_v6 = vpop.permute.xlu1 %553  ;;  %v3898_v28 = vpop.permute.xlu0 %555 }
  0xe2   :  { %s3809_s10 = sld [smem:[#allocation3 + $0x44]]  ;;  %v3906_v25 = vstv %s3433_s18  ;;  %v3910_v59 = vadd.f32 %v421_v56, %v324_v50  ;;  %v3913_v39 = vadd.f32 %v444_v11, %v3678_v41  ;;  %v3916_v35 = vadd.f32 %v445_v15, %v3680_v62  ;;  %v6364_v41 = vld [vmem:[#allocation18_spill] sm:$0xff] }
  0xe3   :  { %s3817_s14 = sld [smem:[#allocation3 + $0x2a]]  ;;  %1996 = vrot.lane.b32.xlu0 %v6345_v13, %s6298_s3  ;;  %v3921_v55 = vadd.f32 %v422_v36, %v325_v4  ;;  %v6350_v16 = vrot.slane %v3323_v10, 1  ;;  %v6351_v27 = vrot.slane %v3325_v12, 1  ;;  %v1253_v12 = vstv %s3551_s23 }
  0xe4   :  { %6340 = sst [smem:[#allocation64_spill]] %s3827_s6  ;;  %v1313_v3 = vstv %s3561_s2  ;;  %v468_v11 = vsel %vm340_vm3, %v3652_v30, %v3695_v38  ;;  %v1223_v4 = vstv %s3541_s20  ;;  %v1373_v38 = vstv %s3567_s24 }
  0xe5   :  { %6342 = sst [smem:[#allocation65_spill]] %s3845_s16  ;;  %1998 = vrot.lane.b32.xlu1 %v6350_v16, %s6298_s3  ;;  %v3945_v22 = vpop.permute.xlu1 %557  ;;  %v3947_v36 = vpop.permute.xlu0 %576  ;;  %v6360_v16 = vrot.slane %v3341_v40, 1  ;;  %v6367_v2 = vrot.slane %v6366_v42, 1  ;;  %v513_v42 = vsel %vm340_vm3, %v3771_v37, %v3773_v57  ;;  %v514_v15 = vsel %vm340_vm3, %v3773_v57, %v3804_v0 }
  0xe6   :  { %6343 = sst [smem:[#allocation66_spill]] %s3859_s26  ;;  %v1385_v57 = vstv %s3775_s12  ;;  %v536_v0 = vsel %vm340_vm3, %v3806_v8, %v3854_v21 }
  0xe7   :  { %s3866_s11 = sld [smem:[#allocation3 + $0x4a]]  ;;  %2000 = vrot.lane.b32.xlu0 %v6351_v27, %s6298_s3 }
  0xe8   :  { %6337 = sst [smem:[#allocation62_spill]] %s3809_s10 }
  0xe9   :  { %6339 = sst [smem:[#allocation63_spill]] %s3817_s14  ;;  %v3991_v56 = vpop.permute.xlu1 %578  ;;  %v3993_v62 = vpop.permute.xlu0 %580 }
  0xea   :  { %s6341_s10 = sld [smem:[#allocation109_spill]] }
  0xeb   :  { %s3884_s17 = sld [smem:[#allocation3 + $0x53]]  ;;  %2021 = vrot.lane.b32.xlu0 %v6360_v16, %s6298_s3  ;;  %v3986_v16 = vadd.f32 %v468_v11, %v3745_v43  ;;  %v1325_v11 = vstv %s3766_s29 }
  0xec   :  { %s3908_s14 = sld [smem:[#allocation3 + $0x65]] }
  0xed   :  { %6344 = sst [smem:[#allocation67_spill]] %s3866_s11 }
  0xee   :  { %s3919_s15 = sld [smem:[#allocation3 + $0x4b]] }
  0xef   :  { %s3961_s2 = sld [smem:[#allocation3 + $0x4c]]  ;;  %2042 = vrot.lane.b32.xlu0 %v6367_v2, %s6298_s3  ;;  %v4034_v2 = vstv %s3699_s8 }
  0xf0   :  { %v3832_v20 = vld [vmem:[%s6341_s10] sm:$0xff]  ;;  %v3840_v47 = vld [vmem:[%s6341_s10 + $0x8] sm:$0xff]  ;;  %s3891_s10 = sld [smem:[#allocation3 + $0x5c]] }
  0xf1   :  { %v3835_v60 = vmul.f32 %v3832_v20, %v2216_v52  ;;  %v3843_v5 = vmul.f32 %v3840_v47, %v2216_v52  ;;  %v3864_v14 = vmul.f32 %v3832_v20, %v2239_v53  ;;  %v3880_v18 = vmul.f32 %v3840_v47, %v2239_v53  ;;  %6346 = sst [smem:[#allocation68_spill]] %s3884_s17 }
  0xf2   :  { %v3889_v24 = vmul.f32 %v3832_v20, %v2262_v17  ;;  %v3901_v49 = vmul.f32 %v3840_v47, %v2262_v17  ;;  %v3903_v52 = vmul.f32 0.0, %v2262_v17  ;;  %6348 = sst [smem:[#allocation70_spill]] %s3908_s14  ;;  %v3935_v53 = vadd.f32 %v467_v32, %v3687_v51 }
  0xf3   :  { %v3939_v10 = vmul.f32 %v3832_v20, %v3906_v25  ;;  %s3953_s17 = sld [smem:[#allocation3 + $0x66]]  ;;  %v6359_v32 = vrot.slane %v3338_v34, 1  ;;  %v3971_v51 = vmul.f32 %v3832_v20, %v1253_v12  ;;  %v3974_v30 = vmul.f32 %v3832_v20, %v1313_v3 }
  0xf4   :  { %6349 = sst [smem:[#allocation71_spill]] %s3919_s15  ;;  %v490_v17 = vsel %vm340_vm3, %v3697_v48, %v3739_v26  ;;  %v3997_v34 = vmul.f32 %v3832_v20, %v1223_v4  ;;  %v4002_v40 = vmul.f32 %v3832_v20, %v1373_v38  ;;  %v491_v48 = vsel %vm340_vm3, %v3739_v26, %v3741_v45 }
  0xf5   :  { %s3932_s15 = sld [smem:[#allocation3 + $0x54]]  ;;  %2019 = vrot.lane.b32.xlu1 %v6359_v32, %s6298_s3  ;;  %v6365_v32 = vrot.slane %v6364_v41, 1  ;;  %v4024_v50 = vadd.f32 %v490_v17, %v3777_v23  ;;  %v4028_v26 = vmul.f32 %v3840_v47, %v3906_v25  ;;  %v4031_v45 = vmul.f32 0.0, %v3906_v25  ;;  %v4041_v41 = vpop.permute.xlu1 %599  ;;  %v4043_v23 = vpop.permute.xlu0 %601 }
  0xf6   :  { %6347 = sst [smem:[#allocation69_spill]] %s3891_s10  ;;  %v4046_v17 = vmul.f32 %v3840_v47, %v1253_v12  ;;  %v4049_v25 = vmul.f32 %v3840_v47, %v1313_v3  ;;  %v4057_v43 = vadd.f32 %v491_v48, %v3799_v31  ;;  %v6375_v12 = vld [vmem:[#allocation20_spill] sm:$0xff]  ;;  %v6377_v3 = vld [vmem:[#allocation21_spill] sm:$0xff]  ;;  %v4073_v31 = vmul.f32 %v3840_v47, %v1223_v4 }
  0xf7   :  { %s3943_s10 = sld [smem:[#allocation3 + $0x5d]]  ;;  %v6376_v27 = vrot.slane %v6375_v12, 1  ;;  %v6378_v13 = vrot.slane %v6377_v3, 1  ;;  %v4077_v48 = vmul.f32 %v3832_v20, %v4034_v2  ;;  %v4088_v4 = vmul.f32 %v3840_v47, %v4034_v2 }
  0xf8   :  { %s3977_s20 = sld [smem:[#allocation3 + $0x55]]  ;;  %6372 = vst [vmem:[#allocation18_spill] sm:$0xff] %v4049_v25  ;;  %v1229_v25 = vstv %s3749_s13  ;;  %v4137_v33 = vmul.f32 %v3832_v20, %v1325_v11 }
  0xf9   :  { %6357 = sst [smem:[#allocation74_spill]] %s3953_s17  ;;  %2023 = vrot.lane.b32.xlu1 %v6365_v32, %s6298_s3  ;;  %v4052_v32 = vmul.f32 %v3840_v47, %v1373_v38  ;;  %2046 = vrot.lane.b32.xlu0 %v6378_v13, %s6298_s3  ;;  %6380 = vst [vmem:[#allocation20_spill] sm:$0xff] %v4088_v4  ;;  %v604_v3 = vpop.permute.xlu1 %603  ;;  %v623_v37 = vpop.permute.xlu0 %622  ;;  %v1265_v38 = vstv %s3756_s9  ;;  %v6396_v4 = vrot.slane %v6395_v61, 1  ;;  %v4176_v61 = vmul.f32 %v3832_v20, %v1229_v25 }
  0xfa   :  { %s3983_s18 = sld [smem:[#allocation3 + $0x5e]]  ;;  %v4100_v12 = vsel %vm340_vm3, %v4043_v23, %v604_v3  ;;  %6390 = vst [vmem:[#allocation21_spill] sm:$0xff] %v4137_v33  ;;  %v4142_v3 = vadd.f32 %v514_v15, %v3849_v7  ;;  %v4197_v15 = vmul.f32 %v3840_v47, %v1325_v11  ;;  %v6406_v7 = vld [vmem:[#allocation26_spill] sm:$0xff]  ;;  %v560_v11 = vsel %vm340_vm3, %v3898_v28, %v3945_v22  ;;  %v6417_v33 = vld [vmem:[#allocation28_spill] sm:$0xff] }
  0xfb   :  { %6353 = sst [smem:[#allocation72_spill]] %s3932_s15  ;;  %6373 = vst [vmem:[#allocation19_spill] sm:$0xff] %v4052_v32 }
  0xfc   :  { %s3999_s24 = sld [smem:[#allocation3 + $0x67]] }
  0xfd   :  { %6355 = sst [smem:[#allocation73_spill]] %s3943_s10  ;;  %2044 = vrot.lane.b32.xlu1 %v6376_v27, %s6298_s3  ;;  %v4082_v27 = vadd.f32 %v513_v42, %v3847_v44  ;;  %v6384_v44 = vld [vmem:[#allocation22_spill] sm:$0xff]  ;;  %v6386_v42 = vld [vmem:[#allocation23_spill] sm:$0xff] }
  0xfe   :  { %s4007_s23 = sld [smem:[#allocation3 + $0x4d]]  ;;  %v6385_v46 = vrot.slane %v6384_v44, 1  ;;  %v6387_v63 = vrot.slane %v6386_v42, 1  ;;  %v627_v44 = vpop.permute.xlu0 %626  ;;  %v4134_v42 = vmul.f32 %v3832_v20, %v1265_v38  ;;  %6405 = vst [vmem:[#allocation23_spill] sm:$0xff] %v4197_v15 }
  0xff   :  { %s4021_s28 = sld [smem:[#allocation3 + $0x56]] }
 0x100   :  { %s4036_s5 = sld [smem:[#allocation3 + $0x5f]]  ;;  %2067 = vrot.lane.b32.xlu0 %v6387_v63, %s6298_s3  ;;  %v625_v63 = vpop.permute.xlu1 %624  ;;  %v1337_v15 = vstv %s3983_s18 }
 0x101   :  { %s4054_s8 = sld [smem:[#allocation3 + $0x68]]  ;;  %2065 = vrot.lane.b32.xlu1 %v6385_v46, %s6298_s3  ;;  %v537_v46 = vsel %vm340_vm3, %v3854_v21, %v3856_v58  ;;  %v4145_v8 = vsel %vm340_vm3, %v623_v37, %v625_v63  ;;  %v4148_v32 = vsel %vm340_vm3, %v625_v63, %v627_v44  ;;  %v6393_v58 = vld [vmem:[#allocation24_spill] sm:$0xff]  ;;  %v4162_v37 = vmul.f32 %v3832_v20, %v1385_v57 }
 0x102   :  { %s4062_s19 = sld [smem:[#allocation3 + $0x4e]]  ;;  %v6394_v13 = vrot.slane %v6393_v58, 1  ;;  %v4165_v63 = vmul.f32 0.0, %v4034_v2  ;;  %v4170_v44 = vadd.f32 %v536_v0, %v3910_v59  ;;  %v648_v2 = vpop.permute.xlu0 %647  ;;  %v4185_v59 = vmul.f32 %v3840_v47, %v1265_v38 }
 0x103   :  { %s4079_s25 = sld [smem:[#allocation3 + $0x57]]  ;;  %v6407_v38 = vrot.slane %v6406_v7, 1  ;;  %v6419_v7 = vld [vmem:[#allocation29_spill] sm:$0xff] }
 0x104   :  { %6363 = sst [smem:[#allocation75_spill]] %s4007_s23  ;;  %2088 = vrot.lane.b32.xlu0 %v6396_v4, %s6298_s3  ;;  %v646_v58 = vpop.permute.xlu1 %645  ;;  %6403 = vst [vmem:[#allocation22_spill] sm:$0xff] %v4185_v59  ;;  %v6408_v4 = vld [vmem:[#allocation27_spill] sm:$0xff] }
 0x105   :  { %6368 = sst [smem:[#allocation76_spill]] %s4021_s28  ;;  %2069 = vrot.lane.b32.xlu1 %v6394_v13, %s6298_s3  ;;  %v4173_v13 = vadd.f32 %v537_v46, %v3921_v55  ;;  %v559_v55 = vsel %vm340_vm3, %v3896_v6, %v3898_v28  ;;  %v4193_v0 = vsel %vm340_vm3, %v646_v58, %v648_v2  ;;  %v6409_v21 = vrot.slane %v6408_v4, 1 }
 0x106   :  { %6370 = sst [smem:[#allocation77_spill]] %s4036_s5  ;;  %v4211_v46 = vmul.f32 %v3840_v47, %v1385_v57  ;;  %v4221_v4 = vmul.f32 %v3840_v47, %v1229_v25  ;;  %v669_v6 = vpop.permute.xlu0 %668  ;;  %v4242_v58 = vadd.f32 %v560_v11, %v3916_v35  ;;  %v6420_v28 = vrot.slane %v6419_v7, 2 }
 0x107   :  { %6374 = sst [smem:[#allocation78_spill]] %s4054_s8  ;;  %v1397_v35 = vstv %s3999_s24  ;;  %v583_v11 = vsel %vm340_vm3, %v3991_v56, %v3993_v62  ;;  %v605_v7 = vsel %vm340_vm3, %v4041_v41, %v4043_v23  ;;  %v6427_v23 = vld [vmem:[#allocation31_spill] sm:$0xff] }
 0x108   :  { %s4090_s14 = sld [smem:[#allocation3 + $0x60]]  ;;  %2092 = vrot.lane.b32.xlu0 %v6409_v21, %s6298_s3  ;;  %6410 = vst [vmem:[#allocation24_spill] sm:$0xff] %v4211_v46  ;;  %6412 = vst [vmem:[#allocation25_spill] sm:$0xff] %v4221_v4  ;;  %v4226_v21 = vadd.f32 %v559_v55, %v3913_v39  ;;  %v650_v57 = vpop.permute.xlu1 %649  ;;  %v1277_v39 = vstv %s3977_s20 }
 0x109   :  { %s4096_s15 = sld [smem:[#allocation3 + $0x69]]  ;;  %2090 = vrot.lane.b32.xlu1 %v6407_v38, %s6298_s3  ;;  %v4234_v22 = vsel %vm340_vm3, %v648_v2, %v650_v57  ;;  %v6418_v38 = vrot.slane %v6417_v33, 2  ;;  %v582_v33 = vsel %vm340_vm3, %v3947_v36, %v3991_v56  ;;  %v1235_v2 = vstv %s3961_s2  ;;  %v6425_v56 = vld [vmem:[#allocation30_spill] sm:$0xff] }
 0x10a   :  { %s4105_s21 = sld [smem:[#allocation3 + $0x6e]]  ;;  %v4280_v36 = vmul.f32 %v3832_v20, %v1277_v39  ;;  %v4283_v62 = vmul.f32 %v3840_v47, %v1277_v39  ;;  %v6426_v41 = vrot.slane %v6425_v56, 2  ;;  %v4301_v39 = vmul.f32 %v3840_v47, %v1337_v15 }
 0x10b   :  { %s4119_s9 = sld [smem:[#allocation3 + $0x77]]  ;;  %v4306_v56 = vadd.f32 %v582_v33, %v3935_v53  ;;  %v609_v57 = vadd.f32 %v605_v7, %v4024_v50  ;;  %v4320_v4 = vmul.f32 %v3832_v20, %v1235_v2  ;;  %v4323_v53 = vmul.f32 %v3840_v47, %v1235_v2  ;;  %v6435_v2 = vld [vmem:[#allocation33_spill] sm:$0xff]  ;;  %v6442_v33 = vld [vmem:[#allocation35_spill] sm:$0xff] }
 0x10c   :  { %s4125_s22 = sld [smem:[#allocation3 + $0x80]]  ;;  %2113 = vrot.lane.b32.xlu0 %v6420_v28, %s6298_s3  ;;  %v673_v28 = vpop.permute.xlu0 %672  ;;  %6423 = vst [vmem:[#allocation26_spill] sm:$0xff] %v4283_v62  ;;  %6429 = vst [vmem:[#allocation27_spill] sm:$0xff] %v4301_v39  ;;  %v6436_v59 = vrot.slane %v6435_v2, 2  ;;  %v4372_v39 = vadd.f32 %v4148_v32, %v4142_v3  ;;  %v6443_v50 = vrot.slane %v6442_v33, 2 }
 0x10d   :  { %s4139_s12 = sld [smem:[#allocation3 + $0x89]]  ;;  %2111 = vrot.lane.b32.xlu1 %v6418_v38, %s6298_s3  ;;  %v671_v38 = vpop.permute.xlu1 %670  ;;  %6432 = vst [vmem:[#allocation29_spill] sm:$0xff] %v4323_v53  ;;  %v6451_v53 = vld [vmem:[#allocation39_spill] sm:$0xff] }
 0x10e   :  { %s4151_s4 = sld [smem:[#allocation3 + $0x6f]]  ;;  %v4274_v25 = vsel %vm340_vm3, %v669_v6, %v671_v38  ;;  %v4277_v55 = vsel %vm340_vm3, %v671_v38, %v673_v28  ;;  %v6428_v6 = vrot.slane %v6427_v23, 2  ;;  %v4295_v38 = vmul.f32 %v3832_v20, %v1337_v15 }
 0x10f   :  { %6382 = sst [smem:[#allocation79_spill]] %s4096_s15  ;;  %v4298_v28 = vmul.f32 %v3832_v20, %v1397_v35  ;;  %v632_v23 = vadd.f32 %v4145_v8, %v4082_v27  ;;  %v4386_v27 = vadd.f32 %v4193_v0, %v4170_v44 }
 0x110   :  { %6383 = sst [smem:[#allocation80_spill]] %s4105_s21  ;;  %2134 = vrot.lane.b32.xlu0 %v6428_v6, %s6298_s3  ;;  %v4313_v6 = vmul.f32 %v3840_v47, %v1397_v35  ;;  %v694_v46 = vpop.permute.xlu0 %693 }
 0x111   :  { %s4167_s27 = sld [smem:[#allocation3 + $0x78]]  ;;  %2115 = vrot.lane.b32.xlu1 %v6426_v41, %s6298_s3  ;;  %v4309_v41 = vadd.f32 %v583_v11, %v3986_v16  ;;  %v692_v15 = vpop.permute.xlu1 %691  ;;  %v6433_v11 = vld [vmem:[#allocation32_spill] sm:$0xff] }
 0x112   :  { %s4179_s30 = sld [smem:[#allocation3 + $0x81]]  ;;  %6431 = vst [vmem:[#allocation28_spill] sm:$0xff] %v4313_v6  ;;  %v4328_v16 = vsel %vm340_vm3, %v692_v15, %v694_v46  ;;  %v6434_v7 = vrot.slane %v6433_v11, 2  ;;  %v610_v11 = vadd.f32 %v4100_v12, %v4057_v43  ;;  %v4413_v6 = vadd.f32 %v4234_v22, %v4173_v13 }
 0x113   :  { %s4199_s13 = sld [smem:[#allocation3 + $0x70]]  ;;  %v4430_v13 = vadd.f32 %v4274_v25, %v4226_v21  ;;  %v4434_v22 = vadd.f32 %v4277_v55, %v4242_v58  ;;  %v6459_v21 = vld [vmem:[#allocation42_spill] sm:$0xff] }
 0x114   :  { %6392 = sst [smem:[#allocation81_spill]] %s4151_s4  ;;  %2138 = vrot.lane.b32.xlu0 %v6436_v59, %s6298_s3  ;;  %v715_v35 = vpop.permute.xlu0 %714 }
 0x115   :  { %s4213_s7 = sld [smem:[#allocation3 + $0x79]]  ;;  %2136 = vrot.lane.b32.xlu1 %v6434_v7, %s6298_s3  ;;  %v696_v15 = vpop.permute.xlu1 %695 }
 0x116   :  { %s6413_s0 = sld [smem:[#allocation69_spill]]  ;;  %v4361_v43 = vsel %vm340_vm3, %v694_v46, %v696_v15  ;;  %v6444_v46 = vld [vmem:[#allocation38_spill] sm:$0xff] }
 0x117   :  { %6399 = sst [smem:[#allocation82_spill]] %s4167_s27  ;;  %v6445_v15 = vrot.slane %v6444_v46, 2 }
 0x118   :  { %6400 = sst [smem:[#allocation83_spill]] %s4179_s30 }
 0x119   :  { %s4187_s27 = sld [smem:[#allocation3 + $0x8a]]  ;;  %2157 = vrot.lane.b32.xlu1 %v6443_v50, %s6298_s3  ;;  %2159 = vrot.lane.b32.xlu0 %v6445_v15, %s6298_s3  ;;  %v717_v33 = vpop.permute.xlu1 %716  ;;  %v719_v50 = vpop.permute.xlu0 %718  ;;  %v1241_v46 = vstv %s4199_s13 }
 0x11a   :  { %s6414_s29 = sld [smem:[#allocation70_spill]]  ;;  %v720_v44 = vsel %vm340_vm3, %v715_v35, %v717_v33  ;;  %v721_v0 = vsel %vm340_vm3, %v717_v33, %v719_v50  ;;  %v6452_v35 = vrot.slane %v6451_v53, 2  ;;  %v6453_v33 = vld [vmem:[#allocation41_spill] sm:$0xff] }
 0x11b   :  { %s4231_s16 = sld [smem:[#allocation3 + $0x8b]]  ;;  %v1289_v59 = vstv %s4213_s7  ;;  %v4415_v8 = vadd.f32 %v720_v44, %v609_v57  ;;  %v4417_v62 = vadd.f32 %v721_v0, %v610_v11  ;;  %v6454_v50 = vrot.slane %v6453_v33, 2 }
 0x11c   :  { %s4239_s6 = sld [smem:[#allocation3 + $0x71]]  ;;  %v4396_v15 = vmul.f32 %v3832_v20, %v1289_v59  ;;  %v4437_v57 = vmul.f32 %v3832_v20, %v1241_v46  ;;  %v4440_v53 = vmul.f32 %v3840_v47, %v1289_v59  ;;  %v4456_v33 = vmul.f32 %v3840_v47, %v1241_v46 }
 0x11d   :  { %s4253_s11 = sld [smem:[#allocation3 + $0x7a]]  ;;  %2161 = vrot.lane.b32.xlu1 %v6452_v35, %s6298_s3  ;;  %2180 = vrot.lane.b32.xlu0 %v6454_v50, %s6298_s3  ;;  %v738_v11 = vpop.permute.xlu1 %737  ;;  %v740_v44 = vpop.permute.xlu0 %739  ;;  %v4462_v50 = vadd.f32 %v4328_v16, %v4306_v56  ;;  %v6460_v0 = vrot.slane %v6459_v21, 2  ;;  %v6465_v56 = vld [vmem:[#allocation14_spill] sm:$0xff]  ;;  %v6467_v16 = vmov 0  ;;  %v6474_v46 = vrot.slane %v3604_v54, 2 }
 0x11e   :  { %s6421_s1 = sld [smem:[#allocation72_spill]]  ;;  %6455 = vst [vmem:[#allocation30_spill] sm:$0xff] %v4440_v53  ;;  %v743_v58 = vsel %vm340_vm3, %v738_v11, %v740_v44  ;;  %6457 = vst [vmem:[#allocation32_spill] sm:$0xff] %v4456_v33  ;;  %v6461_v11 = vld [vmem:[#allocation43_spill] sm:$0xff] }
 0x11f   :  { %6404 = sst [smem:[#allocation84_spill]] %s4187_s27  ;;  %v6462_v55 = vrot.slane %v6461_v11, 2 }
 0x120   :  { %s4223_s27 = sld [smem:[#allocation3 + $0x82]] }
 0x121   :  { %s4259_s26 = sld [smem:[#allocation3 + $0x83]]  ;;  %v1409_v7 = vstv %s4231_s16  ;;  %2182 = vrot.lane.b32.xlu1 %v6460_v0, %s6298_s3  ;;  %2184 = vrot.lane.b32.xlu0 %v6462_v55, %s6298_s3  ;;  %v742_v11 = vpop.permute.xlu1 %741 }
 0x122   :  { %6416 = sst [smem:[#allocation69_spill]] %s4239_s6  ;;  %v4407_v32 = vmul.f32 %v3832_v20, %v1409_v7  ;;  %v4474_v25 = vmul.f32 %v3840_v47, %v1409_v7  ;;  %v4492_v7 = vadd.f32 %v4361_v43, %v4309_v41  ;;  %v744_v55 = vsel %vm340_vm3, %v740_v44, %v742_v11 }
 0x123   :  { %s4271_s18 = sld [smem:[#allocation3 + $0x8c]]  ;;  %v4506_v41 = vadd.f32 %v744_v55, %v4372_v39  ;;  %v6473_v43 = vrot.slane %v3599_v19, 2  ;;  %v6478_v39 = vmov 0 }
 0x124   :  { %s4285_s20 = sld [smem:[#allocation3 + $0x72]]  ;;  %6463 = vst [vmem:[#allocation33_spill] sm:$0xff] %v4474_v25 }
 0x125   :  { %s4303_s2 = sld [smem:[#allocation3 + $0x7b]]  ;;  %2203 = vrot.lane.b32.xlu1 %v6473_v43, %s6298_s3  ;;  %2205 = vrot.lane.b32.xlu0 %v6474_v46, %s6298_s3  ;;  %v763_v54 = vpop.permute.xlu1 %762 }
 0x126   :  { %s4315_s24 = sld [smem:[#allocation3 + $0x84]]  ;;  %v1349_v2 = vstv %s4223_s27 }
 0x127   :  { %6422 = sst [smem:[#allocation70_spill]] %s4259_s26  ;;  %v4399_v12 = vmul.f32 %v3832_v20, %v1349_v2  ;;  %v4448_v35 = vmul.f32 %v3840_v47, %v1349_v2  ;;  %v4464_v2 = vadd.f32 %v743_v58, %v632_v23  ;;  %v6466_v23 = vand.u32 15, %v6465_v56  ;;  %v761_v56 = vpop.permute.xlu0 %760  ;;  %v6476_v58 = vld [vmem:[#allocation15_spill] sm:$0xff] }
 0x128   :  { %s4325_s30 = sld [smem:[#allocation3 + $0x8d]] }
 0x129   :  { %s4333_s17 = sld [smem:[#allocation3 + $0x92]]  ;;  %6456 = vst [vmem:[#allocation31_spill] sm:$0xff] %v4448_v35  ;;  %vm4480_vm5 = vcmp.lt.s32.totalorder %v6466_v23, 15  ;;  %v6477_v23 = vand.u32 15, %v6476_v58 }
 0x12a   :  { %6424 = sst [smem:[#allocation72_spill]] %s4285_s20  ;;  %v6468_v16 = vsel %vm4480_vm5, 4294967295, %v6467_v16 }
 0x12b   :  { %6430 = sst [smem:[#allocation85_spill]] %s4303_s2  ;;  %6469 = vst [vmem:[#allocation35_spill] sm:$0xff] %v6468_v16  ;;  %vm4521_vm6 = vcmp.lt.s32.totalorder %v6477_v23, 15  ;;  %v765_v46 = vpop.permute.xlu0 %764  ;;  %v766_v23 = vsel %vm340_vm3, %v761_v56, %v763_v54 }
 0x12c   :  { %s4345_s23 = sld [smem:[#allocation3 + $0x9b]]  ;;  %v6479_v39 = vsel %vm4521_vm6, 4294967295, %v6478_v39  ;;  %v767_v43 = vsel %vm340_vm3, %v763_v54, %v765_v46  ;;  %v4550_v44 = vadd.f32 %v766_v23, %v4386_v27  ;;  %v777_v46 = vpop.permute.xlu1 %776 }
 0x12d   :  { %s4352_s10 = sld [smem:[#allocation3 + $0xa4]]  ;;  %6480 = vst [vmem:[#allocation38_spill] sm:$0xff] %v6479_v39  ;;  %v4553_v35 = vadd.f32 %v767_v43, %v4413_v6 }
 0x12e   :  { %s4358_s28 = sld [smem:[#allocation3 + $0xad]]  ;;  %6487 = vst [vmem:[#allocation14_spill] sm:$0xff] %v4550_v44 }
 0x12f   :  { %s4366_s5 = sld [smem:[#allocation3 + $0x93]]  ;;  %6488 = vst [vmem:[#allocation15_spill] sm:$0xff] %v4553_v35  ;;  %v779_v23 = vpop.permute.xlu0 %778 }
 0x130   :  { %s4382_s7 = sld [smem:[#allocation3 + $0x9c]]  ;;  %v783_v6 = vsel %vm782_vm4, %v777_v46, %v779_v23 }
 0x131   :  { %s4391_s21 = sld [smem:[#allocation3 + $0xa5]] }
 0x132   :  { %6437 = sst [smem:[#allocation86_spill]] %s4345_s23 }
 0x133   :  { %6438 = sst [smem:[#allocation87_spill]] %s4352_s10 }
 0x134   :  { %6439 = sst [smem:[#allocation88_spill]] %s4358_s28 }
 0x135   :  { %6441 = sst [smem:[#allocation89_spill]] %s4366_s5 }
 0x136   :  { %6447 = sst [smem:[#allocation90_spill]] %s4382_s7 }
 0x137   :  { %6448 = sst [smem:[#allocation91_spill]] %s4391_s21 }
 0x138   :  { %s4401_s16 = sld [smem:[#allocation3 + $0xae]] }
 0x139   :  { %s4409_s4 = sld [smem:[#allocation3 + $0x94]] }
 0x13a   :  { %s4426_s13 = sld [smem:[#allocation3 + $0x9d]] }
 0x13b   :  { %s4442_s27 = sld [smem:[#allocation3 + $0xa6]] }
 0x13c   :  { %s4450_s15 = sld [smem:[#allocation3 + $0xaf]] }
 0x13d   :  { %s4458_s8 = sld [smem:[#allocation3 + $0x95]] }
 0x13e   :  { %6450 = sst [smem:[#allocation92_spill]] %s4401_s16 }
 0x13f   :  { %s4476_s6 = sld [smem:[#allocation3 + $0x9e]]  ;;  %v1247_v11 = vstv %s4409_s4  ;;  %s3006_s4 = smov 111  }
 0x140   :  { %s4488_s26 = sld [smem:[#allocation3 + $0xa7]]  ;;  %v1301_v59 = vstv %s4426_s13  ;;  %2330 = vrot.lane.b32.xlu0 %v3832_v20, %s3006_s4  ;;  %v4564_v27 = vmul.f32 %v3832_v20, %v1247_v11 }
 0x141   :  { %s4497_s20 = sld [smem:[#allocation3 + $0xb0]]  ;;  %v1361_v0 = vstv %s4442_s27  ;;  %v4529_v3 = vmul.f32 %v3832_v20, %v1301_v59  ;;  %v4539_v58 = vmul.f32 %v3840_v47, %v1301_v59  ;;  %v6489_v59 = vrot.slane %v3606_v9, 2 }
 0x142   :  { %s4503_s2 = sld [smem:[#allocation3 + $0x96]]  ;;  %v1421_v21 = vstv %s4450_s15  ;;  %v4536_v25 = vmul.f32 %v3832_v20, %v1361_v0  ;;  %v4561_v54 = vmul.f32 %v3840_v47, %v1361_v0  ;;  %6491 = vst [vmem:[#allocation102_spill] sm:$0xff] %v4564_v27  ;;  %v4569_v9 = vmul.f32 %v3840_v47, %v1247_v11 }
 0x143   :  { %6458 = sst [smem:[#allocation93_spill]] %s4458_s8  ;;  %6481 = vst [vmem:[#allocation39_spill] sm:$0xff] %v4529_v3  ;;  %6484 = vst [vmem:[#allocation42_spill] sm:$0xff] %v4539_v58  ;;  %v4545_v19 = vmul.f32 %v3832_v20, %v1421_v21  ;;  %2207 = vrot.lane.b32.xlu1 %v6489_v59, %s6298_s3  ;;  %v4575_v20 = vmul.f32 %v3840_v47, %v1421_v21  ;;  %v4583_v59 = vsel %vm4480_vm5, %v783_v6, 0.0  ;;  %v6500_v0 = vmov 0.0  }
 0x144   :  { %s4517_s27 = sld [smem:[#allocation3 + $0x9f]]  ;;  %6483 = vst [vmem:[#allocation41_spill] sm:$0xff] %v4536_v25  ;;  %6490 = vst [vmem:[#allocation101_spill] sm:$0xff] %v4561_v54  ;;  %2334 = vrot.lane.b32.xlu0 %v6500_v0, %s3006_s4  ;;  %v1000_v25 = vpop.permute.xlu0 %999 }
 0x145   :  { %6464 = sst [smem:[#allocation94_spill]] %s4476_s6  ;;  %6485 = vst [vmem:[#allocation43_spill] sm:$0xff] %v4545_v19  ;;  %6492 = vst [vmem:[#allocation103_spill] sm:$0xff] %v4569_v9 }
 0x146   :  { %6470 = sst [smem:[#allocation95_spill]] %s4488_s26  ;;  %6496 = vst [vmem:[#allocation104_spill] sm:$0xff] %v4575_v20 }
 0x147   :  { %6471 = sst [smem:[#allocation96_spill]] %s4497_s20  ;;  %2332 = vrot.lane.b32.xlu1 %v3840_v47, %s3006_s4  ;;  %v781_v47 = vpop.permute.xlu1 %780 }
 0x148   :  { %6472 = sst [smem:[#allocation97_spill]] %s4503_s2  ;;  %v784_v3 = vsel %vm782_vm4, %v779_v23, %v781_v47  ;;  %v1004_v35 = vpop.permute.xlu0 %1003 }
 0x149   :  { %s4531_s13 = sld [smem:[#allocation3 + $0xa8]] }
 0x14a   :  { %6475 = sst [smem:[#allocation98_spill]] %s4517_s27 }
 0x14b   :  { %s4547_s15 = sld [smem:[#allocation3 + $0xb1]] }
 0x14c   :  { %s6493_s21 = sld [smem:[#allocation10_spill]] }
 0x14d   :  { %s6494_s16 = sld [smem:[#allocation34_spill]] }
 0x14e   :  { %s6495_s5 = sld [smem:[#allocation36_spill]] }
 0x14f   :  { %6482 = sst [smem:[#allocation99_spill]] %s4531_s13 }
 0x150   :  { %s6497_s8 = sld [smem:[#allocation37_spill]] }
 0x151   :  { %6486 = sst [smem:[#allocation100_spill]] %s4547_s15 }
 0x152   :  { %s6498_s7 = sld [smem:[#allocation53_spill]]  ;;  %v6501_v11 = vstv %s6493_s21 }
 0x153   :  { %s6499_s28 = sld [smem:[#allocation12_spill]]  ;;  %v791_v43 = vmul.f32 %v6501_v11, %v4583_v59  ;;  %v6502_v55 = vstv %s6494_s16  ;;  %v6513_v20 = vstv %s6494_s16 }
 0x154   :  { %v821_v58 = vmul.f32 %v6502_v55, %v4583_v59  ;;  %v6503_v9 = vstv %s6495_s5  ;;  %s6504_s20 = sld [smem:[#allocation54_spill]] }
 0x155   :  { %v881_v6 = vmul.f32 %v6503_v9, %v4583_v59  ;;  %v793_v9 = vadd.f32 %v791_v43, %v4430_v13  ;;  %s6508_s4 = sld [smem:[#allocation13_spill]] }
 0x156   :  { %v6505_v0 = vstv %s6497_s8  ;;  %v825_v19 = vrot.slane %v821_v58, 1  ;;  %s6515_s15 = sld [smem:[#allocation9_spill]] }
 0x157   :  { %v941_v21 = vmul.f32 %v6505_v0, %v4583_v59  ;;  %v4615_v0 = vsel %vm4521_vm6, %v784_v3, 0.0  ;;  %v885_v55 = vrot.slane %v881_v6, 2  ;;  %v6512_v3 = vstv %s6493_s21  ;;  %s6516_s13 = sld [smem:[#allocation40_spill]] }
 0x158   :  { %v6506_v56 = vstv %s6498_s7  ;;  %v829_v43 = vadd.f32 %v825_v19, %v793_v9  ;;  %v792_v27 = vmul.f32 %v6512_v3, %v4615_v0  ;;  %s6518_s2 = sld [smem:[#allocation44_spill]] }
 0x159   :  { %v797_v46 = vmul.f32 %v6506_v56, %v4583_v59  ;;  %v6507_v54 = vstv %s6499_s28  ;;  %v6509_v56 = vrot.slane %v3835_v60, 3  ;;  %v822_v60 = vmul.f32 %v6513_v20, %v4615_v0  ;;  %s6523_s21 = sld [smem:[#allocation45_spill]] }
 0x15a   :  { %v833_v11 = vmul.f32 %v6507_v54, %v4583_v59  ;;  %v6510_v54 = vrot.slane %v3843_v5, 3  ;;  %v6511_v13 = vstv %s6504_s20  ;;  %v945_v5 = vrot.slane %v941_v21, 3  ;;  %s6530_s16 = sld [smem:[#allocation48_spill]] }
 0x15b   :  { %2226 = vrot.lane.b32.xlu1 %v6509_v56, %s6298_s3  ;;  %v799_v23 = vadd.f32 %v797_v46, %v4462_v50  ;;  %v4627_v58 = vmul.f32 %v6511_v13, %v4583_v59  ;;  %v1002_v56 = vpop.permute.xlu1 %1001  ;;  %v6517_v19 = vstv %s6508_s4  ;;  %v889_v9 = vadd.f32 %v885_v55, %v829_v43  ;;  %s6534_s27 = sld [smem:[#allocation11_spill]] }
 0x15c   :  { %2228 = vrot.lane.b32.xlu0 %v6510_v54, %s6298_s3  ;;  %v837_v47 = vrot.slane %v833_v11, 1  ;;  %v6514_v54 = vstv %s6495_s5  ;;  %v4643_v6 = vmul.f32 %v6517_v19, %v4583_v59  ;;  %v1006_v11 = vsel %vm1005_vm7, %v1000_v25, %v1002_v56  ;;  %s6528_s5 = sld [smem:[#allocation46_spill]] }
 0x15d   :  { %v882_v50 = vmul.f32 %v6514_v54, %v4615_v0  ;;  %v1007_v20 = vsel %vm1005_vm7, %v1002_v56, %v1004_v35  ;;  %v794_v13 = vadd.f32 %v792_v27, %v4434_v22  ;;  %v4650_v3 = vsel %vm3309_vm1, %v1006_v11, 0.0  ;;  %s6573_s26 = sld [smem:[#allocation60_spill]] }
 0x15e   :  { %v4638_v46 = vadd.f32 %v837_v47, %v799_v23  ;;  %v4654_v23 = vsel %vm3315_vm2, %v1007_v20, 0.0  ;;  %v6521_v47 = vrot.slane %v3861_v1, 3  ;;  %v6522_v25 = vrot.slane %v3864_v14, 3  ;;  %v1441_v14 = vpop.permute.xlu0 %1440  ;;  %s6592_s6 = sld [smem:[#allocation63_spill]] }
 0x15f   :  { %v826_v35 = vrot.slane %v822_v60, 1  ;;  %v6524_v22 = vstv %s6497_s8  ;;  %v949_v55 = vadd.f32 %v945_v5, %v889_v9  ;;  %v6525_v43 = vstv %s6515_s15  ;;  %s6529_s8 = sld [smem:[#allocation47_spill]] }
 0x160   :  { %2230 = vrot.lane.b32.xlu1 %v6521_v47, %s6298_s3  ;;  %2249 = vrot.lane.b32.xlu0 %v6522_v25, %s6298_s3  ;;  %v942_v27 = vmul.f32 %v6524_v22, %v4615_v0  ;;  %v1014_v56 = vmul.f32 %v6525_v43, %v4650_v3  ;;  %v6526_v19 = vstv %s6516_s13  ;;  %v6527_v1 = vstv %s6518_s2  ;;  %v1439_v47 = vpop.permute.xlu1 %1438  ;;  %s6594_s10 = sld [smem:[#allocation65_spill]] }
 0x161   :  { %v1044_v11 = vmul.f32 %v6526_v19, %v4650_v3  ;;  %v1104_v20 = vmul.f32 %v6527_v1, %v4650_v3  ;;  %v830_v25 = vadd.f32 %v826_v35, %v794_v13  ;;  %v886_v53 = vrot.slane %v882_v50, 2  ;;  %s6595_s23 = sld [smem:[#allocation66_spill]] }
 0x162   :  { %v897_v60 = vrot.slane %v4627_v58, 2  ;;  %v1445_v9 = vsel %vm1444_vm8, %v1439_v47, %v1441_v14  ;;  %v1016_v22 = vadd.f32 %v1014_v56, %v949_v55  ;;  %v6531_v19 = vstv %s6523_s21 }
 0x163   :  { %v1048_v43 = vrot.slane %v1044_v11, 1  ;;  %v1164_v33 = vmul.f32 %v6531_v19, %v4650_v3  ;;  %v4682_v1 = vsel %vm4480_vm5, %v1445_v9, 0.0  ;;  %v6532_v50 = vrot.slane %v3880_v18, 3 }
 0x164   :  { %v6533_v58 = vrot.slane %v3882_v29, 3  ;;  %v890_v13 = vadd.f32 %v886_v53, %v830_v25  ;;  %v946_v35 = vrot.slane %v942_v27, 3  ;;  %v6535_v55 = vstv %s6516_s13  ;;  %v1443_v5 = vpop.permute.xlu1 %1442  ;;  %v1662_v29 = vpop.permute.xlu0 %1661  ;;  %s6546_s13 = sld [smem:[#allocation51_spill]] }
 0x165   :  { %2251 = vrot.lane.b32.xlu1 %v6532_v50, %s6298_s3  ;;  %v1045_v56 = vmul.f32 %v6535_v55, %v4654_v23  ;;  %v1052_v11 = vadd.f32 %v1048_v43, %v1016_v22  ;;  %v1108_v47 = vrot.slane %v1104_v20, 2  ;;  %v6536_v9 = vstv %s6528_s5 }
 0x166   :  { %2253 = vrot.lane.b32.xlu0 %v6533_v58, %s6298_s3  ;;  %v4696_v19 = vmul.f32 %v6536_v9, %v4682_v1  ;;  %v6537_v18 = vstv %s6529_s8  ;;  %v6538_v58 = vstv %s6530_s16  ;;  %v950_v27 = vadd.f32 %v946_v35, %v890_v13 }
 0x167   :  { %v4701_v50 = vmul.f32 %v6537_v18, %v4682_v1  ;;  %v4706_v53 = vmul.f32 %v6538_v58, %v4682_v1  ;;  %v6539_v25 = vstv %s6515_s15  ;;  %v6540_v20 = vstv %s6518_s2  ;;  %s6545_s2 = sld [smem:[#allocation50_spill]] }
 0x168   :  { %v1015_v22 = vmul.f32 %v6539_v25, %v4654_v23  ;;  %v1105_v43 = vmul.f32 %v6540_v20, %v4654_v23  ;;  %v1446_v55 = vsel %vm1444_vm8, %v1441_v14, %v1443_v5  ;;  %v1112_v9 = vadd.f32 %v1108_v47, %v1052_v11  ;;  %s6548_s15 = sld [smem:[#allocation52_spill]] }
 0x169   :  { %v1168_v16 = vrot.slane %v1164_v33, 3  ;;  %v6541_v18 = vstv %s6534_s27  ;;  %v4720_v58 = vsel %vm4521_vm6, %v1446_v55, 0.0  ;;  %v6542_v13 = vrot.slane %v3889_v24, 3  ;;  %v1664_v24 = vpop.permute.xlu1 %1663 }
 0x16a   :  { %v1453_v44 = vmul.f32 %v6541_v18, %v4682_v1  ;;  %v6543_v35 = vrot.slane %v3901_v49, 3  ;;  %v1487_v14 = vrot.slane %v4696_v19, 1  ;;  %v1017_v33 = vadd.f32 %v1015_v22, %v950_v27  ;;  %v1666_v18 = vpop.permute.xlu0 %1665 }
 0x16b   :  { %2272 = vrot.lane.b32.xlu1 %v6542_v13, %s6298_s3  ;;  %v1049_v5 = vrot.slane %v1045_v56, 1  ;;  %v1172_v11 = vadd.f32 %v1168_v16, %v1112_v9  ;;  %v1547_v47 = vrot.slane %v4701_v50, 2  ;;  %v6544_v20 = vstv %s6523_s21  ;;  %s6552_s21 = sld [smem:[#allocation49_spill]] }
 0x16c   :  { %2274 = vrot.lane.b32.xlu0 %v6543_v35, %s6298_s3  ;;  %v1165_v55 = vmul.f32 %v6544_v20, %v4654_v23  ;;  %v1109_v49 = vrot.slane %v1105_v43, 2  ;;  %v6547_v35 = vstv %s6528_s5  ;;  %v901_v16 = vadd.f32 %v897_v60, %v4638_v46  ;;  %s6562_s5 = sld [smem:[#allocation56_spill]] }
 0x16d   :  { %v1053_v13 = vadd.f32 %v1049_v5, %v1017_v33  ;;  %v4737_v27 = vmul.f32 %v6547_v35, %v4720_v58  ;;  %v1668_v56 = vsel %vm1667_vm9, %v1662_v29, %v1664_v24  ;;  %v1669_v22 = vsel %vm1667_vm9, %v1664_v24, %v1666_v18 }
 0x16e   :  { %v1226_v9 = vadd.f32 %v3997_v34, %v1172_v11  ;;  %v6549_v20 = vstv %s6529_s8  ;;  %v4750_v43 = vsel %vm3309_vm1, %v1668_v56, 0.0  ;;  %v6550_v33 = vrot.slane %v3903_v52, 3  ;;  %s6568_s8 = sld [smem:[#allocation57_spill]] }
 0x16f   :  { %v4746_v25 = vmul.f32 %v6549_v20, %v4720_v58  ;;  %v6551_v46 = vrot.slane %v3939_v10, 3  ;;  %v1113_v60 = vadd.f32 %v1109_v49, %v1053_v13  ;;  %v1169_v29 = vrot.slane %v1165_v55, 3  ;;  %v1893_v13 = vpop.permute.xlu1 %1892 }
 0x170   :  { %2276 = vrot.lane.b32.xlu1 %v6550_v33, %s6298_s3  ;;  %v6553_v34 = vstv %s6530_s16  ;;  %v6554_v11 = vrot.slane %v3971_v51, 1  ;;  %v6555_v24 = vstv %s6545_s2  ;;  %v6556_v52 = vstv %s6546_s13  ;;  %s6571_s16 = sld [smem:[#allocation58_spill]] }
 0x171   :  { %2295 = vrot.lane.b32.xlu0 %v6551_v46, %s6298_s3  ;;  %v4761_v5 = vmul.f32 %v6553_v34, %v4720_v58  ;;  %v4768_v18 = vmul.f32 %v6555_v24, %v4750_v43  ;;  %v4773_v35 = vmul.f32 %v6556_v52, %v4750_v43  ;;  %v6557_v10 = vstv %s6534_s27  ;;  %s6561_s27 = sld [smem:[#allocation55_spill]] }
 0x172   :  { %v1262_v21 = vadd.f32 %v6554_v11, %v1226_v9  ;;  %v1454_v56 = vmul.f32 %v6557_v10, %v4720_v58  ;;  %v4780_v55 = vsel %vm3315_vm2, %v1669_v22, 0.0  ;;  %v6558_v49 = vstv %s6548_s15  ;;  %v1895_v9 = vpop.permute.xlu0 %1894  ;;  %s6583_s13 = sld [smem:[#allocation59_spill]] }
 0x173   :  { %v4785_v51 = vmul.f32 %v6558_v49, %v4750_v43  ;;  %v1173_v20 = vadd.f32 %v1169_v29, %v1113_v60  ;;  %v1488_v33 = vrot.slane %v4737_v27, 1  ;;  %v6559_v46 = vrot.slane %v3974_v30, 2 }
 0x174   :  { %v6560_v11 = vstv %s6552_s21  ;;  %v4794_v54 = vsel %vm1898_vm10, %v1893_v13, %v1895_v9  ;;  %v1548_v22 = vrot.slane %v4746_v25, 2  ;;  %v6563_v27 = vrot.slane %v4028_v26, 3 }
 0x175   :  { %v1322_v34 = vadd.f32 %v6559_v46, %v1262_v21  ;;  %v1676_v24 = vmul.f32 %v6560_v11, %v4750_v43  ;;  %v6564_v30 = vrot.slane %v4031_v45, 3  ;;  %v1227_v29 = vadd.f32 %v4073_v31, %v1173_v20  ;;  %v1897_v45 = vpop.permute.xlu1 %1896 }
 0x176   :  { %2297 = vrot.lane.b32.xlu1 %v6563_v27, %s6298_s3  ;;  %v1608_v21 = vrot.slane %v4761_v5, 3  ;;  %v6565_v25 = vrot.slane %v4002_v40, 3  ;;  %v6566_v49 = vstv %s6545_s2  ;;  %v6567_v26 = vrot.slane %v4643_v6, 3  ;;  %v1914_v40 = vpop.permute.xlu0 %1913  ;;  %s6577_s2 = sld [smem:[#allocation61_spill]] }
 0x177   :  { %2299 = vrot.lane.b32.xlu0 %v6564_v30, %s6298_s3  ;;  %v4813_v46 = vmul.f32 %v6566_v49, %v4780_v55  ;;  %v6569_v27 = vrot.slane %v4046_v17, 1  ;;  %v6570_v31 = vstv %s6552_s21  ;;  %v6572_v20 = vstv %s6561_s27  ;;  %s6590_s21 = sld [smem:[#allocation64_spill]] }
 0x178   :  { %v1382_v10 = vadd.f32 %v6565_v25, %v1322_v34  ;;  %v961_v11 = vadd.f32 %v6567_v26, %v901_v16  ;;  %v4822_v5 = vmul.f32 %v6570_v31, %v4780_v55  ;;  %v1020_v34 = vmul.f32 %v6572_v20, %v4650_v3  ;;  %v6578_v31 = vld [vmem:[#allocation18_spill] sm:$0xff] }
 0x179   :  { %v1263_v30 = vadd.f32 %v6569_v27, %v1227_v29  ;;  %v6574_v25 = vstv %s6562_s5  ;;  %v6575_v16 = vmov %v6556_v52  ;;  %v6576_v17 = vstv %s6548_s15  ;;  %s6586_s15 = sld [smem:[#allocation62_spill]] }
 0x17a   :  { %v1056_v49 = vmul.f32 %v6574_v25, %v4650_v3  ;;  %v1455_v6 = vadd.f32 %v1453_v44, %v1382_v10  ;;  %v4833_v26 = vmul.f32 %v6575_v16, %v4780_v55  ;;  %v4838_v29 = vmul.f32 %v6576_v17, %v4780_v55  ;;  %v6581_v44 = vld [vmem:[#allocation20_spill] sm:$0xff] }
 0x17b   :  { %v4841_v27 = vsel %vm1898_vm10, %v1895_v9, %v1897_v45  ;;  %v6579_v13 = vrot.slane %v6578_v31, 2  ;;  %v6580_v20 = vrot.slane %v4077_v48, 3  ;;  %v6582_v10 = vrot.slane %v6581_v44, 3 }
 0x17c   :  { %v1022_v25 = vadd.f32 %v1020_v34, %v961_v11  ;;  %v1060_v16 = vrot.slane %v1056_v49, 1  ;;  %v6584_v17 = vstv %s6568_s8  ;;  %v1491_v9 = vadd.f32 %v1487_v14, %v1455_v6  ;;  %v4867_v49 = vpop.permute.xlu1 %1915 }
 0x17d   :  { %v1323_v60 = vadd.f32 %v6579_v13, %v1263_v30  ;;  %2318 = vrot.lane.b32.xlu1 %v6580_v20, %s6298_s3  ;;  %2320 = vrot.lane.b32.xlu0 %v6582_v10, %s6298_s3  ;;  %v1116_v52 = vmul.f32 %v6584_v17, %v4650_v3  ;;  %v1711_v45 = vrot.slane %v4813_v46, 1  ;;  %v6585_v13 = vstv %s6571_s16  ;;  %v6588_v20 = vld [vmem:[#allocation19_spill] sm:$0xff]  ;;  %v4874_v46 = vpop.permute.xlu0 %1917 }
 0x17e   :  { %v1176_v48 = vmul.f32 %v6585_v13, %v4650_v3  ;;  %v6587_v30 = vstv %s6573_s26  ;;  %v6589_v11 = vrot.slane %v6588_v20, 3  ;;  %v1064_v44 = vadd.f32 %v1060_v16, %v1022_v25 }
 0x17f   :  { %v4863_v31 = vmul.f32 %v6587_v30, %v4682_v1  ;;  %v1120_v10 = vrot.slane %v1116_v52, 2  ;;  %v6591_v19 = vstv %s6577_s2  ;;  %v1551_v6 = vadd.f32 %v1547_v47, %v1491_v9 }
 0x180   :  { %v1383_v34 = vadd.f32 %v6589_v11, %v1323_v60  ;;  %v4872_v14 = vmul.f32 %v6591_v19, %v4682_v1  ;;  %v1771_v17 = vrot.slane %v4833_v26, 2  ;;  %v6593_v60 = vstv %s6583_s13 }
 0x181   :  { %v1459_v30 = vmul.f32 %v6593_v60, %v4682_v1  ;;  %v1124_v52 = vadd.f32 %v1120_v10, %v1064_v44  ;;  %v1180_v16 = vrot.slane %v1176_v48, 3  ;;  %v6596_v20 = vstv %s6586_s15 }
 0x182   :  { %v1456_v25 = vadd.f32 %v1454_v56, %v1383_v34  ;;  %v4886_v11 = vmul.f32 %v6596_v20, %v4682_v1  ;;  %v6597_v50 = vrot.slane %v4165_v63, 3  ;;  %v6598_v47 = vrot.slane %v4706_v53, 3  ;;  %v4909_v53 = vpop.permute.xlu1 %1933 }
 0x183   :  { %v1499_v9 = vrot.slane %v4863_v31, 1  ;;  %v6599_v34 = vstv %s6590_s21  ;;  %v1184_v10 = vadd.f32 %v1180_v16, %v1124_v52  ;;  %v6600_v19 = vstv %s6592_s6  ;;  %v4911_v31 = vpop.permute.xlu0 %1935 }
 0x184   :  { %2322 = vrot.lane.b32.xlu1 %v6597_v50, %s6298_s3  ;;  %v1611_v26 = vadd.f32 %v6598_v47, %v1551_v6  ;;  %v4898_v48 = vmul.f32 %v6599_v34, %v4750_v43  ;;  %v1492_v44 = vadd.f32 %v1488_v33, %v1456_v25  ;;  %v4903_v60 = vmul.f32 %v6600_v19, %v4750_v43  ;;  %s6625_s3 = sld [smem:[#allocation68_spill]] }
 0x185   :  { %v4907_v63 = vsel %vm1898_vm10, %v1914_v40, %v4867_v49  ;;  %v6601_v20 = vstv %s6594_s10  ;;  %v6602_v33 = vstv %s6595_s23  ;;  %v6603_v52 = vstv %s6498_s7  ;;  %s6644_s7 = sld [smem:[#allocation77_spill]] }
 0x186   :  { %v1678_v6 = vadd.f32 %v1676_v24, %v1611_v26  ;;  %v4916_v50 = vmul.f32 %v6601_v20, %v4750_v43  ;;  %v4921_v25 = vmul.f32 %v6602_v33, %v4750_v43  ;;  %v798_v16 = vmul.f32 %v6603_v52, %v4615_v0 }
 0x187   :  { %v1552_v47 = vadd.f32 %v1548_v22, %v1492_v44  ;;  %v1232_v40 = vadd.f32 %v4176_v61, %v1184_v10  ;;  %v1619_v34 = vrot.slane %v4886_v11, 3  ;;  %v6604_v19 = vstv %s6499_s28  ;;  %s6622_s28 = sld [smem:[#allocation67_spill]] }
 0x188   :  { %v834_v24 = vmul.f32 %v6604_v19, %v4615_v0  ;;  %v6605_v26 = vrot.slane %v4768_v18, 1  ;;  %v800_v33 = vadd.f32 %v798_v16, %v4492_v7  ;;  %v6606_v13 = vstv %s6504_s20  ;;  %v4943_v18 = vpop.permute.xlu1 %1937  ;;  %v6611_v19 = vld [vmem:[#allocation21_spill] sm:$0xff]  ;;  %s6643_s20 = sld [smem:[#allocation75_spill]] }
 0x189   :  { %v894_v39 = vmul.f32 %v6606_v13, %v4615_v0  ;;  %v1612_v22 = vadd.f32 %v1608_v21, %v1552_v47  ;;  %v6607_v61 = vrot.slane %v4134_v42, 1  ;;  %v6608_v10 = vstv %s6508_s4  ;;  %s6647_s4 = sld [smem:[#allocation78_spill]] }
 0x18a   :  { %v1714_v20 = vadd.f32 %v6605_v26, %v1678_v6  ;;  %v838_v11 = vrot.slane %v834_v24, 1  ;;  %v954_v52 = vmul.f32 %v6608_v10, %v4615_v0  ;;  %v4945_v6 = vpop.permute.xlu0 %1953  ;;  %v6609_v7 = vrot.slane %v4773_v35, 2 }
 0x18b   :  { %v1274_v44 = vadd.f32 %v6607_v61, %v1232_v40  ;;  %v6610_v42 = vstv %s6562_s5  ;;  %v1679_v40 = vadd.f32 %v4822_v5, %v1612_v22  ;;  %v6612_v24 = vrot.slane %v6611_v19, 2  ;;  %s6715_s5 = sld [smem:[#allocation69_spill]] }
 0x18c   :  { %v1774_v16 = vadd.f32 %v6609_v7, %v1714_v20  ;;  %v1057_v47 = vmul.f32 %v6610_v42, %v4654_v23  ;;  %v842_v61 = vadd.f32 %v838_v11, %v800_v33  ;;  %v898_v10 = vrot.slane %v894_v39, 2  ;;  %v4970_v11 = vpop.permute.xlu1 %1955 }
 0x18d   :  { %v1334_v26 = vadd.f32 %v6612_v24, %v1274_v44  ;;  %v6613_v56 = vrot.slane %v4785_v51, 3  ;;  %v6614_v20 = vstv %s6561_s27  ;;  %v6615_v21 = vstv %s6568_s8  ;;  %s6660_s27 = sld [smem:[#allocation79_spill]] }
 0x18e   :  { %v1021_v7 = vmul.f32 %v6614_v20, %v4654_v23  ;;  %v1117_v13 = vmul.f32 %v6615_v21, %v4654_v23  ;;  %v6616_v42 = vstv %s6571_s16  ;;  %v1715_v22 = vadd.f32 %v1711_v45, %v1679_v40  ;;  %v4972_v51 = vpop.permute.xlu0 %1957  ;;  %s6718_s8 = sld [smem:[#allocation72_spill]] }
 0x18f   :  { %v1834_v35 = vadd.f32 %v6613_v56, %v1774_v16  ;;  %v1177_v5 = vmul.f32 %v6616_v42, %v4654_v23  ;;  %v6617_v19 = vrot.slane %v4162_v37, 3  ;;  %v902_v33 = vadd.f32 %v898_v10, %v842_v61  ;;  %s6721_s16 = sld [smem:[#allocation85_spill]] }
 0x190   :  { %v958_v39 = vrot.slane %v954_v52, 3  ;;  %v1061_v16 = vrot.slane %v1057_v47, 1  ;;  %v6619_v21 = vstv %s6573_s26  ;;  %v6620_v45 = vstv %s6577_s2  ;;  %s6634_s26 = sld [smem:[#allocation73_spill]] }
 0x191   :  { %v1394_v44 = vadd.f32 %v6617_v19, %v1334_v26  ;;  %v4975_v56 = vadd.f32 %v4794_v54, %v1834_v35  ;;  %v4980_v24 = vmul.f32 %v6619_v21, %v4720_v58  ;;  %v4985_v37 = vmul.f32 %v6620_v45, %v4720_v58  ;;  %s6778_s2 = sld [smem:[#allocation92_spill]] }
 0x192   :  { %v1775_v40 = vadd.f32 %v1771_v17, %v1715_v22  ;;  %v962_v26 = vadd.f32 %v958_v39, %v902_v33  ;;  %v6621_v61 = vstv %s6583_s13  ;;  %v1121_v54 = vrot.slane %v1117_v13, 2  ;;  %v5001_v33 = vpop.permute.xlu1 %1973  ;;  %v5003_v13 = vpop.permute.xlu0 %1975  ;;  %s6783_s13 = sld [smem:[#allocation94_spill]] }
 0x193   :  { %6618 = vst [vmem:[#allocation16_spill] sm:$0xff] %v4975_v56  ;;  %v1461_v52 = vadd.f32 %v1459_v30, %v1394_v44  ;;  %v4990_v10 = vmul.f32 %v6621_v61, %v4720_v58  ;;  %v1181_v47 = vrot.slane %v1177_v5, 3  ;;  %v6623_v20 = vstv %s6586_s15  ;;  %s6785_s15 = sld [smem:[#allocation95_spill]] }
 0x194   :  { %v4996_v42 = vmul.f32 %v6623_v20, %v4720_v58  ;;  %v6624_v19 = vrot.slane %v4838_v29, 3  ;;  %v1023_v22 = vadd.f32 %v1021_v7, %v962_v26  ;;  %v6626_v5 = vstv %s6590_s21  ;;  %s6786_s21 = sld [smem:[#allocation96_spill]] }
 0x195   :  { %v1503_v30 = vadd.f32 %v1499_v9, %v1461_v52  ;;  %v5008_v39 = vmul.f32 %v6626_v5, %v4780_v55  ;;  %v6627_v21 = vstv %s6594_s10  ;;  %v6628_v45 = vstv %s6595_s23  ;;  %s6636_s10 = sld [smem:[#allocation71_spill]] }
 0x196   :  { %v1835_v17 = vadd.f32 %v6624_v19, %v1775_v40  ;;  %v5013_v29 = vmul.f32 %v6627_v21, %v4780_v55  ;;  %v5018_v9 = vmul.f32 %v6628_v45, %v4780_v55  ;;  %v5023_v7 = vsel %vm1898_vm10, %v4867_v49, %v4874_v46  ;;  %s6637_s23 = sld [smem:[#allocation74_spill]] }
 0x197   :  { %v6630_v52 = vrot.slane %v4872_v14, 2  ;;  %v1065_v61 = vadd.f32 %v1061_v16, %v1023_v22  ;;  %v6631_v20 = vstv %s6622_s28  ;;  %v6632_v21 = vstv %s6592_s6  ;;  %s6641_s6 = sld [smem:[#allocation76_spill]] }
 0x198   :  { %v5026_v40 = vadd.f32 %v4841_v27, %v1835_v17  ;;  %v803_v19 = vmul.f32 %v6631_v20, %v4583_v59  ;;  %v5037_v45 = vmul.f32 %v6632_v21, %v4780_v55  ;;  %v6633_v49 = vstv %s6625_s3  ;;  %v5049_v20 = vpop.permute.xlu1 %1977  ;;  %v5051_v21 = vpop.permute.xlu0 %1996 }
 0x199   :  { %v1563_v26 = vadd.f32 %v6630_v52, %v1503_v30  ;;  %v845_v46 = vmul.f32 %v6633_v49, %v4583_v59  ;;  %v6635_v27 = vstv %s6413_s0  ;;  %v1125_v30 = vadd.f32 %v1121_v54, %v1065_v61  ;;  %6639 = vst [vmem:[#allocation18_spill] sm:$0xff] %v5049_v20  ;;  %6640 = vst [vmem:[#allocation20_spill] sm:$0xff] %v5051_v21 }
 0x19a   :  { %6629 = vst [vmem:[#allocation17_spill] sm:$0xff] %v5026_v40  ;;  %v905_v17 = vmul.f32 %v6635_v27, %v4583_v59  ;;  %v805_v16 = vadd.f32 %v803_v19, %v4415_v8  ;;  %v6638_v22 = vstv %s6414_s29  ;;  %v6645_v19 = vstv %s6634_s26 }
 0x19b   :  { %v1623_v14 = vadd.f32 %v1619_v34, %v1563_v26  ;;  %v965_v52 = vmul.f32 %v6638_v22, %v4583_v59  ;;  %v849_v44 = vrot.slane %v845_v46, 1  ;;  %v6642_v34 = vstv %s6421_s1 }
 0x19c   :  { %v1068_v26 = vmul.f32 %v6642_v34, %v4650_v3  ;;  %v1185_v8 = vadd.f32 %v1181_v47, %v1125_v30  ;;  %v1128_v27 = vmul.f32 %v6645_v19, %v4650_v3  ;;  %v909_v35 = vrot.slane %v905_v17, 2  ;;  %v5079_v17 = vpop.permute.xlu0 %2000 }
 0x19d   :  { %v1684_v54 = vadd.f32 %v4903_v60, %v1623_v14  ;;  %v853_v22 = vadd.f32 %v849_v44, %v805_v16  ;;  %v6646_v5 = vstv %s6636_s10  ;;  %v6648_v46 = vstv %s6637_s23  ;;  %v6650_v14 = vld [vmem:[#allocation25_spill] sm:$0xff]  ;;  %v5077_v44 = vpop.permute.xlu1 %1998  ;;  %6653 = vst [vmem:[#allocation21_spill] sm:$0xff] %v5079_v17 }
 0x19e   :  { %v1026_v49 = vmul.f32 %v6646_v5, %v4650_v3  ;;  %v1188_v20 = vmul.f32 %v6648_v46, %v4650_v3  ;;  %v6649_v34 = vrot.slane %v4898_v48, 1  ;;  %v1233_v47 = vadd.f32 %v6650_v14, %v1185_v8  ;;  %6652 = vst [vmem:[#allocation19_spill] sm:$0xff] %v5077_v44 }
 0x19f   :  { %v969_v30 = vrot.slane %v965_v52, 3  ;;  %v6651_v61 = vstv %s6641_s6  ;;  %v913_v5 = vadd.f32 %v909_v35, %v853_v22  ;;  %v1072_v16 = vrot.slane %v1068_v26, 1 }
 0x1a0   :  { %v1726_v60 = vadd.f32 %v6649_v34, %v1684_v54  ;;  %v5075_v40 = vmul.f32 %v6651_v61, %v4682_v1  ;;  %v6654_v19 = vstv %s6643_s20  ;;  %v6655_v48 = vstv %s6644_s7  ;;  %v6657_v61 = vld [vmem:[#allocation22_spill] sm:$0xff] }
 0x1a1   :  { %v5084_v46 = vmul.f32 %v6654_v19, %v4682_v1  ;;  %v5089_v54 = vmul.f32 %v6655_v48, %v4682_v1  ;;  %v6656_v52 = vrot.slane %v4916_v50, 2  ;;  %v6658_v34 = vrot.slane %v6657_v61, 1 }
 0x1a2   :  { %v1132_v17 = vrot.slane %v1128_v27, 2  ;;  %v6659_v35 = vstv %s6647_s4  ;;  %v973_v22 = vadd.f32 %v969_v30, %v913_v5  ;;  %v1192_v19 = vrot.slane %v1188_v20, 3  ;;  %v5116_v5 = vpop.permute.xlu1 %2019 }
 0x1a3   :  { %v1786_v8 = vadd.f32 %v6656_v52, %v1726_v60  ;;  %v1275_v14 = vadd.f32 %v6658_v34, %v1233_v47  ;;  %v5098_v26 = vmul.f32 %v6659_v35, %v4682_v1  ;;  %v6661_v48 = vstv %s4062_s19  ;;  %v6663_v52 = vld [vmem:[#allocation23_spill] sm:$0xff]  ;;  %6666 = vst [vmem:[#allocation25_spill] sm:$0xff] %v5116_v5  ;;  %v5118_v34 = vpop.permute.xlu0 %2021 }
 0x1a4   :  { %v5104_v21 = vmul.f32 %v6661_v48, %v4750_v43  ;;  %v6662_v50 = vrot.slane %v4921_v25, 3  ;;  %v6664_v47 = vrot.slane %v6663_v52, 2  ;;  %v6665_v30 = vstv %s4079_s25  ;;  %6667 = vst [vmem:[#allocation22_spill] sm:$0xff] %v5118_v34 }
 0x1a5   :  { %v5114_v20 = vmul.f32 %v6665_v30, %v4750_v43  ;;  %v1028_v35 = vadd.f32 %v1026_v49, %v973_v22  ;;  %v6668_v25 = vstv %s4090_s14  ;;  %v6669_v48 = vstv %s6622_s28  ;;  %s6789_s28 = sld [smem:[#allocation98_spill]] }
 0x1a6   :  { %v1846_v60 = vadd.f32 %v6662_v50, %v1786_v8  ;;  %v1335_v27 = vadd.f32 %v6664_v47, %v1275_v14  ;;  %v5123_v8 = vmul.f32 %v6668_v25, %v4750_v43  ;;  %v5128_v14 = vsel %vm1898_vm10, %v4909_v53, %v4911_v31  ;;  %v6671_v47 = vld [vmem:[#allocation24_spill] sm:$0xff] }
 0x1a7   :  { %v804_v50 = vmul.f32 %v6669_v48, %v4615_v0  ;;  %v6672_v30 = vrot.slane %v6671_v47, 3  ;;  %v6673_v22 = vstv %s6660_s27  ;;  %v1076_v56 = vadd.f32 %v1072_v16, %v1028_v35  ;;  %v5159_v35 = vpop.permute.xlu1 %2023 }
 0x1a8   :  { %v5134_v52 = vadd.f32 %v4907_v63, %v1846_v60  ;;  %v5142_v25 = vmul.f32 %v6673_v22, %v4750_v43  ;;  %v6674_v5 = vstv %s6625_s3  ;;  %v6675_v63 = vstv %s6413_s0  ;;  %6678 = vst [vmem:[#allocation24_spill] sm:$0xff] %v5159_v35  ;;  %s6691_s0 = sld [smem:[#allocation80_spill]] }
 0x1a9   :  { %v1395_v61 = vadd.f32 %v6672_v30, %v1335_v27  ;;  %v806_v53 = vadd.f32 %v804_v50, %v4417_v62  ;;  %v846_v48 = vmul.f32 %v6674_v5, %v4615_v0  ;;  %v906_v60 = vmul.f32 %v6675_v63, %v4615_v0  ;;  %v5161_v62 = vpop.permute.xlu0 %2042  ;;  %s6793_s3 = sld [smem:[#allocation97_spill]] }
 0x1aa   :  { %6670 = vst [vmem:[#allocation23_spill] sm:$0xff] %v5134_v52  ;;  %v6676_v30 = vstv %s6414_s29  ;;  %v6677_v22 = vstv %s6421_s1  ;;  %6679 = vst [vmem:[#allocation105_spill] sm:$0xff] %v5161_v62  ;;  %v1136_v5 = vadd.f32 %v1132_v17, %v1076_v56  ;;  %v6681_v47 = vrot.slane %v4980_v24, 1  ;;  %s6702_s1 = sld [smem:[#allocation82_spill]] }
 0x1ab   :  { %v1462_v27 = vadd.f32 %v4990_v10, %v1395_v61  ;;  %v966_v49 = vmul.f32 %v6676_v30, %v4615_v0  ;;  %v1069_v16 = vmul.f32 %v6677_v22, %v4654_v23  ;;  %v850_v63 = vrot.slane %v846_v48, 1  ;;  %s6712_s29 = sld [smem:[#allocation70_spill]] }
 0x1ac   :  { %v6680_v10 = vstv %s6634_s26  ;;  %v6682_v22 = vstv %s6636_s10  ;;  %v6683_v34 = vstv %s6637_s23  ;;  %v1196_v44 = vadd.f32 %v1192_v19, %v1136_v5  ;;  %s6799_s26 = sld [smem:[#allocation99_spill]] }
 0x1ad   :  { %v1129_v61 = vmul.f32 %v6680_v10, %v4654_v23  ;;  %v1504_v52 = vadd.f32 %v6681_v47, %v1462_v27  ;;  %v1027_v35 = vmul.f32 %v6682_v22, %v4654_v23  ;;  %v1189_v62 = vmul.f32 %v6683_v34, %v4654_v23  ;;  %v5188_v34 = vpop.permute.xlu1 %2044  ;;  %v5190_v19 = vpop.permute.xlu0 %2046  ;;  %s6805_s10 = sld [smem:[#allocation100_spill]] }
 0x1ae   :  { %v854_v56 = vadd.f32 %v850_v63, %v806_v53  ;;  %v910_v17 = vrot.slane %v906_v60, 2  ;;  %v970_v48 = vrot.slane %v966_v49, 3  ;;  %v6684_v10 = vrot.slane %v4985_v37, 2  ;;  %6687 = vst [vmem:[#allocation106_spill] sm:$0xff] %v5190_v19  ;;  %s5748_s23 = sld [smem:[#allocation3 + $0x11]] }
 0x1af   :  { %v1073_v24 = vrot.slane %v1069_v16, 1  ;;  %v6685_v27 = vstv %s6641_s6  ;;  %v6686_v22 = vstv %s6644_s7  ;;  %v1238_v49 = vadd.f32 %v4320_v4, %v1196_v44  ;;  %s5758_s6 = sld [smem:[#allocation3 + $0x1a]] }
 0x1b0   :  { %v1564_v50 = vadd.f32 %v6684_v10, %v1504_v52  ;;  %v5181_v47 = vmul.f32 %v6685_v27, %v4720_v58  ;;  %v5186_v30 = vmul.f32 %v6686_v22, %v4720_v58  ;;  %v914_v53 = vadd.f32 %v910_v17, %v854_v56  ;;  %s5803_s7 = sld [smem:[#allocation3 + $0x2c]] }
 0x1b1   :  { %v1133_v37 = vrot.slane %v1129_v61, 2  ;;  %v6688_v52 = vstv %s6643_s20  ;;  %v6689_v16 = vrot.slane %v4996_v42, 3  ;;  %v1193_v63 = vrot.slane %v1189_v62, 3  ;;  %s5770_s20 = sld [smem:[#allocation3 + $0x23]] }
 0x1b2   :  { %v5196_v60 = vmul.f32 %v6688_v52, %v4720_v58  ;;  %v6690_v10 = vstv %s6647_s4  ;;  %v6692_v22 = vstv %s4062_s19  ;;  %v6693_v4 = vrot.slane %v4280_v36, 1  ;;  %s6705_s19 = sld [smem:[#allocation83_spill]] }
 0x1b3   :  { %v1624_v5 = vadd.f32 %v6689_v16, %v1564_v50  ;;  %v5203_v27 = vmul.f32 %v6690_v10, %v4720_v58  ;;  %v5208_v19 = vmul.f32 %v6692_v22, %v4780_v55  ;;  %v974_v61 = vadd.f32 %v970_v48, %v914_v53  ;;  %v5230_v48 = vpop.permute.xlu1 %2065  ;;  %s5808_s4 = sld [smem:[#allocation3 + $0x35]] }
 0x1b4   :  { %v1286_v44 = vadd.f32 %v6693_v4, %v1238_v49  ;;  %v6694_v50 = vstv %s4079_s25  ;;  %v6695_v52 = vstv %s4090_s14  ;;  %v5228_v36 = vsel %vm1898_vm10, %v4911_v31, %v4943_v18  ;;  %6696 = vst [vmem:[#allocation107_spill] sm:$0xff] %v5230_v48  ;;  %v5232_v49 = vpop.permute.xlu0 %2067  ;;  %s6707_s25 = sld [smem:[#allocation81_spill]] }
 0x1b5   :  { %v5216_v62 = vmul.f32 %v6694_v50, %v4780_v55  ;;  %v1685_v56 = vadd.f32 %v5037_v45, %v1624_v5  ;;  %v5223_v16 = vmul.f32 %v6695_v52, %v4780_v55  ;;  %v6697_v53 = vrot.slane %v4295_v38, 2  ;;  %s6708_s14 = sld [smem:[#allocation84_spill]] }
 0x1b6   :  { %v1029_v45 = vadd.f32 %v1027_v35, %v974_v61  ;;  %v6698_v5 = vstv %s6660_s27  ;;  %v6699_v4 = vstv %s6691_s0  ;;  %v6700_v52 = vrot.slane %v5008_v39, 1  ;;  %s5817_s27 = sld [smem:[#allocation3 + $0x3e]] }
 0x1b7   :  { %v1346_v10 = vadd.f32 %v6697_v53, %v1286_v44  ;;  %v5239_v22 = vmul.f32 %v6698_v5, %v4780_v55  ;;  %v809_v50 = vmul.f32 %v6699_v4, %v4583_v59  ;;  %v6701_v17 = vstv %s4119_s9  ;;  %v5263_v48 = vpop.permute.xlu1 %2069 }
 0x1b8   :  { %v1727_v31 = vadd.f32 %v6700_v52, %v1685_v56  ;;  %v857_v42 = vmul.f32 %v6701_v17, %v4583_v59  ;;  %v6703_v38 = vstv %s4125_s22  ;;  %v6704_v35 = vrot.slane %v4298_v28, 3  ;;  %v5265_v28 = vpop.permute.xlu0 %2088 }
 0x1b9   :  { %v917_v44 = vmul.f32 %v6703_v38, %v4583_v59  ;;  %v1077_v53 = vadd.f32 %v1073_v24, %v1029_v45  ;;  %v811_v4 = vadd.f32 %v809_v50, %v4464_v2  ;;  %v6706_v39 = vrot.slane %v5013_v29, 2 }
 0x1ba   :  { %v1406_v61 = vadd.f32 %v6704_v35, %v1346_v10  ;;  %v861_v17 = vrot.slane %v857_v42, 1  ;;  %v6709_v18 = vstv %s4139_s12  ;;  %v6710_v29 = vstv %s6702_s1 }
 0x1bb   :  { %v1787_v56 = vadd.f32 %v6706_v39, %v1727_v31  ;;  %v977_v38 = vmul.f32 %v6709_v18, %v4583_v59  ;;  %v1137_v10 = vadd.f32 %v1133_v37, %v1077_v53  ;;  %v1080_v45 = vmul.f32 %v6710_v29, %v4650_v3  ;;  %v5288_v29 = vpop.permute.xlu1 %2090 }
 0x1bc   :  { %v1467_v24 = vadd.f32 %v5084_v46, %v1406_v61  ;;  %v6711_v50 = vrot.slane %v5018_v9, 3  ;;  %v865_v42 = vadd.f32 %v861_v17, %v811_v4  ;;  %v921_v35 = vrot.slane %v917_v44, 2 }
 0x1bd   :  { %v6713_v18 = vstv %s6705_s19  ;;  %v6714_v52 = vrot.slane %v5075_v40, 1  ;;  %v1197_v46 = vadd.f32 %v1193_v63, %v1137_v10  ;;  %v6716_v37 = vstv %s6707_s25  ;;  %v5290_v40 = vpop.permute.xlu0 %2092 }
 0x1be   :  { %v1847_v31 = vadd.f32 %v6711_v50, %v1787_v56  ;;  %v1140_v39 = vmul.f32 %v6713_v18, %v4650_v3  ;;  %v1032_v61 = vmul.f32 %v6716_v37, %v4650_v3  ;;  %v6717_v53 = vstv %s6708_s14  ;;  %6719 = vst [vmem:[#allocation108_spill] sm:$0xff] %v5290_v40 }
 0x1bf   :  { %v1515_v5 = vadd.f32 %v6714_v52, %v1467_v24  ;;  %v1200_v9 = vmul.f32 %v6717_v53, %v4650_v3  ;;  %v925_v4 = vadd.f32 %v921_v35, %v865_v42  ;;  %v981_v44 = vrot.slane %v977_v38, 3  ;;  %v6722_v24 = vld [vmem:[#allocation29_spill] sm:$0xff]  ;;  %v6728_v53 = vld [vmem:[#allocation26_spill] sm:$0xff] }
 0x1c0   :  { %v5286_v56 = vadd.f32 %v5023_v7, %v1847_v31  ;;  %v1084_v17 = vrot.slane %v1080_v45, 1  ;;  %v6720_v63 = vrot.slane %v5089_v54, 2  ;;  %v1239_v10 = vadd.f32 %v6722_v24, %v1197_v46 }
 0x1c1   :  { %v6723_v50 = vstv %s4253_s11  ;;  %v6724_v7 = vstv %s6712_s29  ;;  %v985_v38 = vadd.f32 %v981_v44, %v925_v4  ;;  %v1144_v45 = vrot.slane %v1140_v39, 2 }
 0x1c2   :  { %v1575_v52 = vadd.f32 %v6720_v63, %v1515_v5  ;;  %v5298_v18 = vmul.f32 %v6723_v50, %v4682_v1  ;;  %v5303_v31 = vmul.f32 %v6724_v7, %v4682_v1  ;;  %v6725_v42 = vstv %s6715_s5 }
 0x1c3   :  { %v5308_v35 = vmul.f32 %v6725_v42, %v4682_v1  ;;  %v6726_v54 = vstv %s4271_s18  ;;  %v6727_v46 = vrot.slane %v5098_v26, 3  ;;  %v6729_v63 = vrot.slane %v6728_v53, 1 }
 0x1c4   :  { %v5313_v5 = vmul.f32 %v6726_v54, %v4682_v1  ;;  %v1204_v50 = vrot.slane %v1200_v9, 3  ;;  %v6730_v4 = vstv %s6718_s8  ;;  %v1034_v44 = vadd.f32 %v1032_v61, %v985_v38  ;;  %v6733_v9 = vld [vmem:[#allocation27_spill] sm:$0xff] }
 0x1c5   :  { %v1635_v37 = vadd.f32 %v6727_v46, %v1575_v52  ;;  %v1287_v24 = vadd.f32 %v6729_v63, %v1239_v10  ;;  %v5322_v39 = vmul.f32 %v6730_v4, %v4750_v43  ;;  %v6731_v26 = vstv %s6721_s16  ;;  %v5331_v52 = vpop.permute.xlu1 %2111 }
 0x1c6   :  { %v5329_v54 = vmul.f32 %v6731_v26, %v4750_v43  ;;  %6732 = vst [vmem:[#allocation29_spill] sm:$0xff] %v5331_v52  ;;  %v6734_v46 = vrot.slane %v6733_v9, 2  ;;  %v6735_v61 = vstv %s4315_s24  ;;  %v5344_v63 = vsel %vm1898_vm10, %v4945_v6, %v4970_v11  ;;  %v5353_v9 = vpop.permute.xlu0 %2113 }
 0x1c7   :  { %v1690_v10 = vadd.f32 %v5104_v21, %v1635_v37  ;;  %v5339_v38 = vmul.f32 %v6735_v61, %v4750_v43  ;;  %v1088_v4 = vadd.f32 %v1084_v17, %v1034_v44  ;;  %v6736_v42 = vstv %s6691_s0  ;;  %6738 = vst [vmem:[#allocation26_spill] sm:$0xff] %v5353_v9  ;;  %v6740_v61 = vld [vmem:[#allocation28_spill] sm:$0xff]  ;;  %s5828_s0 = sld [smem:[#allocation3 + $0x47]] }
 0x1c8   :  { %v1347_v53 = vadd.f32 %v6734_v46, %v1287_v24  ;;  %v810_v2 = vmul.f32 %v6736_v42, %v4615_v0  ;;  %v6737_v21 = vstv %s4119_s9  ;;  %v6739_v24 = vrot.slane %v5114_v20, 1  ;;  %s6766_s9 = sld [smem:[#allocation88_spill]] }
 0x1c9   :  { %v858_v37 = vmul.f32 %v6737_v21, %v4615_v0  ;;  %v6741_v7 = vrot.slane %v6740_v61, 3  ;;  %v6742_v6 = vstv %s4325_s30  ;;  %v6743_v44 = vstv %s4125_s22  ;;  %s6760_s22 = sld [smem:[#allocation86_spill]] }
 0x1ca   :  { %v1738_v46 = vadd.f32 %v6739_v24, %v1690_v10  ;;  %v5362_v17 = vmul.f32 %v6742_v6, %v4750_v43  ;;  %v918_v26 = vmul.f32 %v6743_v44, %v4615_v0  ;;  %v1148_v42 = vadd.f32 %v1144_v45, %v1088_v4  ;;  %v5371_v10 = vpop.permute.xlu1 %2115 }
 0x1cb   :  { %v1407_v52 = vadd.f32 %v6741_v7, %v1347_v53  ;;  %v812_v21 = vadd.f32 %v810_v2, %v4506_v41  ;;  %v862_v40 = vrot.slane %v858_v37, 1  ;;  %v6744_v9 = vstv %s4139_s12  ;;  %s6770_s12 = sld [smem:[#allocation90_spill]] }
 0x1cc   :  { %v978_v20 = vmul.f32 %v6744_v9, %v4615_v0  ;;  %v6745_v24 = vrot.slane %v5123_v8, 2  ;;  %v1746_v61 = vrot.slane %v5329_v54, 1  ;;  %v1806_v6 = vrot.slane %v5339_v38, 2 }
 0x1cd   :  { %v1468_v53 = vadd.f32 %v5196_v60, %v1407_v52  ;;  %v1208_v45 = vadd.f32 %v1204_v50, %v1148_v42  ;;  %v866_v4 = vadd.f32 %v862_v40, %v812_v21  ;;  %v922_v41 = vrot.slane %v918_v26, 2  ;;  %v5393_v21 = vpop.permute.xlu0 %2134 }
 0x1ce   :  { %v1798_v7 = vadd.f32 %v6745_v24, %v1738_v46  ;;  %v6746_v2 = vstv %s6702_s1  ;;  %v6747_v9 = vrot.slane %v5142_v25, 3  ;;  %v6748_v8 = vrot.slane %v5181_v47, 1  ;;  %s5855_s1 = sld [smem:[#allocation3 + $0x50]] }
 0x1cf   :  { %v1081_v37 = vmul.f32 %v6746_v2, %v4654_v23  ;;  %v6749_v52 = vstv %s6705_s19  ;;  %v1244_v50 = vadd.f32 %v4437_v57, %v1208_v45  ;;  %v926_v40 = vadd.f32 %v922_v41, %v866_v4  ;;  %v5403_v45 = vpop.permute.xlu1 %2136  ;;  %s5861_s19 = sld [smem:[#allocation3 + $0x59]] }
 0x1d0   :  { %v1858_v44 = vadd.f32 %v6747_v9, %v1798_v7  ;;  %v1516_v46 = vadd.f32 %v6748_v8, %v1468_v53  ;;  %v1141_v24 = vmul.f32 %v6749_v52, %v4654_v23  ;;  %v982_v26 = vrot.slane %v978_v20, 3 }
 0x1d1   :  { %v6750_v42 = vstv %s6708_s14  ;;  %v6751_v7 = vrot.slane %v5186_v30, 2  ;;  %v6752_v2 = vstv %s6707_s25  ;;  %v1085_v57 = vrot.slane %v1081_v37, 1  ;;  %s5866_s25 = sld [smem:[#allocation3 + $0x62]] }
 0x1d2   :  { %v1201_v25 = vmul.f32 %v6750_v42, %v4654_v23  ;;  %v5396_v47 = vadd.f32 %v5128_v14, %v1858_v44  ;;  %v1033_v9 = vmul.f32 %v6752_v2, %v4654_v23  ;;  %v6753_v20 = vrot.slane %v4396_v15, 1  ;;  %s5877_s14 = sld [smem:[#allocation3 + $0x6b]] }
 0x1d3   :  { %v1576_v53 = vadd.f32 %v6751_v7, %v1516_v46  ;;  %v986_v41 = vadd.f32 %v982_v26, %v926_v40  ;;  %v6754_v8 = vstv %s4253_s11  ;;  %v6755_v14 = vstv %s6712_s29  ;;  %s6762_s11 = sld [smem:[#allocation87_spill]] }
 0x1d4   :  { %v1298_v4 = vadd.f32 %v6753_v20, %v1244_v50  ;;  %v5410_v52 = vmul.f32 %v6754_v8, %v4720_v58  ;;  %v5415_v30 = vmul.f32 %v6755_v14, %v4720_v58  ;;  %v6756_v44 = vrot.slane %v5203_v27, 3  ;;  %s5892_s29 = sld [smem:[#allocation3 + $0x74]] }
 0x1d5   :  { %v1145_v37 = vrot.slane %v1141_v24, 2  ;;  %v6757_v42 = vstv %s6715_s5  ;;  %v6758_v15 = vstv %s4271_s18  ;;  %v6759_v40 = vrot.slane %v4399_v12, 2  ;;  %s6773_s18 = sld [smem:[#allocation89_spill]] }
 0x1d6   :  { %v1636_v46 = vadd.f32 %v6756_v44, %v1576_v53  ;;  %v5422_v7 = vmul.f32 %v6757_v42, %v4720_v58  ;;  %v5427_v50 = vmul.f32 %v6758_v15, %v4720_v58  ;;  %v1035_v2 = vadd.f32 %v1033_v9, %v986_v41  ;;  %s5897_s5 = sld [smem:[#allocation3 + $0x7d]] }
 0x1d7   :  { %v1358_v26 = vadd.f32 %v6759_v40, %v1298_v4  ;;  %v1205_v20 = vrot.slane %v1201_v25, 3  ;;  %v6761_v8 = vstv %s6721_s16  ;;  %v6763_v44 = vstv %s6718_s8  ;;  %s5902_s8 = sld [smem:[#allocation3 + $0x86]] }
 0x1d8   :  { %v5434_v27 = vmul.f32 %v6761_v8, %v4780_v55  ;;  %v1691_v24 = vadd.f32 %v5208_v19, %v1636_v46  ;;  %v5442_v42 = vmul.f32 %v6763_v44, %v4780_v55  ;;  %v6764_v12 = vrot.slane %v4407_v32, 3  ;;  %v5456_v46 = vpop.permute.xlu0 %2138  ;;  %v5467_v44 = vpop.permute.xlu1 %2157  ;;  %v6774_v32 = vld [vmem:[#allocation14_spill] sm:$0xff]  ;;  %s5910_s16 = sld [smem:[#allocation3 + $0x8f]] }
 0x1d9   :  { %v1089_v9 = vadd.f32 %v1085_v57, %v1035_v2  ;;  %v6765_v25 = vstv %s4315_s24  ;;  %v5454_v19 = vsel %vm1898_vm10, %v4970_v11, %v4972_v51  ;;  %v6767_v15 = vrot.slane %v5216_v62, 1  ;;  %s6777_s24 = sld [smem:[#allocation91_spill]] }
 0x1da   :  { %v1418_v4 = vadd.f32 %v6764_v12, %v1358_v26  ;;  %v5449_v41 = vmul.f32 %v6765_v25, %v4780_v55  ;;  %v6768_v57 = vstv %s4333_s17  ;;  %v6769_v2 = vstv %s6760_s22 }
 0x1db   :  { %v1739_v40 = vadd.f32 %v6767_v15, %v1691_v24  ;;  %v815_v26 = vmul.f32 %v6768_v57, %v4583_v59  ;;  %v869_v8 = vmul.f32 %v6769_v2, %v4583_v59  ;;  %v1149_v51 = vadd.f32 %v1145_v37, %v1089_v9 }
 0x1dc   :  { %v1473_v11 = vadd.f32 %v5308_v35, %v1418_v4  ;;  %v1747_v12 = vrot.slane %v5434_v27, 1  ;;  %v6771_v62 = vstv %s6762_s11  ;;  %v6772_v25 = vrot.slane %v5223_v16, 2 }
 0x1dd   :  { %v929_v24 = vmul.f32 %v6771_v62, %v4583_v59  ;;  %v817_v57 = vadd.f32 %v815_v26, %v6774_v32  ;;  %v873_v14 = vrot.slane %v869_v8, 1  ;;  %v6775_v2 = vstv %s6766_s9 }
 0x1de   :  { %v1799_v15 = vadd.f32 %v6772_v25, %v1739_v40  ;;  %v989_v53 = vmul.f32 %v6775_v2, %v4583_v59  ;;  %v6776_v60 = vrot.slane %v5298_v18, 1  ;;  %v1209_v37 = vadd.f32 %v1205_v20, %v1149_v51 }
 0x1df   :  { %v1807_v4 = vrot.slane %v5449_v41, 2  ;;  %v6779_v9 = vstv %s4325_s30  ;;  %v6780_v16 = vrot.slane %v5239_v22, 3  ;;  %v877_v32 = vadd.f32 %v873_v14, %v817_v57  ;;  %s6788_s30 = sld [smem:[#allocation93_spill]] }
 0x1e0   :  { %v1527_v35 = vadd.f32 %v6776_v60, %v1473_v11  ;;  %v5486_v62 = vmul.f32 %v6779_v9, %v4780_v55  ;;  %v933_v26 = vrot.slane %v929_v24, 2  ;;  %v6781_v8 = vstv %s6770_s12  ;;  %v6784_v11 = vld [vmem:[#allocation32_spill] sm:$0xff]  ;;  %v5499_v9 = vpop.permute.xlu0 %2159 }
 0x1e1   :  { %v1859_v40 = vadd.f32 %v6780_v16, %v1799_v15  ;;  %v1092_v59 = vmul.f32 %v6781_v8, %v4650_v3  ;;  %v6782_v18 = vrot.slane %v5303_v31, 2  ;;  %v1245_v20 = vadd.f32 %v6784_v11, %v1209_v37  ;;  %v6794_v16 = vld [vmem:[#allocation30_spill] sm:$0xff] }
 0x1e2   :  { %v993_v51 = vrot.slane %v989_v53, 3  ;;  %v6787_v25 = vstv %s6773_s18  ;;  %v937_v14 = vadd.f32 %v933_v26, %v877_v32  ;;  %v6790_v31 = vstv %s6777_s24 }
 0x1e3   :  { %v1587_v60 = vadd.f32 %v6782_v18, %v1527_v35  ;;  %v1038_v2 = vmul.f32 %v6787_v25, %v4650_v3  ;;  %v5502_v22 = vadd.f32 %v5228_v36, %v1859_v40  ;;  %v1152_v24 = vmul.f32 %v6790_v31, %v4650_v3  ;;  %v5510_v35 = vpop.permute.xlu1 %2161 }
 0x1e4   :  { %v6791_v15 = vstv %s6778_s2  ;;  %v6792_v53 = vrot.slane %v5313_v5, 3  ;;  %v6795_v8 = vrot.slane %v6794_v16, 1  ;;  %v1096_v40 = vrot.slane %v1092_v59, 1 }
 0x1e5   :  { %v1212_v57 = vmul.f32 %v6791_v15, %v4650_v3  ;;  %v997_v11 = vadd.f32 %v993_v51, %v937_v14  ;;  %v6796_v32 = vstv %s6783_s13  ;;  %v6797_v25 = vstv %s6785_s15 }
 0x1e6   :  { %v1647_v37 = vadd.f32 %v6792_v53, %v1587_v60  ;;  %v1299_v18 = vadd.f32 %v6795_v8, %v1245_v20  ;;  %v5520_v26 = vmul.f32 %v6796_v32, %v4682_v1  ;;  %v5525_v3 = vmul.f32 %v6797_v25, %v4682_v1  ;;  %v6800_v20 = vld [vmem:[#allocation31_spill] sm:$0xff] }
 0x1e7   :  { %v6798_v31 = vstv %s6786_s21  ;;  %v6801_v15 = vrot.slane %v6800_v20, 2  ;;  %v6802_v51 = vstv %s6788_s30  ;;  %v6803_v53 = vstv %s6789_s28 }
 0x1e8   :  { %v5530_v5 = vmul.f32 %v6798_v31, %v4682_v1  ;;  %v1696_v60 = vadd.f32 %v5322_v39, %v1647_v37  ;;  %v5538_v14 = vmul.f32 %v6802_v51, %v4682_v1  ;;  %v5543_v16 = vmul.f32 %v6803_v53, %v4750_v43  ;;  %v6806_v37 = vld [vmem:[#allocation33_spill] sm:$0xff] }
 0x1e9   :  { %v1359_v59 = vadd.f32 %v6801_v15, %v1299_v18  ;;  %v1040_v8 = vadd.f32 %v1038_v2, %v997_v11  ;;  %v1156_v32 = vrot.slane %v1152_v24, 2  ;;  %v1216_v25 = vrot.slane %v1212_v57, 3  ;;  %v5556_v2 = vpop.permute.xlu0 %2180  ;;  %v6812_v57 = vld [vmem:[#allocation15_spill] sm:$0xff] }
 0x1ea   :  { %v6804_v31 = vstv %s6793_s3  ;;  %v1750_v39 = vadd.f32 %v1746_v61, %v1696_v60  ;;  %v6807_v18 = vrot.slane %v6806_v37, 3  ;;  %v6808_v11 = vstv %s6799_s26  ;;  %v5567_v60 = vpop.permute.xlu1 %2182 }
 0x1eb   :  { %v5548_v36 = vmul.f32 %v6804_v31, %v4750_v43  ;;  %v1100_v24 = vadd.f32 %v1096_v40, %v1040_v8  ;;  %v5562_v51 = vmul.f32 %v6808_v11, %v4750_v43  ;;  %v6809_v54 = vstv %s4333_s17  ;;  %s5735_s17 = sld [smem:[#allocation3 + $0x8]] }
 0x1ec   :  { %v1419_v1 = vadd.f32 %v6807_v18, %v1359_v59  ;;  %v816_v61 = vmul.f32 %v6809_v54, %v4615_v0  ;;  %v1810_v59 = vadd.f32 %v1806_v6, %v1750_v39  ;;  %v6810_v8 = vstv %s6760_s22 }
 0x1ed   :  { %v870_v31 = vmul.f32 %v6810_v8, %v4615_v0  ;;  %v1160_v37 = vadd.f32 %v1156_v32, %v1100_v24  ;;  %v6811_v18 = vstv %s6805_s10  ;;  %v6813_v15 = vstv %s6762_s11 }
 0x1ee   :  { %v1474_v53 = vadd.f32 %v5422_v7, %v1419_v1  ;;  %v5579_v11 = vmul.f32 %v6811_v18, %v4750_v43  ;;  %v818_v54 = vadd.f32 %v816_v61, %v6812_v57  ;;  %v930_v20 = vmul.f32 %v6813_v15, %v4615_v0 }
 0x1ef   :  { %v6814_v38 = vrot.slane %v5362_v17, 3  ;;  %v6815_v7 = vrot.slane %v5410_v52, 1  ;;  %v874_v1 = vrot.slane %v870_v31, 1  ;;  %v6816_v32 = vstv %s6766_s9  ;;  %v6819_v31 = vld [vmem:[#allocation102_spill] sm:$0xff]  ;;  %s6877_s9 = sld [smem:[#allocation110_spill]] }
 0x1f0   :  { %v990_v24 = vmul.f32 %v6816_v32, %v4615_v0  ;;  %v1220_v8 = vadd.f32 %v1216_v25, %v1160_v37  ;;  %v5596_v15 = vsel %vm1898_vm10, %v5001_v33, %v5003_v13  ;;  %v6817_v17 = vstv %s6770_s12 }
 0x1f1   :  { %v1870_v6 = vadd.f32 %v6814_v38, %v1810_v59  ;;  %v1528_v39 = vadd.f32 %v6815_v7, %v1474_v53  ;;  %v1093_v57 = vmul.f32 %v6817_v17, %v4654_v23  ;;  %v6818_v61 = vrot.slane %v5415_v30, 2  ;;  %v5606_v53 = vpop.permute.xlu0 %2184  ;;  %v5616_v7 = vpop.permute.xlu1 %2203 }
 0x1f2   :  { %v878_v0 = vadd.f32 %v874_v1, %v818_v54  ;;  %v934_v25 = vrot.slane %v930_v20, 2  ;;  %v1250_v37 = vadd.f32 %v6819_v31, %v1220_v8  ;;  %v6820_v18 = vstv %s6777_s24  ;;  %v6824_v8 = vld [vmem:[#allocation39_spill] sm:$0xff]  ;;  %s5934_s24 = sld [smem:[#allocation3 + $0x98]] }
 0x1f3   :  { %v5602_v52 = vadd.f32 %v5344_v63, %v1870_v6  ;;  %v1588_v59 = vadd.f32 %v6818_v61, %v1528_v39  ;;  %v1153_v38 = vmul.f32 %v6820_v18, %v4654_v23  ;;  %v6821_v63 = vstv %s6778_s2  ;;  %s5940_s2 = sld [smem:[#allocation3 + $0xa1]] }
 0x1f4   :  { %v1213_v6 = vmul.f32 %v6821_v63, %v4654_v23  ;;  %v6822_v30 = vrot.slane %v5427_v50, 3  ;;  %v938_v54 = vadd.f32 %v934_v25, %v878_v0  ;;  %v994_v39 = vrot.slane %v990_v24, 3 }
 0x1f5   :  { %v6823_v1 = vstv %s6783_s13  ;;  %v6825_v17 = vrot.slane %v6824_v8, 1  ;;  %v6826_v31 = vstv %s6773_s18  ;;  %v1097_v33 = vrot.slane %v1093_v57, 1  ;;  %s5944_s13 = sld [smem:[#allocation3 + $0xaa]] }
 0x1f6   :  { %v1648_v20 = vadd.f32 %v6822_v30, %v1588_v59  ;;  %v5623_v32 = vmul.f32 %v6823_v1, %v4720_v58  ;;  %v1039_v18 = vmul.f32 %v6826_v31, %v4654_v23  ;;  %v6827_v63 = vstv %s6785_s15  ;;  %v6830_v30 = vld [vmem:[#allocation41_spill] sm:$0xff]  ;;  %s5954_s15 = sld [smem:[#allocation3 + $0xb3]] }
 0x1f7   :  { %v1310_v61 = vadd.f32 %v6825_v17, %v1250_v37  ;;  %v5633_v43 = vmul.f32 %v6827_v63, %v4720_v58  ;;  %v998_v24 = vadd.f32 %v994_v39, %v938_v54  ;;  %v6828_v59 = vstv %s6788_s30  ;;  %v6833_v63 = vld [vmem:[#allocation43_spill] sm:$0xff]  ;;  %v6841_v39 = vld [vmem:[#allocation21_spill] sm:$0xff]  ;;  %v6844_v54 = vld [vmem:[#allocation22_spill] sm:$0xff] }
 0x1f8   :  { %v1697_v50 = vadd.f32 %v5442_v42, %v1648_v20  ;;  %v5639_v0 = vmul.f32 %v6828_v59, %v4720_v58  ;;  %v6829_v25 = vstv %s6786_s21  ;;  %v6831_v23 = vrot.slane %v6830_v30, 2 }
 0x1f9   :  { %v5644_v37 = vmul.f32 %v6829_v25, %v4720_v58  ;;  %v1157_v1 = vrot.slane %v1153_v38, 2  ;;  %v1217_v8 = vrot.slane %v1213_v6, 3  ;;  %v6832_v17 = vstv %s6789_s28  ;;  %v5657_v58 = vpop.permute.xlu0 %2205 }
 0x1fa   :  { %v1370_v57 = vadd.f32 %v6831_v23, %v1310_v61  ;;  %v5651_v31 = vmul.f32 %v6832_v17, %v4780_v55  ;;  %v1751_v42 = vadd.f32 %v1747_v12, %v1697_v50  ;;  %v1041_v20 = vadd.f32 %v1039_v18, %v998_v24  ;;  %v5672_v12 = vpop.permute.xlu1 %2207  ;;  %v6837_v23 = vld [vmem:[#allocation19_spill] sm:$0xff] }
 0x1fb   :  { %v6834_v59 = vrot.slane %v6833_v63, 3  ;;  %v6835_v6 = vstv %s6793_s3  ;;  %v6836_v27 = vstv %s6799_s26  ;;  %v2003_v41 = vsel %vm1898_vm10, %v6837_v23, %v6841_v39  ;;  %v6849_v39 = vld [vmem:[#allocation105_spill] sm:$0xff] }
 0x1fc   :  { %v5665_v25 = vmul.f32 %v6835_v6, %v4780_v55  ;;  %v5670_v30 = vmul.f32 %v6836_v27, %v4780_v55  ;;  %v1811_v18 = vadd.f32 %v1807_v4, %v1751_v42  ;;  %v1101_v50 = vadd.f32 %v1097_v33, %v1041_v20  ;;  %v6840_v27 = vld [vmem:[#allocation16_spill] sm:$0xff]  ;;  %v6843_v20 = vld [vmem:[#allocation17_spill] sm:$0xff] }
 0x1fd   :  { %v1430_v61 = vadd.f32 %v6834_v59, %v1370_v57  ;;  %v6838_v57 = vld [vmem:[#allocation20_spill] sm:$0xff]  ;;  %v6839_v59 = vstv %s6805_s10  ;;  %v6842_v4 = vrot.slane %v5486_v62, 3  ;;  %v2007_v24 = vadd.f32 %v2003_v41, %v6843_v20  ;;  %v2331_v41 = vpop.permute.xlu0 %2330 }
 0x1fe   :  { %v2002_v17 = vsel %vm1898_vm10, %v6838_v57, %v6837_v23  ;;  %v5684_v6 = vmul.f32 %v6839_v59, %v4780_v55  ;;  %v1161_v42 = vadd.f32 %v1157_v1, %v1101_v50  ;;  %v6845_v57 = vld [vmem:[#allocation25_spill] sm:$0xff]  ;;  %v6847_v59 = vld [vmem:[#allocation23_spill] sm:$0xff]  ;;  %v2048_v62 = vsel %vm1898_vm10, %v6849_v39, %v5188_v34  ;;  %v6860_v39 = vld [vmem:[#allocation18_spill] sm:$0xff] }
 0x1ff   :  { %v1479_v63 = vadd.f32 %v5538_v14, %v1430_v61  ;;  %v2006_v38 = vadd.f32 %v2002_v17, %v6840_v27  ;;  %v1871_v33 = vadd.f32 %v6842_v4, %v1811_v18  ;;  %v2025_v14 = vsel %vm1898_vm10, %v6845_v57, %v6844_v54  ;;  %v6848_v17 = vld [vmem:[#allocation24_spill] sm:$0xff]  ;;  %v6851_v4 = vld [vmem:[#allocation106_spill] sm:$0xff] }
 0x200   :  { %v6846_v61 = vrot.slane %v5520_v26, 1  ;;  %v2029_v40 = vadd.f32 %v2025_v14, %v6847_v59  ;;  %v2026_v27 = vsel %vm1898_vm10, %v6844_v54, %v6848_v17  ;;  %v1221_v18 = vadd.f32 %v1217_v8, %v1161_v42  ;;  %v6852_v54 = vld [vmem:[#allocation107_spill] sm:$0xff]  ;;  %v2333_v8 = vpop.permute.xlu1 %2332 }
 0x201   :  { %v1964_v1 = vadd.f32 %v5454_v19, %v1871_v33  ;;  %v2030_v50 = vadd.f32 %v2026_v27, %v5286_v56  ;;  %v2052_v23 = vadd.f32 %v2048_v62, %v5396_v47  ;;  %v6850_v26 = vrot.slane %v5525_v3, 2  ;;  %v6853_v56 = vld [vmem:[#allocation103_spill] sm:$0xff] }
 0x202   :  { %v1539_v55 = vadd.f32 %v6846_v61, %v1479_v63  ;;  %v2049_v20 = vsel %vm1898_vm10, %v5188_v34, %v6851_v4  ;;  %v2071_v57 = vsel %vm1898_vm10, %v6852_v54, %v5232_v49  ;;  %v2072_v19 = vsel %vm1898_vm10, %v5232_v49, %v5263_v48  ;;  %v6856_v48 = vld [vmem:[#allocation26_spill] sm:$0xff]  ;;  %v6857_v49 = vld [vmem:[#allocation29_spill] sm:$0xff]  ;;  %v2335_v54 = vpop.permute.xlu0 %2334 }
 0x203   :  { %v1251_v33 = vadd.f32 %v6853_v56, %v1221_v18  ;;  %v2053_v47 = vadd.f32 %v2049_v20, %v5502_v22  ;;  %v2075_v3 = vadd.f32 %v2071_v57, %v5602_v52  ;;  %v2076_v42 = vadd.f32 %v2072_v19, %v1964_v1  ;;  %v6858_v22 = vld [vmem:[#allocation42_spill] sm:$0xff] }
 0x204   :  { %v1599_v63 = vadd.f32 %v6850_v26, %v1539_v55  ;;  %v6854_v14 = vrot.slane %v5530_v5, 3  ;;  %v2094_v34 = vsel %vm1898_vm10, %v5265_v28, %v5288_v29  ;;  %v6855_v55 = vld [vmem:[#allocation108_spill] sm:$0xff]  ;;  %v2117_v17 = vsel %vm1898_vm10, %v6857_v49, %v6856_v48 }
 0x205   :  { %v5730_v59 = vsel %vm1898_vm10, %v5288_v29, %v6855_v55  ;;  %v6859_v52 = vrot.slane %v6858_v22, 1  ;;  %v1819_v5 = vrot.slane %v5670_v30, 2  ;;  %v5743_v28 = vsel %vm1898_vm10, %v5003_v13, %v6860_v39  ;;  %v6861_v13 = vld [vmem:[#allocation101_spill] sm:$0xff] }
 0x206   :  { %v1659_v61 = vadd.f32 %v6854_v14, %v1599_v63  ;;  %v2118_v29 = vsel %vm1898_vm10, %v6856_v48, %v5371_v10  ;;  %v1879_v1 = vrot.slane %v5684_v6, 3  ;;  %v2140_v18 = vsel %vm1898_vm10, %v5393_v21, %v5403_v45 }
 0x207   :  { %v1311_v27 = vadd.f32 %v6859_v52, %v1251_v33  ;;  %v2141_v26 = vsel %vm1898_vm10, %v5403_v45, %v5456_v46  ;;  %v6862_v63 = vrot.slane %v6861_v13, 2  ;;  %v2121_v10 = vadd.f32 %v2117_v17, %v2006_v38  ;;  %v2227_v46 = vpop.permute.xlu1 %2226  ;;  %v6864_v33 = vld [vmem:[#allocation104_spill] sm:$0xff] }
 0x208   :  { %v1702_v62 = vadd.f32 %v5548_v36, %v1659_v61  ;;  %v2122_v20 = vadd.f32 %v2118_v29, %v2007_v24  ;;  %v6863_v36 = vrot.slane %v5543_v16, 1  ;;  %v3007_v19 = vmov 1966171168  }
 0x209   :  { %v1371_v4 = vadd.f32 %v6862_v63, %v1311_v27  ;;  %v2557_v56 = vunpack.c.l.s4 %v3007_v19  ;;  %v2163_v21 = vsel %vm1898_vm10, %v5467_v44, %v5499_v9  ;;  %v2164_v45 = vsel %vm1898_vm10, %v5499_v9, %v5510_v35  ;;  %v2229_v27 = vpop.permute.xlu0 %2228 }
 0x20a   :  { %v1762_v57 = vadd.f32 %v6863_v36, %v1702_v62  ;;  %v6865_v38 = vrot.slane %v6864_v33, 3  ;;  %v5774_v14 = vadd.f32 %v2140_v18, %v2029_v40  ;;  %v5776_v16 = vadd.f32 %v2141_v26, %v2030_v50 }
 0x20b   :  { %v2186_v61 = vsel %vm1898_vm10, %v5556_v2, %v5567_v60  ;;  %v6866_v44 = vrot.slane %v5562_v51, 2  ;;  %v6867_v48 = vlaneseq  ;;  %v5784_v35 = vadd.f32 %v2163_v21, %v2052_v23  ;;  %v2231_v62 = vpop.permute.xlu1 %2230 }
 0x20c   :  { %v1431_v24 = vadd.f32 %v6865_v38, %v1371_v4  ;;  %v2187_v49 = vsel %vm1898_vm10, %v5567_v60, %v5606_v53  ;;  %v2558_v50 = vunpack.c.0.s8 %v2557_v56  ;;  %v5790_v17 = vadd.f32 %v2164_v45, %v2053_v47 }
 0x20d   :  { %v1822_v55 = vadd.f32 %v6866_v44, %v1762_v57  ;;  %v2560_v9 = vshrl.u32 %v6867_v48, 7  ;;  %v5792_v2 = vadd.f32 %v2186_v61, %v2075_v3  ;;  %v6868_v51 = vrot.slane %v5579_v11, 3  ;;  %v2250_v38 = vpop.permute.xlu0 %2249 }
 0x20e   :  { %v1480_v40 = vadd.f32 %v5639_v0, %v1431_v24  ;;  %v5796_v52 = vadd.f32 %v2187_v49, %v2076_v42  ;;  %v5801_v23 = vsel %vm1898_vm10, %v5616_v7, %v5657_v58  ;;  %v6869_v60 = vrot.slane %v5623_v32, 1 }
 0x20f   :  { %v1882_v22 = vadd.f32 %v6868_v51, %v1822_v55  ;;  %v2337_v0 = vsel %vm2336_vm11, %v2331_v41, %v2333_v8  ;;  %v2338_v47 = vsel %vm2336_vm11, %v2333_v8, %v2335_v54  ;;  %v2374_v3 = vstv %s5748_s23 }
 0x210   :  { %v1540_v53 = vadd.f32 %v6869_v60, %v1480_v40  ;;  %v5813_v39 = vsel %vm4480_vm5, %v2337_v0, 0.0  ;;  %v2344_v7 = vstv %s5735_s17  ;;  %v2434_v29 = vstv %s5758_s6 }
 0x211   :  { %v1983_v11 = vadd.f32 %v5596_v15, %v1882_v22  ;;  %v6871_v32 = vrot.slane %v5633_v43, 2  ;;  %v5824_v8 = vsel %vm1898_vm10, %v5657_v58, %v5672_v12  ;;  %v2375_v18 = vmul.f32 %v2374_v3, %v5813_v39 }
 0x212   :  { %v2435_v15 = vmul.f32 %v2434_v29, %v5813_v39  ;;  %v5834_v63 = vsel %vm4521_vm6, %v2338_v47, 0.0  ;;  %v2494_v4 = vstv %s5770_s20  ;;  %v2232_v43 = vsel %vm1898_vm10, %v2227_v46, %v2229_v27 }
 0x213   :  { %v1600_v41 = vadd.f32 %v6871_v32, %v1540_v53  ;;  %v5830_v26 = vadd.f32 %v2094_v34, %v1983_v11  ;;  %v6873_v54 = vrot.slane %v5644_v37, 3  ;;  %v5840_v58 = vsub.s32 %v2558_v50, %v2560_v9  ;;  %v2252_v9 = vpop.permute.xlu1 %2251 }
 0x214   :  { %v2345_v12 = vmul.f32 %v2344_v7, %v5813_v39  ;;  %v2379_v57 = vrot.slane %v2375_v18, 1  ;;  %v2439_v19 = vrot.slane %v2435_v15, 2  ;;  %v2495_v34 = vmul.f32 %v2494_v4, %v5813_v39 }
 0x215   :  { %v1660_v36 = vadd.f32 %v6873_v54, %v1600_v41  ;;  %v2236_v56 = vadd.f32 %v2232_v43, %v2121_v10  ;;  %v2233_v21 = vsel %vm1898_vm10, %v2229_v27, %v2231_v62  ;;  %v2346_v37 = vmul.f32 %v2344_v7, %v5834_v63  ;;  %v2254_v62 = vpop.permute.xlu0 %2253 }
 0x216   :  { %v2237_v33 = vadd.f32 %v2233_v21, %v2122_v20  ;;  %v2376_v46 = vmul.f32 %v2374_v3, %v5834_v63  ;;  %v2436_v61 = vmul.f32 %v2434_v29, %v5834_v63  ;;  %v2496_v44 = vmul.f32 %v2494_v4, %v5834_v63 }
 0x217   :  { %v1703_v45 = vadd.f32 %v5665_v25, %v1660_v36  ;;  %v2347_v24 = vadd.f32 %v2345_v12, %v2236_v56  ;;  %v2350_v55 = vstv %s5803_s7  ;;  %v6874_v10 = vrot.slane %v5651_v31, 1  ;;  %v2273_v15 = vpop.permute.xlu1 %2272 }
 0x218   :  { %v2348_v40 = vadd.f32 %v2346_v37, %v2237_v33  ;;  %v2380_v25 = vrot.slane %v2376_v46, 1  ;;  %v2386_v20 = vstv %s5808_s4  ;;  %v2499_v50 = vrot.slane %v2495_v34, 3 }
 0x219   :  { %v1763_v49 = vadd.f32 %v6874_v10, %v1703_v45  ;;  %v2383_v51 = vadd.f32 %v2379_v57, %v2347_v24  ;;  %v2440_v22 = vrot.slane %v2436_v61, 2  ;;  %v2446_v60 = vstv %s5817_s27 }
 0x21a   :  { %v2384_v0 = vadd.f32 %v2380_v25, %v2348_v40  ;;  %v2506_v47 = vstv %s5828_s0  ;;  %v2255_v3 = vsel %vm1898_vm10, %v2250_v38, %v2252_v9  ;;  %v2351_v11 = vmul.f32 %v2350_v55, %v5813_v39  ;;  %v2275_v38 = vpop.permute.xlu0 %2274 }
 0x21b   :  { %v1823_v53 = vadd.f32 %v1819_v5, %v1763_v49  ;;  %v2443_v31 = vadd.f32 %v2439_v19, %v2383_v51  ;;  %v2259_v27 = vadd.f32 %v2255_v3, %v5774_v14  ;;  %v2387_v42 = vmul.f32 %v2386_v20, %v5813_v39 }
 0x21c   :  { %v2444_v30 = vadd.f32 %v2440_v22, %v2384_v0  ;;  %v2500_v5 = vrot.slane %v2496_v44, 3  ;;  %v2447_v29 = vmul.f32 %v2446_v60, %v5813_v39  ;;  %vm5872_vm12 = vcmp.lt.s32.totalorder %v6867_v48, 256  ;;  %v2277_v44 = vpop.permute.xlu1 %2276 }
 0x21d   :  { %v1883_v7 = vadd.f32 %v1879_v1, %v1823_v53  ;;  %v2353_v14 = vadd.f32 %v2351_v11, %v2259_v27  ;;  %v2391_v41 = vrot.slane %v2387_v42, 1  ;;  %v2507_v18 = vmul.f32 %v2506_v47, %v5813_v39 }
 0x21e   :  { %v2503_v1 = vadd.f32 %v2499_v50, %v2443_v31  ;;  %v2504_v13 = vadd.f32 %v2500_v5, %v2444_v30  ;;  %v2451_v4 = vrot.slane %v2447_v29, 2  ;;  %v2388_v54 = vmul.f32 %v2386_v20, %v5834_v63  ;;  %v2296_v29 = vpop.permute.xlu0 %2295 }
 0x21f   :  { %v1984_v6 = vadd.f32 %v5743_v28, %v1883_v7  ;;  %v2395_v43 = vadd.f32 %v2391_v41, %v2353_v14  ;;  %v2448_v48 = vmul.f32 %v2446_v60, %v5834_v63  ;;  %v2508_v36 = vmul.f32 %v2506_v47, %v5834_v63 }
 0x220   :  { %v2555_v57 = vcombine.low %v2503_v1, %v2504_v13  ;;  %v2661_v19 = vcombine.high %v2503_v1, %v2504_v13  ;;  %v2256_v28 = vsel %vm1898_vm10, %v2252_v9, %v2254_v62  ;;  %v5889_v34 = vadd.f32 %v5801_v23, %v5830_v26  ;;  %v2298_v62 = vpop.permute.xlu1 %2297 }
 0x221   :  { %v5884_v12 = vadd.f32 %v5730_v59, %v1984_v6  ;;  %v2455_v56 = vadd.f32 %v2451_v4, %v2395_v43  ;;  %v2511_v21 = vrot.slane %v2507_v18, 3  ;;  %v2352_v45 = vmul.f32 %v2350_v55, %v5834_v63 }
 0x222   :  { %v2562_v59 = vrot.slane %v2555_v57, %v5840_v58  ;;  %v2668_v33 = vrot.slane %v2661_v19, %v5840_v58  ;;  %v2392_v37 = vrot.slane %v2388_v54, 1  ;;  %v2260_v46 = vadd.f32 %v2256_v28, %v5776_v16 }
 0x223   :  { %v2452_v24 = vrot.slane %v2448_v48, 2  ;;  %v2356_v23 = vstv %s5855_s1  ;;  %v2398_v26 = vstv %s5861_s19  ;;  %v2458_v61 = vstv %s5866_s25 }
 0x224   :  { %v2569_v55 = vrot.slane %v2562_v59, %v5840_v58  ;;  %v2675_v9 = vrot.slane %v2668_v33, %v5840_v58  ;;  %v2512_v10 = vrot.slane %v2508_v36, 3  ;;  %v2354_v49 = vadd.f32 %v2352_v45, %v2260_v46 }
 0x225   :  { %v2399_v40 = vmul.f32 %v2398_v26, %v5813_v39  ;;  %v2459_v16 = vmul.f32 %v2458_v61, %v5813_v39  ;;  %v2518_v25 = vstv %s5877_s14  ;;  %v2278_v20 = vsel %vm1898_vm10, %v2273_v15, %v2275_v38 }
 0x226   :  { %2575 = vst.msk [vmem:[%s6877_s9] ss:$8 sm:$0x3] %vm5872_vm12, %v2569_v55  ;;  %2949 = vst.msk [vmem:[%s6877_s9 + $0x5] ss:$8 sm:$0x3] %vm5872_vm12, %v2675_v9  ;;  %v2396_v50 = vadd.f32 %v2392_v37, %v2354_v49  ;;  %v2357_v51 = vmul.f32 %v2356_v23, %v5813_v39  ;;  %v2282_v22 = vadd.f32 %v2278_v20, %v5784_v35  ;;  %v2410_v18 = vstv %s5897_s5 }
 0x227   :  { %v2279_v60 = vsel %vm1898_vm10, %v2275_v38, %v2277_v44  ;;  %v2515_v53 = vadd.f32 %v2511_v21, %v2455_v56  ;;  %v2519_v0 = vmul.f32 %v2518_v25, %v5813_v39  ;;  %v2358_v3 = vmul.f32 %v2356_v23, %v5834_v63  ;;  %v2319_v23 = vpop.permute.xlu1 %2318 }
 0x228   :  { %v2283_v47 = vadd.f32 %v2279_v60, %v5790_v17  ;;  %v2456_v31 = vadd.f32 %v2452_v24, %v2396_v50  ;;  %v2403_v27 = vrot.slane %v2399_v40, 1  ;;  %v2359_v11 = vadd.f32 %v2357_v51, %v2282_v22  ;;  %v2300_v24 = vpop.permute.xlu0 %2299 }
 0x229   :  { %v2400_v42 = vmul.f32 %v2398_v26, %v5834_v63  ;;  %v2463_v7 = vrot.slane %v2459_v16, 2  ;;  %v2460_v35 = vmul.f32 %v2458_v61, %v5834_v63  ;;  %v2520_v5 = vmul.f32 %v2518_v25, %v5834_v63 }
 0x22a   :  { %v2360_v30 = vadd.f32 %v2358_v3, %v2283_v47  ;;  %v2516_v14 = vadd.f32 %v2512_v10, %v2456_v31  ;;  %v2407_v17 = vadd.f32 %v2403_v27, %v2359_v11  ;;  %v2523_v15 = vrot.slane %v2519_v0, 3 }
 0x22b   :  { %v2404_v41 = vrot.slane %v2400_v42, 1  ;;  %v2464_v6 = vrot.slane %v2460_v35, 2  ;;  %v2362_v1 = vstv %s5892_s29  ;;  %v2470_v13 = vstv %s5902_s8  ;;  %v2323_v42 = vpop.permute.xlu1 %2322 }
 0x22c   :  { %v2579_v4 = vcombine.low %v2515_v53, %v2516_v14  ;;  %v2680_v43 = vcombine.high %v2515_v53, %v2516_v14  ;;  %v2467_v54 = vadd.f32 %v2463_v7, %v2407_v17  ;;  %v2530_v36 = vstv %s5910_s16  ;;  %v2321_v11 = vpop.permute.xlu0 %2320 }
 0x22d   :  { %v2408_v48 = vadd.f32 %v2404_v41, %v2360_v30  ;;  %v2301_v57 = vsel %vm1898_vm10, %v2296_v29, %v2298_v62  ;;  %v2411_v19 = vmul.f32 %v2410_v18, %v5813_v39  ;;  %v2471_v28 = vmul.f32 %v2470_v13, %v5813_v39 }
 0x22e   :  { %v2586_v56 = vrot.slane %v2579_v4, %v5840_v58  ;;  %v2687_v21 = vrot.slane %v2680_v43, %v5840_v58  ;;  %v2524_v59 = vrot.slane %v2520_v5, 3  ;;  %v2214_v33 = vadd.f32 %v5824_v8, %v5884_v12 }
 0x22f   :  { %v2468_v45 = vadd.f32 %v2464_v6, %v2408_v48  ;;  %v2527_v37 = vadd.f32 %v2523_v15, %v2467_v54  ;;  %v2305_v46 = vadd.f32 %v2301_v57, %v5792_v2  ;;  %v2363_v38 = vmul.f32 %v2362_v1, %v5813_v39 }
 0x230   :  { %v2593_v26 = vrot.slane %v2586_v56, %v5840_v58  ;;  %v2694_v61 = vrot.slane %v2687_v21, %v5840_v58  ;;  %v2531_v55 = vmul.f32 %v2530_v36, %v5813_v39  ;;  %v2415_v10 = vrot.slane %v2411_v19, 1 }
 0x231   :  { %v2528_v44 = vadd.f32 %v2524_v59, %v2468_v45  ;;  %v2365_v9 = vadd.f32 %v2363_v38, %v2305_v46  ;;  %v2475_v49 = vrot.slane %v2471_v28, 2  ;;  %v2412_v8 = vmul.f32 %v2410_v18, %v5834_v63 }
 0x232   :  { %2945 = vst.msk [vmem:[%s6877_s9 + $0x1] ss:$8 sm:$0x3] %vm5872_vm12, %v2593_v26  ;;  %2950 = vst.msk [vmem:[%s6877_s9 + $0x6] ss:$8 sm:$0x3] %vm5872_vm12, %v2694_v61  ;;  %v2472_v40 = vmul.f32 %v2470_v13, %v5834_v63  ;;  %v2302_v16 = vsel %vm1898_vm10, %v2298_v62, %v2300_v24  ;;  %v2364_v20 = vmul.f32 %v2362_v1, %v5834_v63  ;;  %v2368_v0 = vstv %s5934_s24 }
 0x233   :  { %v2600_v2 = vcombine.low %v2527_v37, %v2528_v44  ;;  %v2699_v12 = vcombine.high %v2527_v37, %v2528_v44  ;;  %v2419_v25 = vadd.f32 %v2415_v10, %v2365_v9  ;;  %v2532_v50 = vmul.f32 %v2530_v36, %v5834_v63 }
 0x234   :  { %v2306_v51 = vadd.f32 %v2302_v16, %v5796_v52  ;;  %v2535_v53 = vrot.slane %v2531_v55, 3  ;;  %v2416_v3 = vrot.slane %v2412_v8, 1  ;;  %v2422_v27 = vstv %s5940_s2 }
 0x235   :  { %v2607_v22 = vrot.slane %v2600_v2, %v5840_v58  ;;  %v2706_v60 = vrot.slane %v2699_v12, %v5840_v58  ;;  %v2479_v47 = vadd.f32 %v2475_v49, %v2419_v25  ;;  %v2476_v35 = vrot.slane %v2472_v40, 2 }
 0x236   :  { %v2366_v31 = vadd.f32 %v2364_v20, %v2306_v51  ;;  %v2482_v5 = vstv %s5944_s13  ;;  %v2536_v52 = vrot.slane %v2532_v50, 3  ;;  %v2369_v62 = vmul.f32 %v2368_v0, %v5813_v39 }
 0x237   :  { %v2614_v7 = vrot.slane %v2607_v22, %v5840_v58  ;;  %v2713_v30 = vrot.slane %v2706_v60, %v5840_v58  ;;  %v2423_v14 = vmul.f32 %v2422_v27, %v5813_v39  ;;  %v2539_v17 = vadd.f32 %v2535_v53, %v2479_v47 }
 0x238   :  { %v2420_v29 = vadd.f32 %v2416_v3, %v2366_v31  ;;  %v2483_v41 = vmul.f32 %v2482_v5, %v5813_v39  ;;  %v2324_v18 = vsel %vm1898_vm10, %v2319_v23, %v2321_v11  ;;  %v2325_v15 = vsel %vm1898_vm10, %v2321_v11, %v2323_v42 }
 0x239   :  { %2946 = vst.msk [vmem:[%s6877_s9 + $0x2] ss:$8 sm:$0x3] %vm5872_vm12, %v2614_v7  ;;  %2951 = vst.msk [vmem:[%s6877_s9 + $0x7] ss:$8 sm:$0x3] %vm5872_vm12, %v2713_v30  ;;  %v2542_v1 = vstv %s5954_s15  ;;  %v2328_v13 = vadd.f32 %v2324_v18, %v5889_v34  ;;  %v2329_v4 = vadd.f32 %v2325_v15, %v2214_v33  ;;  %v2370_v43 = vmul.f32 %v2368_v0, %v5834_v63 }
 0x23a   :  { %v2480_v6 = vadd.f32 %v2476_v35, %v2420_v29  ;;  %v2424_v54 = vmul.f32 %v2422_v27, %v5834_v63  ;;  %v2484_v48 = vmul.f32 %v2482_v5, %v5834_v63  ;;  %v2427_v57 = vrot.slane %v2423_v14, 1 }
 0x23b   :  { %v2371_v19 = vadd.f32 %v2369_v62, %v2328_v13  ;;  %v2543_v28 = vmul.f32 %v2542_v1, %v5813_v39  ;;  %v2372_v56 = vadd.f32 %v2370_v43, %v2329_v4  ;;  %v2544_v45 = vmul.f32 %v2542_v1, %v5834_v63 }
 0x23c   :  { %v2540_v36 = vadd.f32 %v2536_v52, %v2480_v6  ;;  %v2428_v21 = vrot.slane %v2424_v54, 1  ;;  %v2487_v46 = vrot.slane %v2483_v41, 2  ;;  %v2488_v38 = vrot.slane %v2484_v48, 2 }
 0x23d   :  { %v2431_v34 = vadd.f32 %v2427_v57, %v2371_v19  ;;  %v2547_v61 = vrot.slane %v2543_v28, 3  ;;  %v2548_v55 = vrot.slane %v2544_v45, 3 }
 0x23e   :  { %v2621_v59 = vcombine.low %v2539_v17, %v2540_v36  ;;  %v2718_v37 = vcombine.high %v2539_v17, %v2540_v36  ;;  %v2432_v33 = vadd.f32 %v2428_v21, %v2372_v56 }
 0x23f   :  { %v2491_v26 = vadd.f32 %v2487_v46, %v2431_v34 }
 0x240   :  { %v2628_v24 = vrot.slane %v2621_v59, %v5840_v58  ;;  %v2725_v23 = vrot.slane %v2718_v37, %v5840_v58  ;;  %v2492_v44 = vadd.f32 %v2488_v38, %v2432_v33 }
 0x241   :  { %v2551_v10 = vadd.f32 %v2547_v61, %v2491_v26 }
 0x242   :  { %v2635_v39 = vrot.slane %v2628_v24, %v5840_v58  ;;  %v2732_v9 = vrot.slane %v2725_v23, %v5840_v58  ;;  %v2552_v63 = vadd.f32 %v2548_v55, %v2492_v44 }
 0x244   :  { %2947 = vst.msk [vmem:[%s6877_s9 + $0x3] ss:$8 sm:$0x3] %vm5872_vm12, %v2635_v39  ;;  %2952 = vst.msk [vmem:[%s6877_s9 + $0x10] ss:$8 sm:$0x3] %vm5872_vm12, %v2732_v9  ;;  %v2642_v49 = vcombine.low %v2551_v10, %v2552_v63  ;;  %v2737_v8 = vcombine.high %v2551_v10, %v2552_v63 }
 0x246   :  { %v2649_v2 = vrot.slane %v2642_v49, %v5840_v58  ;;  %v2744_v12 = vrot.slane %v2737_v8, %v5840_v58 }
 0x248   :  { %v2656_v40 = vrot.slane %v2649_v2, %v5840_v58  ;;  %v2751_v16 = vrot.slane %v2744_v12, %v5840_v58 }
 0x24a   :  { %2948 = vst.msk [vmem:[%s6877_s9 + $0x4] ss:$8 sm:$0x3] %vm5872_vm12, %v2656_v40  ;;  %2953 = vst.msk [vmem:[%s6877_s9 + $0x11] ss:$8 sm:$0x3] %vm5872_vm12, %v2751_v16 }
 0x24b   :  { %2760 = vsyncpa [#allocation4], 1 }
 0x24c   :  { %2761 = vsyncpa [#allocation6], 1 }

</bundles_post_ra>
